<compile_context>
chip_gen: v6e
topology: v6e:2x2x1
jax: 0.10.0
libtpu: 0.0.40
codegen_flags: <defaults>
</compile_context>

<pallas_src>
import functools

import jax
import jax.numpy as jnp
from jax.experimental import pallas as pl
from jax.experimental.pallas import tpu as pltpu

Z_DIM = 100
NUM_CLASSES = 10
IMAGE_SIZE = 28 * 28          # 784
IMAGE_SIZE_PAD = 896          # 7 * 128 -> lane-dense output stores
K1_PAD = 128                  # z_dim + num_classes = 110, padded to one MXU K pass
H1, H2, H3 = 256, 512, 512


def _leaky_relu(x, slope=0.2):
    return jnp.where(x >= 0, x, slope * x)


def _round_up(x, m):
    return (x + m - 1) // m * m


def generator_kernel(x_ref, w1_ref, b1_ref, w2_ref, b2_ref,
                     w3_ref, b3_ref, w4_ref, b4_ref, out_ref):
    """One batch tile: 4 lane-dense matmuls + LeakyReLU / Tanh epilogues."""
    f32 = jnp.float32
    mm = x_ref.dtype   # matmul-operand dtype (bf16 or f32); accumulate in f32.

    # Layer 1 (embedding + concat already fused/padded into x and W1)
    h = jnp.dot(x_ref[...], w1_ref[...], preferred_element_type=f32) + b1_ref[...]
    h = _leaky_relu(h)

    # Layer 2
    h = jnp.dot(h.astype(mm), w2_ref[...], preferred_element_type=f32) + b2_ref[...]
    h = _leaky_relu(h)

    # Layer 3
    h = jnp.dot(h.astype(mm), w3_ref[...], preferred_element_type=f32) + b3_ref[...]
    h = _leaky_relu(h)

    # Layer 4 + Tanh (N padded to 896; padded cols are exactly 0 -> tanh(0)=0)
    h = jnp.dot(h.astype(mm), w4_ref[...], preferred_element_type=f32) + b4_ref[...]
    out_ref[...] = jnp.tanh(h)


@functools.partial(jax.jit, static_argnames=("batch_tile", "matmul_dtype"))
def generator_forward(z, labels, params, batch_tile=256, matmul_dtype=jnp.bfloat16):
    """z: (B, 100) f32, labels: (B,) int32 -> (B, 784) f32.

    batch_tile : rows per grid step. 256 fills the v6e/v7x MXU; use 128 on v5e.
    matmul_dtype: jnp.bfloat16 (fast path) or jnp.float32 (exact checking).
    """
    B = z.shape[0]

    # ---- layer-1 fusion on the host: x = [z | emb[labels]], zero-pad K to 128 ----
    c = params["emb"][labels]                                      # (B, 10)
    x = jnp.concatenate([z, c], axis=1)                            # (B, 110)
    x = jnp.pad(x, ((0, 0), (0, K1_PAD - x.shape[1])))             # (B, 128)
    w1 = jnp.pad(params["w1"],
                 ((0, K1_PAD - params["w1"].shape[0]), (0, 0)))    # (128, 256)

    # ---- lane-dense output: zero-pad W4/b4 columns 784 -> 896 ----
    w4 = jnp.pad(params["w4"], ((0, 0), (0, IMAGE_SIZE_PAD - IMAGE_SIZE)))
    b4 = jnp.pad(params["b4"], (0, IMAGE_SIZE_PAD - IMAGE_SIZE))[None, :]

    w2, w3 = params["w2"], params["w3"]
    b1 = params["b1"][None, :]
    b2 = params["b2"][None, :]
    b3 = params["b3"][None, :]

    # Matmul operands in bf16 (or f32); biases stay f32 (added post-accumulate).
    x = x.astype(matmul_dtype)
    w1, w2, w3, w4 = (w.astype(matmul_dtype) for w in (w1, w2, w3, w4))

    # ---- batch tiling: single step for small B, big MXU-filling tiles otherwise ----
    tb = min(batch_tile, _round_up(B, 8))
    Bp = _round_up(B, tb)
    if Bp != B:
        x = jnp.pad(x, ((0, Bp - B), (0, 0)))
    grid = (Bp // tb,)

    def batch_spec(feat):
        return pl.BlockSpec((tb, feat), lambda i: (i, 0))

    def full_spec(shape):
        return pl.BlockSpec(shape, lambda i: (0,) * len(shape))

    out = pl.pallas_call(
        generator_kernel,
        out_shape=jax.ShapeDtypeStruct((Bp, IMAGE_SIZE_PAD), jnp.float32),
        grid_spec=pltpu.PrefetchScalarGridSpec(
            num_scalar_prefetch=0,
            grid=grid,
            in_specs=[
                batch_spec(K1_PAD),                        # x tile (TB, 128)
                full_spec(w1.shape), full_spec(b1.shape),  # layer 1
                full_spec(w2.shape), full_spec(b2.shape),  # layer 2
                full_spec(w3.shape), full_spec(b3.shape),  # layer 3
                full_spec(w4.shape), full_spec(b4.shape),  # layer 4
            ],
            out_specs=batch_spec(IMAGE_SIZE_PAD),
        ),
        compiler_params=pltpu.CompilerParams(
            # Batch tiles are independent -> shards across v7x's 2 TensorCores.
            dimension_semantics=("parallel",)),
    )(x, w1, b1, w2, b2, w3, b3, w4, b4)

    return out[:B, :IMAGE_SIZE]


def init_params(key):
    """Deterministic synthetic parameters matching the PyTorch module's shapes."""
    ks = jax.random.split(key, 9)
    scale = 0.02

    def lin(k, fan_in, fan_out):
        return scale * jax.random.normal(k, (fan_in, fan_out), jnp.float32)

    return {
        "emb": scale * jax.random.normal(ks[0], (NUM_CLASSES, NUM_CLASSES), jnp.float32),
        "w1": lin(ks[1], Z_DIM + NUM_CLASSES, H1),
        "b1": scale * jax.random.normal(ks[2], (H1,), jnp.float32),
        "w2": lin(ks[3], H1, H2),
        "b2": scale * jax.random.normal(ks[4], (H2,), jnp.float32),
        "w3": lin(ks[5], H2, H3),
        "b3": scale * jax.random.normal(ks[6], (H3,), jnp.float32),
        "w4": lin(ks[7], H3, IMAGE_SIZE),
        "b4": scale * jax.random.normal(ks[8], (IMAGE_SIZE,), jnp.float32),
    }


def reference_forward(z, labels, params):
    """Plain-JAX reference mirroring the PyTorch forward exactly."""
    c = params["emb"][labels]
    x = jnp.concatenate([z, c], axis=1)
    h = x @ params["w1"] + params["b1"]
    h = jnp.where(h >= 0, h, 0.2 * h)
    h = h @ params["w2"] + params["b2"]
    h = jnp.where(h >= 0, h, 0.2 * h)
    h = h @ params["w3"] + params["b3"]
    h = jnp.where(h >= 0, h, 0.2 * h)
    return jnp.tanh(h @ params["w4"] + params["b4"])


if __name__ == "__main__":
    key = jax.random.PRNGKey(0)
    k_param, k_z, k_lab = jax.random.split(key, 3)
    params = init_params(k_param)

    # --- small / latency-style batch: single grid step, f32 matmuls, tight check ---
    B_small = 16
    z_s = jax.random.normal(k_z, (B_small, Z_DIM), jnp.float32)
    lab_s = jax.random.randint(k_lab, (B_small,), 0, NUM_CLASSES, dtype=jnp.int32)
    out_s = jax.block_until_ready(
        generator_forward(z_s, lab_s, params, matmul_dtype=jnp.float32))
    ref_s = reference_forward(z_s, lab_s, params)
    assert out_s.shape == (B_small, IMAGE_SIZE)
    assert jnp.allclose(out_s, ref_s, atol=1e-5, rtol=1e-5), "f32 mismatch vs reference"

    # --- throughput-style batch: 2 grid steps (TB=256), bf16 matmuls, f32 accumulate ---
    B_big = 512
    z_b = jax.random.normal(jax.random.fold_in(k_z, 1), (B_big, Z_DIM), jnp.float32)
    lab_b = jax.random.randint(jax.random.fold_in(k_lab, 1), (B_big,), 0,
                               NUM_CLASSES, dtype=jnp.int32)
    out_b = jax.block_until_ready(
        generator_forward(z_b, lab_b, params, matmul_dtype=jnp.bfloat16))
    ref_b = reference_forward(z_b, lab_b, params)
    assert out_b.shape == (B_big, IMAGE_SIZE)
    assert float(jnp.max(jnp.abs(out_b - ref_b))) < 2e-2, "bf16 mismatch vs reference"

    print("KERNEL_OK")
</pallas_src>

<mosaic_0001>
module attributes {stable_mosaic.version = 11 : i64} {
  func.func @generator_kernel(%arg0: i32, %arg1: memref<16x128xf32, #tpu.memory_space<vmem>>, %arg2: memref<128x256xf32, #tpu.memory_space<vmem>>, %arg3: memref<1x256xf32, #tpu.memory_space<vmem>>, %arg4: memref<256x512xf32, #tpu.memory_space<vmem>>, %arg5: memref<1x512xf32, #tpu.memory_space<vmem>>, %arg6: memref<512x512xf32, #tpu.memory_space<vmem>>, %arg7: memref<1x512xf32, #tpu.memory_space<vmem>>, %arg8: memref<512x896xf32, #tpu.memory_space<vmem>>, %arg9: memref<1x896xf32, #tpu.memory_space<vmem>>, %arg10: memref<16x896xf32, #tpu.memory_space<vmem>>) attributes {dimension_semantics = [#tpu.dimension_semantics<parallel>], iteration_bounds = array<i64: 1>, scalar_prefetch = 0 : i64, scratch_operands = 0 : i64, tpu.core_type = #tpu.core_type<tc>, window_params = [{transform_indices = @transform_0, window_bounds = array<i64: 16, 128>}, {pipeline_mode = #tpu.pipeline_mode<synchronous>, transform_indices = @transform_1, window_bounds = array<i64: 128, 256>}, {pipeline_mode = #tpu.pipeline_mode<synchronous>, transform_indices = @transform_2, window_bounds = array<i64: 1, 256>}, {pipeline_mode = #tpu.pipeline_mode<synchronous>, transform_indices = @transform_3, window_bounds = array<i64: 256, 512>}, {pipeline_mode = #tpu.pipeline_mode<synchronous>, transform_indices = @transform_4, window_bounds = array<i64: 1, 512>}, {pipeline_mode = #tpu.pipeline_mode<synchronous>, transform_indices = @transform_5, window_bounds = array<i64: 512, 512>}, {pipeline_mode = #tpu.pipeline_mode<synchronous>, transform_indices = @transform_6, window_bounds = array<i64: 1, 512>}, {pipeline_mode = #tpu.pipeline_mode<synchronous>, transform_indices = @transform_7, window_bounds = array<i64: 512, 896>}, {pipeline_mode = #tpu.pipeline_mode<synchronous>, transform_indices = @transform_8, window_bounds = array<i64: 1, 896>}, {transform_indices = @transform_9, window_bounds = array<i64: 16, 896>}]} {
    %c0 = arith.constant 0 : index
    %c0_0 = arith.constant 0 : index
    %0 = vector.load %arg1[%c0, %c0_0] : memref<16x128xf32, #tpu.memory_space<vmem>>, vector<16x128xf32>
    %c0_1 = arith.constant 0 : index
    %c0_2 = arith.constant 0 : index
    %1 = vector.load %arg2[%c0_1, %c0_2] : memref<128x256xf32, #tpu.memory_space<vmem>>, vector<128x256xf32>
    %cst = arith.constant dense<0.000000e+00> : vector<16x256xf32>
    %2 = tpu.matmul %0, %1, %cst {dimension_numbers = #tpu.dot_dimension_numbers<[1], [0], [0], [1], [0, 0, 1, 1], [], []>} : vector<16x128xf32>, vector<128x256xf32>, vector<16x256xf32> -> vector<16x256xf32>
    %c0_3 = arith.constant 0 : index
    %c0_4 = arith.constant 0 : index
    %3 = vector.load %arg3[%c0_3, %c0_4] : memref<1x256xf32, #tpu.memory_space<vmem>>, vector<1x256xf32>
    %4 = vector.broadcast %3 : vector<1x256xf32> to vector<16x256xf32>
    %5 = arith.addf %2, %4 : vector<16x256xf32>
    %cst_5 = arith.constant 0.000000e+00 : f32
    %6 = vector.broadcast %cst_5 : f32 to vector<16x256xf32>
    %7 = arith.cmpf oge, %5, %6 : vector<16x256xf32>
    %cst_6 = arith.constant 2.000000e-01 : f32
    %8 = vector.broadcast %cst_6 : f32 to vector<16x256xf32>
    %9 = arith.mulf %8, %5 : vector<16x256xf32>
    %10 = arith.select %7, %5, %9 : vector<16x256xi1>, vector<16x256xf32>
    %c0_7 = arith.constant 0 : index
    %c0_8 = arith.constant 0 : index
    %11 = vector.load %arg4[%c0_7, %c0_8] : memref<256x512xf32, #tpu.memory_space<vmem>>, vector<256x512xf32>
    %cst_9 = arith.constant dense<0.000000e+00> : vector<16x512xf32>
    %12 = tpu.matmul %10, %11, %cst_9 {dimension_numbers = #tpu.dot_dimension_numbers<[1], [0], [0], [1], [0, 0, 1, 1], [], []>} : vector<16x256xf32>, vector<256x512xf32>, vector<16x512xf32> -> vector<16x512xf32>
    %c0_10 = arith.constant 0 : index
    %c0_11 = arith.constant 0 : index
    %13 = vector.load %arg5[%c0_10, %c0_11] : memref<1x512xf32, #tpu.memory_space<vmem>>, vector<1x512xf32>
    %14 = vector.broadcast %13 : vector<1x512xf32> to vector<16x512xf32>
    %15 = arith.addf %12, %14 : vector<16x512xf32>
    %cst_12 = arith.constant 0.000000e+00 : f32
    %16 = vector.broadcast %cst_12 : f32 to vector<16x512xf32>
    %17 = arith.cmpf oge, %15, %16 : vector<16x512xf32>
    %cst_13 = arith.constant 2.000000e-01 : f32
    %18 = vector.broadcast %cst_13 : f32 to vector<16x512xf32>
    %19 = arith.mulf %18, %15 : vector<16x512xf32>
    %20 = arith.select %17, %15, %19 : vector<16x512xi1>, vector<16x512xf32>
    %c0_14 = arith.constant 0 : index
    %c0_15 = arith.constant 0 : index
    %21 = vector.load %arg6[%c0_14, %c0_15] : memref<512x512xf32, #tpu.memory_space<vmem>>, vector<512x512xf32>
    %cst_16 = arith.constant dense<0.000000e+00> : vector<16x512xf32>
    %22 = tpu.matmul %20, %21, %cst_16 {dimension_numbers = #tpu.dot_dimension_numbers<[1], [0], [0], [1], [0, 0, 1, 1], [], []>} : vector<16x512xf32>, vector<512x512xf32>, vector<16x512xf32> -> vector<16x512xf32>
    %c0_17 = arith.constant 0 : index
    %c0_18 = arith.constant 0 : index
    %23 = vector.load %arg7[%c0_17, %c0_18] : memref<1x512xf32, #tpu.memory_space<vmem>>, vector<1x512xf32>
    %24 = vector.broadcast %23 : vector<1x512xf32> to vector<16x512xf32>
    %25 = arith.addf %22, %24 : vector<16x512xf32>
    %cst_19 = arith.constant 0.000000e+00 : f32
    %26 = vector.broadcast %cst_19 : f32 to vector<16x512xf32>
    %27 = arith.cmpf oge, %25, %26 : vector<16x512xf32>
    %cst_20 = arith.constant 2.000000e-01 : f32
    %28 = vector.broadcast %cst_20 : f32 to vector<16x512xf32>
    %29 = arith.mulf %28, %25 : vector<16x512xf32>
    %30 = arith.select %27, %25, %29 : vector<16x512xi1>, vector<16x512xf32>
    %c0_21 = arith.constant 0 : index
    %c0_22 = arith.constant 0 : index
    %31 = vector.load %arg8[%c0_21, %c0_22] : memref<512x896xf32, #tpu.memory_space<vmem>>, vector<512x896xf32>
    %cst_23 = arith.constant dense<0.000000e+00> : vector<16x896xf32>
    %32 = tpu.matmul %30, %31, %cst_23 {dimension_numbers = #tpu.dot_dimension_numbers<[1], [0], [0], [1], [0, 0, 1, 1], [], []>} : vector<16x512xf32>, vector<512x896xf32>, vector<16x896xf32> -> vector<16x896xf32>
    %c0_24 = arith.constant 0 : index
    %c0_25 = arith.constant 0 : index
    %33 = vector.load %arg9[%c0_24, %c0_25] : memref<1x896xf32, #tpu.memory_space<vmem>>, vector<1x896xf32>
    %34 = vector.broadcast %33 : vector<1x896xf32> to vector<16x896xf32>
    %35 = arith.addf %32, %34 : vector<16x896xf32>
    %36 = math.tanh %35 : vector<16x896xf32>
    %c0_26 = arith.constant 0 : index
    %c0_27 = arith.constant 0 : index
    %37 = vector.load %arg10[%c0_26, %c0_27] : memref<16x896xf32, #tpu.memory_space<vmem>>, vector<16x896xf32>
    tpu.vector_store %arg10[%c0_26, %c0_27], %36 {strides = array<i32>} : memref<16x896xf32, #tpu.memory_space<vmem>>, vector<16x896xf32>,
    return
  }
  func.func @transform_0(%arg0: i32) -> (i32, i32) {
    %c0_i32 = arith.constant 0 : i32
    %c0_i32_0 = arith.constant 0 : i32
    return %arg0, %c0_i32 : i32, i32
  }
  func.func @transform_1(%arg0: i32) -> (i32, i32) {
    %c0_i32 = arith.constant 0 : i32
    %c0_i32_0 = arith.constant 0 : i32
    %c0_i32_1 = arith.constant 0 : i32
    return %c0_i32, %c0_i32_0 : i32, i32
  }
  func.func @transform_2(%arg0: i32) -> (i32, i32) {
    %c0_i32 = arith.constant 0 : i32
    %c0_i32_0 = arith.constant 0 : i32
    %c0_i32_1 = arith.constant 0 : i32
    return %c0_i32, %c0_i32_0 : i32, i32
  }
  func.func @transform_3(%arg0: i32) -> (i32, i32) {
    %c0_i32 = arith.constant 0 : i32
    %c0_i32_0 = arith.constant 0 : i32
    %c0_i32_1 = arith.constant 0 : i32
    return %c0_i32, %c0_i32_0 : i32, i32
  }
  func.func @transform_4(%arg0: i32) -> (i32, i32) {
    %c0_i32 = arith.constant 0 : i32
    %c0_i32_0 = arith.constant 0 : i32
    %c0_i32_1 = arith.constant 0 : i32
    return %c0_i32, %c0_i32_0 : i32, i32
  }
  func.func @transform_5(%arg0: i32) -> (i32, i32) {
    %c0_i32 = arith.constant 0 : i32
    %c0_i32_0 = arith.constant 0 : i32
    %c0_i32_1 = arith.constant 0 : i32
    return %c0_i32, %c0_i32_0 : i32, i32
  }
  func.func @transform_6(%arg0: i32) -> (i32, i32) {
    %c0_i32 = arith.constant 0 : i32
    %c0_i32_0 = arith.constant 0 : i32
    %c0_i32_1 = arith.constant 0 : i32
    return %c0_i32, %c0_i32_0 : i32, i32
  }
  func.func @transform_7(%arg0: i32) -> (i32, i32) {
    %c0_i32 = arith.constant 0 : i32
    %c0_i32_0 = arith.constant 0 : i32
    %c0_i32_1 = arith.constant 0 : i32
    return %c0_i32, %c0_i32_0 : i32, i32
  }
  func.func @transform_8(%arg0: i32) -> (i32, i32) {
    %c0_i32 = arith.constant 0 : i32
    %c0_i32_0 = arith.constant 0 : i32
    %c0_i32_1 = arith.constant 0 : i32
    return %c0_i32, %c0_i32_0 : i32, i32
  }
  func.func @transform_9(%arg0: i32) -> (i32, i32) {
    %c0_i32 = arith.constant 0 : i32
    %c0_i32_0 = arith.constant 0 : i32
    return %arg0, %c0_i32 : i32, i32
  }
}

</mosaic_0001>

<bundles_post_ra>
// kernel: generator_forward.1
= control target key start
LH: loop header
LB: loop body
LE: loop exit
PB: predicated region body
PF: predicated region fallthrough
CT: control target
= control target key end

     0   :  { %v2409_v4 = vmov 0.0   ;;  %s5292_s0 = inlined_call_operand.vmem [shape: f32[16,128], index: 0, kind: input, shape index: {}]   ;;  %s5293_s1 = inlined_call_operand.vmem [shape: f32[128,256], index: 1, kind: input, shape index: {}]   ;;  %s5294_s2 = inlined_call_operand.vmem [shape: f32[1,256], index: 2, kind: input, shape index: {}]   ;;  %s5295_s3 = inlined_call_operand.vmem [shape: f32[256,512], index: 3, kind: input, shape index: {}]   ;;  %s5296_s4 = inlined_call_operand.vmem [shape: f32[1,512], index: 4, kind: input, shape index: {}]   ;;  %s5297_s5 = inlined_call_operand.vmem [shape: f32[512,512], index: 5, kind: input, shape index: {}]   ;;  %s5298_s6 = inlined_call_operand.vmem [shape: f32[1,512], index: 6, kind: input, shape index: {}]   ;;  %s5299_s7 = inlined_call_operand.vmem [shape: f32[512,896], index: 7, kind: input, shape index: {}]   ;;  %s5300_s8 = inlined_call_operand.vmem [shape: f32[1,896], index: 8, kind: input, shape index: {}]   ;;  %s5301_s9 = inlined_call_operand.hbm [shape: f32[16,896], index: 9, kind: output, shape index: {}]  }
   0x1   :  { %v66_v0 = vld [vmem:[%s5293_s1 + $0xf8] sm:$0xff]  ;;  %v65_v1 = vld [vmem:[%s5293_s1 + $0xf0] sm:$0xff]  ;;  %v64_v2 = vld [vmem:[%s5293_s1 + $0xe8] sm:$0xff]  ;;  %143 = vmatprep.mubr.f32.mxu0 %v2409_v4 }
   0x2   :  { %79 = vmatprep.subr.mxu0 %v66_v0  ;;  %v63_v3 = vld [vmem:[%s5293_s1 + $0xe0] sm:$0xff]  ;;  %v62_v5 = vld [vmem:[%s5293_s1 + $0xd8] sm:$0xff]  ;;  %v61_v6 = vld [vmem:[%s5293_s1 + $0xd0] sm:$0xff] }
   0x3   :  { %80 = vmatpush1.msra.mxu0 %v65_v1  ;;  %v60_v7 = vld [vmem:[%s5293_s1 + $0xc8] sm:$0xff]  ;;  %v59_v8 = vld [vmem:[%s5293_s1 + $0xc0] sm:$0xff]  ;;  %v58_v9 = vld [vmem:[%s5293_s1 + $0xb8] sm:$0xff] }
   0x4   :  { %81 = vmatprep.subr.mxu0 %v64_v2  ;;  %v57_v10 = vld [vmem:[%s5293_s1 + $0xb0] sm:$0xff]  ;;  %v56_v11 = vld [vmem:[%s5293_s1 + $0xa8] sm:$0xff]  ;;  %v55_v12 = vld [vmem:[%s5293_s1 + $0xa0] sm:$0xff] }
   0x5   :  { %82 = vmatpush1.msra.mxu0 %v63_v3  ;;  %v54_v13 = vld [vmem:[%s5293_s1 + $0x98] sm:$0xff]  ;;  %v53_v14 = vld [vmem:[%s5293_s1 + $0x90] sm:$0xff]  ;;  %v229_v15 = vld [vmem:[%s5295_s3 + $0x1e8] sm:$0xff] }
   0x6   :  { %83 = vmatprep.subr.mxu0 %v62_v5  ;;  %v52_v16 = vld [vmem:[%s5293_s1 + $0x88] sm:$0xff]  ;;  %318 = vmatprep.subr.mxu1 %v229_v15  ;;  %v228_v17 = vld [vmem:[%s5295_s3 + $0x1e0] sm:$0xff]  ;;  %v50_v21 = vld [vmem:[%s5293_s1 + $0x78] sm:$0xff] }
   0x7   :  { %84 = vmatpush1.msra.mxu0 %v61_v6  ;;  %v225_v18 = vld [vmem:[%s5295_s3 + $0x1c8] sm:$0xff]  ;;  %v51_v19 = vld [vmem:[%s5293_s1 + $0x80] sm:$0xff]  ;;  %319 = vmatpush1.msra.mxu1 %v228_v17  ;;  %v49_v24 = vld [vmem:[%s5293_s1 + $0x70] sm:$0xff] }
   0x8   :  { %85 = vmatprep.subr.mxu0 %v60_v7  ;;  %v224_v20 = vld [vmem:[%s5295_s3 + $0x1c0] sm:$0xff]  ;;  %320 = vmatprep.subr.mxu1 %v225_v18  ;;  %v221_v22 = vld [vmem:[%s5295_s3 + $0x1a8] sm:$0xff]  ;;  %v46_v30 = vld [vmem:[%s5293_s1 + $0x58] sm:$0xff] }
   0x9   :  { %86 = vmatpush1.msra.mxu0 %v59_v8  ;;  %v220_v23 = vld [vmem:[%s5295_s3 + $0x1a0] sm:$0xff]  ;;  %321 = vmatpush1.msra.mxu1 %v224_v20  ;;  %v217_v25 = vld [vmem:[%s5295_s3 + $0x188] sm:$0xff]  ;;  %v45_v32 = vld [vmem:[%s5293_s1 + $0x50] sm:$0xff] }
   0xa   :  { %87 = vmatprep.subr.mxu0 %v58_v9  ;;  %v48_v26 = vld [vmem:[%s5293_s1 + $0x68] sm:$0xff]  ;;  %322 = vmatprep.subr.mxu1 %v221_v22  ;;  %v216_v27 = vld [vmem:[%s5295_s3 + $0x180] sm:$0xff]  ;;  %v42_v38 = vld [vmem:[%s5293_s1 + $0x38] sm:$0xff] }
   0xb   :  { %88 = vmatpush1.msra.mxu0 %v57_v10  ;;  %v47_v28 = vld [vmem:[%s5293_s1 + $0x60] sm:$0xff]  ;;  %323 = vmatpush1.msra.mxu1 %v220_v23  ;;  %v213_v29 = vld [vmem:[%s5295_s3 + $0x168] sm:$0xff]  ;;  %v41_v40 = vld [vmem:[%s5293_s1 + $0x30] sm:$0xff] }
   0xc   :  { %89 = vmatprep.subr.mxu0 %v56_v11  ;;  %324 = vmatprep.subr.mxu1 %v217_v25  ;;  %v212_v31 = vld [vmem:[%s5295_s3 + $0x160] sm:$0xff]  ;;  %v209_v33 = vld [vmem:[%s5295_s3 + $0x148] sm:$0xff]  ;;  %v38_v46 = vld [vmem:[%s5293_s1 + $0x18] sm:$0xff] }
   0xd   :  { %90 = vmatpush1.msra.mxu0 %v55_v12  ;;  %325 = vmatpush1.msra.mxu1 %v216_v27  ;;  %v44_v34 = vld [vmem:[%s5293_s1 + $0x48] sm:$0xff]  ;;  %v208_v35 = vld [vmem:[%s5295_s3 + $0x140] sm:$0xff]  ;;  %v37_v48 = vld [vmem:[%s5293_s1 + $0x10] sm:$0xff] }
   0xe   :  { %91 = vmatprep.subr.mxu0 %v54_v13  ;;  %326 = vmatprep.subr.mxu1 %v213_v29  ;;  %v43_v36 = vld [vmem:[%s5293_s1 + $0x40] sm:$0xff]  ;;  %v205_v37 = vld [vmem:[%s5295_s3 + $0x128] sm:$0xff]  ;;  %v231_v55 = vld [vmem:[%s5295_s3 + $0x1f8] sm:$0xff] }
   0xf   :  { %92 = vmatpush1.msra.mxu0 %v53_v14  ;;  %327 = vmatpush1.msra.mxu1 %v212_v31  ;;  %v204_v39 = vld [vmem:[%s5295_s3 + $0x120] sm:$0xff]  ;;  %v201_v41 = vld [vmem:[%s5295_s3 + $0x108] sm:$0xff]  ;;  %v230_v56 = vld [vmem:[%s5295_s3 + $0x1f0] sm:$0xff] }
  0x10   :  { %93 = vmatprep.subr.mxu0 %v52_v16  ;;  %328 = vmatprep.subr.mxu1 %v209_v33  ;;  %v40_v42 = vld [vmem:[%s5293_s1 + $0x28] sm:$0xff]  ;;  %v200_v43 = vld [vmem:[%s5295_s3 + $0x100] sm:$0xff]  ;;  %v227_v57 = vld [vmem:[%s5295_s3 + $0x1d8] sm:$0xff] }
  0x11   :  { %94 = vmatpush1.msra.mxu0 %v51_v19  ;;  %329 = vmatpush1.msra.mxu1 %v208_v35  ;;  %v39_v44 = vld [vmem:[%s5293_s1 + $0x20] sm:$0xff]  ;;  %v197_v45 = vld [vmem:[%s5295_s3 + $0xe8] sm:$0xff]  ;;  %v226_v59 = vld [vmem:[%s5295_s3 + $0x1d0] sm:$0xff] }
  0x12   :  { %95 = vmatprep.subr.mxu0 %v50_v21  ;;  %330 = vmatprep.subr.mxu1 %v205_v37  ;;  %v196_v47 = vld [vmem:[%s5295_s3 + $0xe0] sm:$0xff]  ;;  %v193_v49 = vld [vmem:[%s5295_s3 + $0xc8] sm:$0xff]  ;;  %v223_v62 = vld [vmem:[%s5295_s3 + $0x1b8] sm:$0xff] }
  0x13   :  { %96 = vmatpush1.msra.mxu0 %v49_v24  ;;  %331 = vmatpush1.msra.mxu1 %v204_v39  ;;  %v36_v50 = vld [vmem:[%s5293_s1 + $0x8] sm:$0xff]  ;;  %v192_v51 = vld [vmem:[%s5295_s3 + $0xc0] sm:$0xff]  ;;  %v222_v63 = vld [vmem:[%s5295_s3 + $0x1b0] sm:$0xff] }
  0x14   :  { %97 = vmatprep.subr.mxu0 %v48_v26  ;;  %332 = vmatprep.subr.mxu1 %v201_v41  ;;  %v35_v52 = vld [vmem:[%s5293_s1] sm:$0xff]  ;;  %v189_v53 = vld [vmem:[%s5295_s3 + $0xa8] sm:$0xff]  ;;  %v219_v1 = vld [vmem:[%s5295_s3 + $0x198] sm:$0xff] }
  0x15   :  { %98 = vmatpush1.msra.mxu0 %v47_v28  ;;  %333 = vmatpush1.msra.mxu1 %v200_v43  ;;  %v33_v54 = vld [vmem:[%s5292_s0] sm:$0xff]  ;;  %v185_v60 = vld [vmem:[%s5295_s3 + $0x88] sm:$0xff]  ;;  %v218_v3 = vld [vmem:[%s5295_s3 + $0x190] sm:$0xff] }
  0x16   :  { %99 = vmatprep.subr.mxu0 %v46_v30  ;;  %334 = vmatprep.subr.mxu1 %v197_v45  ;;  %v188_v58 = vld [vmem:[%s5295_s3 + $0xa0] sm:$0xff]  ;;  %v34_v61 = vld [vmem:[%s5292_s0 + $0x8] sm:$0xff]  ;;  %v215_v5 = vld [vmem:[%s5295_s3 + $0x178] sm:$0xff] }
  0x17   :  { %100 = vmatpush1.msra.mxu0 %v45_v32  ;;  %335 = vmatpush1.msra.mxu1 %v196_v47  ;;  %v184_v0 = vld [vmem:[%s5295_s3 + $0x80] sm:$0xff]  ;;  %v181_v2 = vld [vmem:[%s5295_s3 + $0x68] sm:$0xff]  ;;  %v214_v7 = vld [vmem:[%s5295_s3 + $0x170] sm:$0xff] }
  0x18   :  { %101 = vmatprep.subr.mxu0 %v44_v34  ;;  %336 = vmatprep.subr.mxu1 %v193_v49  ;;  %v177_v6 = vld [vmem:[%s5295_s3 + $0x48] sm:$0xff]  ;;  %v176_v8 = vld [vmem:[%s5295_s3 + $0x40] sm:$0xff]  ;;  %v211_v9 = vld [vmem:[%s5295_s3 + $0x158] sm:$0xff] }
  0x19   :  { %102 = vmatpush1.msra.mxu0 %v43_v36  ;;  %337 = vmatpush1.msra.mxu1 %v192_v51  ;;  %v173_v10 = vld [vmem:[%s5295_s3 + $0x28] sm:$0xff]  ;;  %v210_v11 = vld [vmem:[%s5295_s3 + $0x150] sm:$0xff]  ;;  %v172_v12 = vld [vmem:[%s5295_s3 + $0x20] sm:$0xff] }
  0x1a   :  { %103 = vmatprep.subr.mxu0 %v42_v38  ;;  %338 = vmatprep.subr.mxu1 %v189_v53  ;;  %v207_v13 = vld [vmem:[%s5295_s3 + $0x138] sm:$0xff]  ;;  %v169_v14 = vld [vmem:[%s5295_s3 + $0x8] sm:$0xff]  ;;  %v206_v15 = vld [vmem:[%s5295_s3 + $0x130] sm:$0xff] }
  0x1b   :  { %104 = vmatpush1.msra.mxu0 %v41_v40  ;;  %339 = vmatpush1.msra.mxu1 %v188_v58  ;;  %v168_v16 = vld [vmem:[%s5295_s3] sm:$0xff]  ;;  %v203_v17 = vld [vmem:[%s5295_s3 + $0x118] sm:$0xff]  ;;  %v293_v18 = vld [vmem:[%s5295_s3 + $0x3e8] sm:$0xff] }
  0x1c   :  { %105 = vmatprep.subr.mxu0 %v40_v42  ;;  %340 = vmatprep.subr.mxu1 %v185_v60  ;;  %v202_v19 = vld [vmem:[%s5295_s3 + $0x110] sm:$0xff]  ;;  %v292_v20 = vld [vmem:[%s5295_s3 + $0x3e0] sm:$0xff]  ;;  %v199_v21 = vld [vmem:[%s5295_s3 + $0xf8] sm:$0xff] }
  0x1d   :  { %106 = vmatpush1.msra.mxu0 %v39_v44  ;;  %341 = vmatpush1.msra.mxu1 %v184_v0  ;;  %v289_v22 = vld [vmem:[%s5295_s3 + $0x3c8] sm:$0xff]  ;;  %v198_v23 = vld [vmem:[%s5295_s3 + $0xf0] sm:$0xff]  ;;  %v288_v24 = vld [vmem:[%s5295_s3 + $0x3c0] sm:$0xff] }
  0x1e   :  { %107 = vmatprep.subr.mxu0 %v38_v46  ;;  %342 = vmatprep.subr.mxu1 %v181_v2  ;;  %v195_v25 = vld [vmem:[%s5295_s3 + $0xd8] sm:$0xff]  ;;  %v285_v26 = vld [vmem:[%s5295_s3 + $0x3a8] sm:$0xff] }
  0x1f   :  { %108 = vmatpush1.msra.mxu0 %v37_v48 }
  0x20   :  { %109 = vmatprep.subr.mxu0 %v36_v50 }
  0x21   :  { %110 = vmatpush1.msra.mxu0 %v35_v52 }
  0x22   :  { %144 = vmatmul.mubr.f32.vlgmr.msra.gmra.mxu0 %v33_v54  ;;  %395 = vmatprep.subr.mxu0 %v231_v55 }
  0x23   :  { %149 = vmatprep.mubr.f32.mxu0 %v2409_v4  ;;  %396 = vmatpush1.msra.mxu0 %v230_v56  ;;  %v180_v4 = vld [vmem:[%s5295_s3 + $0x60] sm:$0xff] }
  0x24   :  { %397 = vmatprep.subr.mxu0 %v227_v57  ;;  %343 = vmatpush1.msra.mxu1 %v180_v4 }
  0x25   :  { %398 = vmatpush1.msra.mxu0 %v226_v59  ;;  %344 = vmatprep.subr.mxu1 %v177_v6 }
  0x26   :  { %150 = vmatmul.mubr.f32.gmra.mxu0 %v34_v61  ;;  %399 = vmatprep.subr.mxu0 %v223_v62 }
  0x27   :  { %400 = vmatpush1.msra.mxu0 %v222_v63  ;;  %345 = vmatpush1.msra.mxu1 %v176_v8 }
  0x28   :  { %401 = vmatprep.subr.mxu0 %v219_v1  ;;  %346 = vmatprep.subr.mxu1 %v173_v10 }
  0x29   :  { %402 = vmatpush1.msra.mxu0 %v218_v3  ;;  %347 = vmatpush1.msra.mxu1 %v172_v12 }
  0x2a   :  { %403 = vmatprep.subr.mxu0 %v215_v5  ;;  %348 = vmatprep.subr.mxu1 %v169_v14 }
  0x2b   :  { %404 = vmatpush1.msra.mxu0 %v214_v7  ;;  %349 = vmatpush1.msra.mxu1 %v168_v16 }
  0x2c   :  { %405 = vmatprep.subr.mxu0 %v211_v9  ;;  %350 = vmatprep.subr.mxu1 %v293_v18 }
  0x2d   :  { %406 = vmatpush1.msra.mxu0 %v210_v11  ;;  %351 = vmatpush2.msra.mxu1 %v292_v20 }
  0x2e   :  { %407 = vmatprep.subr.mxu0 %v207_v13 }
  0x2f   :  { %408 = vmatpush1.msra.mxu0 %v206_v15 }
  0x30   :  { %409 = vmatprep.subr.mxu0 %v203_v17 }
  0x31   :  { %410 = vmatpush1.msra.mxu0 %v202_v19 }
  0x32   :  { %14 = vsyncpa [#allocation3], 0  ;;  %411 = vmatprep.subr.mxu0 %v199_v21  ;;  %v194_v27 = vld [vmem:[%s5295_s3 + $0xd0] sm:$0xff]  ;;  %352 = vmatprep.subr.mxu1 %v289_v22  ;;  %v284_v28 = vld [vmem:[%s5295_s3 + $0x3a0] sm:$0xff] }
  0x33   :  { %412 = vmatpush1.msra.mxu0 %v198_v23  ;;  %v191_v29 = vld [vmem:[%s5295_s3 + $0xb8] sm:$0xff]  ;;  %353 = vmatpush2.msra.mxu1 %v288_v24  ;;  %v281_v30 = vld [vmem:[%s5295_s3 + $0x388] sm:$0xff]  ;;  %v190_v31 = vld [vmem:[%s5295_s3 + $0xb0] sm:$0xff] }
  0x34   :  { %413 = vmatprep.subr.mxu0 %v195_v25  ;;  %354 = vmatprep.subr.mxu1 %v285_v26  ;;  %v280_v32 = vld [vmem:[%s5295_s3 + $0x380] sm:$0xff]  ;;  %v187_v33 = vld [vmem:[%s5295_s3 + $0x98] sm:$0xff]  ;;  %v277_v34 = vld [vmem:[%s5295_s3 + $0x368] sm:$0xff] }
  0x35   :  { %414 = vmatpush1.msra.mxu0 %v194_v27  ;;  %355 = vmatpush2.msra.mxu1 %v284_v28  ;;  %v186_v35 = vld [vmem:[%s5295_s3 + $0x90] sm:$0xff]  ;;  %v276_v36 = vld [vmem:[%s5295_s3 + $0x360] sm:$0xff]  ;;  %v183_v37 = vld [vmem:[%s5295_s3 + $0x78] sm:$0xff] }
  0x36   :  { %415 = vmatprep.subr.mxu0 %v191_v29  ;;  %356 = vmatprep.subr.mxu1 %v281_v30  ;;  %v273_v38 = vld [vmem:[%s5295_s3 + $0x348] sm:$0xff]  ;;  %v182_v39 = vld [vmem:[%s5295_s3 + $0x70] sm:$0xff]  ;;  %v272_v40 = vld [vmem:[%s5295_s3 + $0x340] sm:$0xff] }
  0x37   :  { %416 = vmatpush1.msra.mxu0 %v190_v31  ;;  %357 = vmatpush2.msra.mxu1 %v280_v32  ;;  %v179_v41 = vld [vmem:[%s5295_s3 + $0x58] sm:$0xff]  ;;  %v269_v42 = vld [vmem:[%s5295_s3 + $0x328] sm:$0xff]  ;;  %v178_v43 = vld [vmem:[%s5295_s3 + $0x50] sm:$0xff] }
  0x38   :  { %417 = vmatprep.subr.mxu0 %v187_v33  ;;  %358 = vmatprep.subr.mxu1 %v277_v34  ;;  %v268_v44 = vld [vmem:[%s5295_s3 + $0x320] sm:$0xff]  ;;  %v175_v45 = vld [vmem:[%s5295_s3 + $0x38] sm:$0xff]  ;;  %v265_v46 = vld [vmem:[%s5295_s3 + $0x308] sm:$0xff] }
  0x39   :  { %418 = vmatpush1.msra.mxu0 %v186_v35  ;;  %359 = vmatpush2.msra.mxu1 %v276_v36  ;;  %v174_v47 = vld [vmem:[%s5295_s3 + $0x30] sm:$0xff]  ;;  %v264_v48 = vld [vmem:[%s5295_s3 + $0x300] sm:$0xff]  ;;  %v171_v49 = vld [vmem:[%s5295_s3 + $0x18] sm:$0xff] }
  0x3a   :  { %419 = vmatprep.subr.mxu0 %v183_v37  ;;  %360 = vmatprep.subr.mxu1 %v273_v38  ;;  %v261_v50 = vld [vmem:[%s5295_s3 + $0x2e8] sm:$0xff]  ;;  %v170_v51 = vld [vmem:[%s5295_s3 + $0x10] sm:$0xff]  ;;  %v260_v52 = vld [vmem:[%s5295_s3 + $0x2e0] sm:$0xff]  ;;  %v69_v37 = vlaneseq }
  0x3b   :  { %420 = vmatpush1.msra.mxu0 %v182_v39  ;;  %361 = vmatpush2.msra.mxu1 %v272_v40  ;;  %v295_v53 = vld [vmem:[%s5295_s3 + $0x3f8] sm:$0xff]  ;;  %v257_v54 = vld [vmem:[%s5295_s3 + $0x2c8] sm:$0xff]  ;;  %v294_v55 = vld [vmem:[%s5295_s3 + $0x3f0] sm:$0xff] }
  0x3c   :  { %421 = vmatprep.subr.mxu0 %v179_v41  ;;  %362 = vmatprep.subr.mxu1 %v269_v42  ;;  %v256_v56 = vld [vmem:[%s5295_s3 + $0x2c0] sm:$0xff]  ;;  %v291_v57 = vld [vmem:[%s5295_s3 + $0x3d8] sm:$0xff]  ;;  %v253_v58 = vld [vmem:[%s5295_s3 + $0x2a8] sm:$0xff]  ;;  %v2957_v38 = vshrl.u32 %v69_v37, 7 }
  0x3d   :  { %422 = vmatpush1.msra.mxu0 %v178_v43  ;;  %363 = vmatpush2.msra.mxu1 %v268_v44  ;;  %v290_v59 = vld [vmem:[%s5295_s3 + $0x3d0] sm:$0xff]  ;;  %v252_v60 = vld [vmem:[%s5295_s3 + $0x2a0] sm:$0xff]  ;;  %v287_v61 = vld [vmem:[%s5295_s3 + $0x3b8] sm:$0xff] }
  0x3e   :  { %423 = vmatprep.subr.mxu0 %v175_v45  ;;  %364 = vmatprep.subr.mxu1 %v265_v46  ;;  %v249_v62 = vld [vmem:[%s5295_s3 + $0x288] sm:$0xff]  ;;  %v286_v63 = vld [vmem:[%s5295_s3 + $0x3b0] sm:$0xff]  ;;  %v283_v0 = vld [vmem:[%s5295_s3 + $0x398] sm:$0xff]  ;;  %v2960_v39 = vsub.s32 0, %v2957_v38  ;;  %v2966_v41 = vsub.s32 1, %v2957_v38 }
  0x3f   :  { %424 = vmatpush1.msra.mxu0 %v174_v47  ;;  %365 = vmatpush2.msra.mxu1 %v264_v48  ;;  %v282_v1 = vld [vmem:[%s5295_s3 + $0x390] sm:$0xff]  ;;  %v279_v2 = vld [vmem:[%s5295_s3 + $0x378] sm:$0xff]  ;;  %v248_v17 = vld [vmem:[%s5295_s3 + $0x280] sm:$0xff] }
  0x40   :  { %425 = vmatprep.subr.mxu0 %v171_v49  ;;  %366 = vmatprep.subr.mxu1 %v261_v50  ;;  %v278_v3 = vld [vmem:[%s5295_s3 + $0x370] sm:$0xff]  ;;  %v275_v4 = vld [vmem:[%s5295_s3 + $0x358] sm:$0xff]  ;;  %v245_v19 = vld [vmem:[%s5295_s3 + $0x268] sm:$0xff] }
  0x41   :  { %426 = vmatpush1.msra.mxu0 %v170_v51  ;;  %367 = vmatpush2.msra.mxu1 %v260_v52  ;;  %v274_v5 = vld [vmem:[%s5295_s3 + $0x350] sm:$0xff]  ;;  %v271_v6 = vld [vmem:[%s5295_s3 + $0x338] sm:$0xff]  ;;  %v244_v21 = vld [vmem:[%s5295_s3 + $0x260] sm:$0xff] }
  0x42   :  { %427 = vmatprep.subr.mxu0 %v295_v53  ;;  %368 = vmatprep.subr.mxu1 %v257_v54  ;;  %v270_v7 = vld [vmem:[%s5295_s3 + $0x330] sm:$0xff]  ;;  %v267_v8 = vld [vmem:[%s5295_s3 + $0x318] sm:$0xff]  ;;  %v241_v23 = vld [vmem:[%s5295_s3 + $0x248] sm:$0xff] }
  0x43   :  { %428 = vmatpush2.msra.mxu0 %v294_v55  ;;  %369 = vmatpush2.msra.mxu1 %v256_v56  ;;  %v266_v9 = vld [vmem:[%s5295_s3 + $0x310] sm:$0xff]  ;;  %v263_v10 = vld [vmem:[%s5295_s3 + $0x2f8] sm:$0xff]  ;;  %v240_v25 = vld [vmem:[%s5295_s3 + $0x240] sm:$0xff] }
  0x44   :  { %429 = vmatprep.subr.mxu0 %v291_v57  ;;  %370 = vmatprep.subr.mxu1 %v253_v58  ;;  %v262_v11 = vld [vmem:[%s5295_s3 + $0x2f0] sm:$0xff]  ;;  %v259_v12 = vld [vmem:[%s5295_s3 + $0x2d8] sm:$0xff]  ;;  %v237_v27 = vld [vmem:[%s5295_s3 + $0x228] sm:$0xff] }
  0x45   :  { %430 = vmatpush2.msra.mxu0 %v290_v59  ;;  %371 = vmatpush2.msra.mxu1 %v252_v60  ;;  %v258_v13 = vld [vmem:[%s5295_s3 + $0x2d0] sm:$0xff]  ;;  %v255_v14 = vld [vmem:[%s5295_s3 + $0x2b8] sm:$0xff]  ;;  %v236_v29 = vld [vmem:[%s5295_s3 + $0x220] sm:$0xff] }
  0x46   :  { %431 = vmatprep.subr.mxu0 %v287_v61  ;;  %372 = vmatprep.subr.mxu1 %v249_v62  ;;  %v254_v15 = vld [vmem:[%s5295_s3 + $0x2b0] sm:$0xff]  ;;  %v251_v16 = vld [vmem:[%s5295_s3 + $0x298] sm:$0xff]  ;;  %v233_v31 = vld [vmem:[%s5295_s3 + $0x208] sm:$0xff] }
  0x47   :  { %432 = vmatpush2.msra.mxu0 %v286_v63  ;;  %v250_v18 = vld [vmem:[%s5295_s3 + $0x290] sm:$0xff]  ;;  %373 = vmatpush2.msra.mxu1 %v248_v17  ;;  %v247_v20 = vld [vmem:[%s5295_s3 + $0x278] sm:$0xff]  ;;  %v232_v33 = vld [vmem:[%s5295_s3 + $0x200] sm:$0xff] }
  0x48   :  { %433 = vmatprep.subr.mxu0 %v283_v0  ;;  %374 = vmatprep.subr.mxu1 %v245_v19  ;;  %v246_v22 = vld [vmem:[%s5295_s3 + $0x270] sm:$0xff]  ;;  %v243_v24 = vld [vmem:[%s5295_s3 + $0x258] sm:$0xff]  ;;  %v557_v35 = vld [vmem:[%s5297_s5 + $0x1e8] sm:$0xff] }
  0x49   :  { %434 = vmatpush2.msra.mxu0 %v282_v1  ;;  %375 = vmatpush2.msra.mxu1 %v244_v21  ;;  %v242_v26 = vld [vmem:[%s5295_s3 + $0x250] sm:$0xff]  ;;  %v239_v28 = vld [vmem:[%s5295_s3 + $0x238] sm:$0xff]  ;;  %v685_v36 = vld [vmem:[%s5297_s5 + $0x5e8] sm:$0xff] }
  0x4a   :  { %435 = vmatprep.subr.mxu0 %v279_v2  ;;  %376 = vmatprep.subr.mxu1 %v241_v23  ;;  %v238_v30 = vld [vmem:[%s5295_s3 + $0x230] sm:$0xff]  ;;  %v235_v32 = vld [vmem:[%s5295_s3 + $0x218] sm:$0xff]  ;;  %v67_v40 = vld [vmem:[%s5294_s2] sm:$0x3] }
  0x4b   :  { %436 = vmatpush2.msra.mxu0 %v278_v3  ;;  %377 = vmatpush2.msra.mxu1 %v240_v25  ;;  %v234_v34 = vld [vmem:[%s5295_s3 + $0x210] sm:$0xff]  ;;  %v72_v42 = vrot.slane %v67_v40, %v2960_v39  ;;  %v76_v43 = vrot.slane %v67_v40, %v2966_v41  ;;  %v556_v56 = vld [vmem:[%s5297_s5 + $0x1e0] sm:$0xff]  ;;  %v553_v59 = vld [vmem:[%s5297_s5 + $0x1c8] sm:$0xff] }
  0x4c   :  { %437 = vmatprep.subr.mxu0 %v275_v4  ;;  %378 = vmatprep.subr.mxu1 %v237_v27  ;;  %v684_v57 = vld [vmem:[%s5297_s5 + $0x5e0] sm:$0xff]  ;;  %v681_v60 = vld [vmem:[%s5297_s5 + $0x5c8] sm:$0xff] }
  0x4d   :  { %438 = vmatpush2.msra.mxu0 %v274_v5  ;;  %379 = vmatpush2.msra.mxu1 %v236_v29  ;;  %v552_v0 = vld [vmem:[%s5297_s5 + $0x1c0] sm:$0xff]  ;;  %v549_v2 = vld [vmem:[%s5297_s5 + $0x1a8] sm:$0xff] }
  0x4e   :  { %439 = vmatprep.subr.mxu0 %v271_v6  ;;  %380 = vmatprep.subr.mxu1 %v233_v31  ;;  %v680_v1 = vld [vmem:[%s5297_s5 + $0x5c0] sm:$0xff]  ;;  %v677_v3 = vld [vmem:[%s5297_s5 + $0x5a8] sm:$0xff] }
  0x4f   :  { %440 = vmatpush2.msra.mxu0 %v270_v7  ;;  %381 = vmatpush2.msra.mxu1 %v232_v33  ;;  %v548_v4 = vld [vmem:[%s5297_s5 + $0x1a0] sm:$0xff]  ;;  %v545_v6 = vld [vmem:[%s5297_s5 + $0x188] sm:$0xff] }
  0x50   :  { %441 = vmatprep.subr.mxu0 %v267_v8  ;;  %774 = vmatprep.subr.mxu1 %v557_v35  ;;  %v676_v5 = vld [vmem:[%s5297_s5 + $0x5a0] sm:$0xff]  ;;  %v673_v7 = vld [vmem:[%s5297_s5 + $0x588] sm:$0xff] }
  0x51   :  { %442 = vmatpush2.msra.mxu0 %v266_v9  ;;  %v544_v8 = vld [vmem:[%s5297_s5 + $0x180] sm:$0xff]  ;;  %v661_v19 = vld [vmem:[%s5297_s5 + $0x528] sm:$0xff] }
  0x52   :  { %443 = vmatprep.subr.mxu0 %v263_v10  ;;  %v672_v9 = vld [vmem:[%s5297_s5 + $0x580] sm:$0xff]  ;;  %v541_v10 = vld [vmem:[%s5297_s5 + $0x168] sm:$0xff] }
  0x53   :  { %444 = vmatpush2.msra.mxu0 %v262_v11  ;;  %v669_v11 = vld [vmem:[%s5297_s5 + $0x568] sm:$0xff]  ;;  %v664_v17 = vld [vmem:[%s5297_s5 + $0x540] sm:$0xff] }
  0x54   :  { %445 = vmatprep.subr.mxu0 %v259_v12  ;;  %v540_v12 = vld [vmem:[%s5297_s5 + $0x160] sm:$0xff]  ;;  %v657_v23 = vld [vmem:[%s5297_s5 + $0x508] sm:$0xff] }
  0x55   :  { %446 = vmatpush2.msra.mxu0 %v258_v13  ;;  %v668_v13 = vld [vmem:[%s5297_s5 + $0x560] sm:$0xff]  ;;  %v653_v27 = vld [vmem:[%s5297_s5 + $0x4e8] sm:$0xff] }
  0x56   :  { %447 = vmatprep.subr.mxu0 %v255_v14  ;;  %v537_v14 = vld [vmem:[%s5297_s5 + $0x148] sm:$0xff]  ;;  %v660_v21 = vld [vmem:[%s5297_s5 + $0x520] sm:$0xff] }
  0x57   :  { %448 = vmatpush2.msra.mxu0 %v254_v15  ;;  %v665_v15 = vld [vmem:[%s5297_s5 + $0x548] sm:$0xff]  ;;  %v656_v25 = vld [vmem:[%s5297_s5 + $0x500] sm:$0xff] }
  0x58   :  { %449 = vmatprep.subr.mxu0 %v251_v16  ;;  %v536_v16 = vld [vmem:[%s5297_s5 + $0x140] sm:$0xff]  ;;  %v649_v31 = vld [vmem:[%s5297_s5 + $0x4c8] sm:$0xff] }
  0x59   :  { %450 = vmatpush2.msra.mxu0 %v250_v18  ;;  %v533_v18 = vld [vmem:[%s5297_s5 + $0x128] sm:$0xff]  ;;  %v652_v29 = vld [vmem:[%s5297_s5 + $0x4e0] sm:$0xff] }
  0x5a   :  { %451 = vmatprep.subr.mxu0 %v247_v20  ;;  %v532_v20 = vld [vmem:[%s5297_s5 + $0x120] sm:$0xff]  ;;  %v645_v35 = vld [vmem:[%s5297_s5 + $0x4a8] sm:$0xff] }
  0x5b   :  { %452 = vmatpush2.msra.mxu0 %v246_v22  ;;  %v529_v22 = vld [vmem:[%s5297_s5 + $0x108] sm:$0xff]  ;;  %v648_v33 = vld [vmem:[%s5297_s5 + $0x4c0] sm:$0xff] }
  0x5c   :  { %453 = vmatprep.subr.mxu0 %v243_v24  ;;  %v528_v24 = vld [vmem:[%s5297_s5 + $0x100] sm:$0xff]  ;;  %v513_v40 = vld [vmem:[%s5297_s5 + $0x88] sm:$0xff] }
  0x5d   :  { %454 = vmatpush2.msra.mxu0 %v242_v26  ;;  %v525_v26 = vld [vmem:[%s5297_s5 + $0xe8] sm:$0xff]  ;;  %v644_v37 = vld [vmem:[%s5297_s5 + $0x4a0] sm:$0xff] }
  0x5e   :  { %455 = vmatprep.subr.mxu0 %v239_v28  ;;  %v524_v28 = vld [vmem:[%s5297_s5 + $0xe0] sm:$0xff] }
  0x5f   :  { %456 = vmatpush2.msra.mxu0 %v238_v30  ;;  %v521_v30 = vld [vmem:[%s5297_s5 + $0xc8] sm:$0xff] }
  0x60   :  { %457 = vmatprep.subr.mxu0 %v235_v32  ;;  %v520_v32 = vld [vmem:[%s5297_s5 + $0xc0] sm:$0xff] }
  0x61   :  { %458 = vmatpush2.msra.mxu0 %v234_v34  ;;  %v517_v34 = vld [vmem:[%s5297_s5 + $0xa8] sm:$0xff] }
  0x62   :  { %851 = vmatprep.subr.mxu0 %v685_v36  ;;  %v516_v36 = vld [vmem:[%s5297_s5 + $0xa0] sm:$0xff] }
  0xe2   :  { %v145_v44 = vpop.f32.mrf.mxu0 }
  0xe3   :  { %v146_v45 = vadd.f32 %v145_v44, %v72_v42  ;;  %v640_v44 = vld [vmem:[%s5297_s5 + $0x480] sm:$0xff] }
  0xe4   :  { %v147_v46 = vpop.f32.mrf.mxu0 }
  0xe5   :  { %v148_v47 = vadd.f32 %v147_v46, %v76_v43  ;;  %v160_v48 = vmul.f32 0.2, %v146_v45  ;;  %vm156_vm1 = vcmp.ge.f32.partialorder %v146_v45, 0.0  ;;  %v637_v46 = vld [vmem:[%s5297_s5 + $0x468] sm:$0xff] }
  0xe6   :  { %v151_v49 = vpop.f32.mrf.mxu0 }
  0xe7   :  { %v152_v50 = vadd.f32 %v151_v49, %v72_v42  ;;  %vm157_vm0 = vcmp.ge.f32.partialorder %v148_v47, 0.0  ;;  %v161_v51 = vmul.f32 0.2, %v148_v47  ;;  %v164_v58 = vsel %vm156_vm1, %v146_v45, %v160_v48  ;;  %v641_v42 = vld [vmem:[%s5297_s5 + $0x488] sm:$0xff]  ;;  %v636_v48 = vld [vmem:[%s5297_s5 + $0x460] sm:$0xff] }
  0xe8   :  { %v153_v52 = vpop.f32.mrf.mxu0  ;;  %v509_v45 = vld [vmem:[%s5297_s5 + $0x68] sm:$0xff] }
  0xe9   :  { %v162_v53 = vmul.f32 0.2, %v152_v50  ;;  %v154_v54 = vadd.f32 %v153_v52, %v76_v43  ;;  %v165_v55 = vsel %vm157_vm0, %v148_v47, %v161_v51  ;;  %vm158_vm2 = vcmp.ge.f32.partialorder %v152_v50, 0.0  ;;  %v512_v43 = vld [vmem:[%s5297_s5 + $0x80] sm:$0xff]  ;;  %v505_v49 = vld [vmem:[%s5297_s5 + $0x48] sm:$0xff] }
  0xea   :  { %382 = vmatprep.mubr.f32.mxu1 %v165_v55  ;;  %459 = vmatprep.mubr.f32.mxu0 %v165_v55  ;;  %v508_v47 = vld [vmem:[%s5297_s5 + $0x60] sm:$0xff] }
  0xeb   :  { %v163_v61 = vmul.f32 0.2, %v154_v54  ;;  %383 = vmatmul.mubr.f32.vlgmr.msra.gmra.mxu1 %v164_v58  ;;  %460 = vmatmul.mubr.f32.vlgmr.msra.gmra.mxu0 %v164_v58  ;;  %vm159_vm3 = vcmp.ge.f32.partialorder %v154_v54, 0.0  ;;  %v166_v62 = vsel %vm158_vm2, %v152_v50, %v162_v53  ;;  %v633_v50 = vld [vmem:[%s5297_s5 + $0x448] sm:$0xff]  ;;  %v504_v51 = vld [vmem:[%s5297_s5 + $0x40] sm:$0xff] }
  0xec   :  { %775 = vmatpush1.msra.mxu1 %v556_v56  ;;  %852 = vmatpush1.msra.mxu0 %v684_v57  ;;  %v632_v52 = vld [vmem:[%s5297_s5 + $0x440] sm:$0xff]  ;;  %v501_v53 = vld [vmem:[%s5297_s5 + $0x28] sm:$0xff] }
  0xed   :  { %v167_v63 = vsel %vm159_vm3, %v154_v54, %v163_v61  ;;  %776 = vmatprep.subr.mxu1 %v553_v59  ;;  %853 = vmatprep.subr.mxu0 %v681_v60  ;;  %v629_v54 = vld [vmem:[%s5297_s5 + $0x428] sm:$0xff]  ;;  %v500_v55 = vld [vmem:[%s5297_s5 + $0x20] sm:$0xff] }
  0xee   :  { %388 = vmatprep.mubr.f32.mxu1 %v167_v63  ;;  %465 = vmatprep.mubr.f32.mxu0 %v167_v63  ;;  %v628_v56 = vld [vmem:[%s5297_s5 + $0x420] sm:$0xff]  ;;  %v497_v57 = vld [vmem:[%s5297_s5 + $0x8] sm:$0xff] }
  0xef   :  { %389 = vmatmul.mubr.f32.gmra.mxu1 %v166_v62  ;;  %466 = vmatmul.mubr.f32.gmra.mxu0 %v166_v62  ;;  %v625_v58 = vld [vmem:[%s5297_s5 + $0x408] sm:$0xff]  ;;  %v496_v59 = vld [vmem:[%s5297_s5] sm:$0xff] }
  0xf0   :  { %777 = vmatpush1.msra.mxu1 %v552_v0  ;;  %854 = vmatpush1.msra.mxu0 %v680_v1  ;;  %v624_v60 = vld [vmem:[%s5297_s5 + $0x400] sm:$0xff]  ;;  %v621_v61 = vld [vmem:[%s5297_s5 + $0x3e8] sm:$0xff] }
  0xf1   :  { %778 = vmatprep.subr.mxu1 %v549_v2  ;;  %855 = vmatprep.subr.mxu0 %v677_v3  ;;  %v749_v62 = vld [vmem:[%s5297_s5 + $0x7e8] sm:$0xff]  ;;  %v620_v63 = vld [vmem:[%s5297_s5 + $0x3e0] sm:$0xff] }
  0xf2   :  { %779 = vmatpush1.msra.mxu1 %v548_v4  ;;  %856 = vmatpush1.msra.mxu0 %v676_v5  ;;  %v748_v0 = vld [vmem:[%s5297_s5 + $0x7e0] sm:$0xff]  ;;  %v617_v1 = vld [vmem:[%s5297_s5 + $0x3c8] sm:$0xff] }
  0xf3   :  { %780 = vmatprep.subr.mxu1 %v545_v6  ;;  %857 = vmatprep.subr.mxu0 %v673_v7  ;;  %v745_v2 = vld [vmem:[%s5297_s5 + $0x7c8] sm:$0xff]  ;;  %v616_v3 = vld [vmem:[%s5297_s5 + $0x3c0] sm:$0xff] }
  0xf4   :  { %781 = vmatpush1.msra.mxu1 %v544_v8  ;;  %858 = vmatpush1.msra.mxu0 %v672_v9  ;;  %v744_v4 = vld [vmem:[%s5297_s5 + $0x7c0] sm:$0xff]  ;;  %v613_v5 = vld [vmem:[%s5297_s5 + $0x3a8] sm:$0xff] }
  0xf5   :  { %782 = vmatprep.subr.mxu1 %v541_v10  ;;  %859 = vmatprep.subr.mxu0 %v669_v11  ;;  %v741_v6 = vld [vmem:[%s5297_s5 + $0x7a8] sm:$0xff]  ;;  %v612_v7 = vld [vmem:[%s5297_s5 + $0x3a0] sm:$0xff] }
  0xf6   :  { %783 = vmatpush1.msra.mxu1 %v540_v12  ;;  %860 = vmatpush1.msra.mxu0 %v668_v13  ;;  %v740_v8 = vld [vmem:[%s5297_s5 + $0x7a0] sm:$0xff]  ;;  %v609_v9 = vld [vmem:[%s5297_s5 + $0x388] sm:$0xff] }
  0xf7   :  { %784 = vmatprep.subr.mxu1 %v537_v14  ;;  %861 = vmatprep.subr.mxu0 %v665_v15  ;;  %v737_v10 = vld [vmem:[%s5297_s5 + $0x788] sm:$0xff]  ;;  %v608_v11 = vld [vmem:[%s5297_s5 + $0x380] sm:$0xff] }
  0xf8   :  { %785 = vmatpush1.msra.mxu1 %v536_v16  ;;  %862 = vmatpush1.msra.mxu0 %v664_v17  ;;  %v736_v12 = vld [vmem:[%s5297_s5 + $0x780] sm:$0xff]  ;;  %v605_v13 = vld [vmem:[%s5297_s5 + $0x368] sm:$0xff] }
  0xf9   :  { %786 = vmatprep.subr.mxu1 %v533_v18  ;;  %863 = vmatprep.subr.mxu0 %v661_v19  ;;  %v733_v14 = vld [vmem:[%s5297_s5 + $0x768] sm:$0xff]  ;;  %v604_v15 = vld [vmem:[%s5297_s5 + $0x360] sm:$0xff] }
  0xfa   :  { %787 = vmatpush1.msra.mxu1 %v532_v20  ;;  %864 = vmatpush1.msra.mxu0 %v660_v21  ;;  %v732_v16 = vld [vmem:[%s5297_s5 + $0x760] sm:$0xff]  ;;  %v601_v17 = vld [vmem:[%s5297_s5 + $0x348] sm:$0xff] }
  0xfb   :  { %788 = vmatprep.subr.mxu1 %v529_v22  ;;  %865 = vmatprep.subr.mxu0 %v657_v23  ;;  %v729_v18 = vld [vmem:[%s5297_s5 + $0x748] sm:$0xff]  ;;  %v600_v19 = vld [vmem:[%s5297_s5 + $0x340] sm:$0xff] }
  0xfc   :  { %789 = vmatpush1.msra.mxu1 %v528_v24  ;;  %866 = vmatpush1.msra.mxu0 %v656_v25  ;;  %v728_v20 = vld [vmem:[%s5297_s5 + $0x740] sm:$0xff]  ;;  %v597_v21 = vld [vmem:[%s5297_s5 + $0x328] sm:$0xff] }
  0xfd   :  { %790 = vmatprep.subr.mxu1 %v525_v26  ;;  %867 = vmatprep.subr.mxu0 %v653_v27  ;;  %v725_v22 = vld [vmem:[%s5297_s5 + $0x728] sm:$0xff]  ;;  %v596_v23 = vld [vmem:[%s5297_s5 + $0x320] sm:$0xff] }
  0xfe   :  { %791 = vmatpush1.msra.mxu1 %v524_v28  ;;  %868 = vmatpush1.msra.mxu0 %v652_v29  ;;  %v724_v24 = vld [vmem:[%s5297_s5 + $0x720] sm:$0xff]  ;;  %v593_v25 = vld [vmem:[%s5297_s5 + $0x308] sm:$0xff] }
  0xff   :  { %792 = vmatprep.subr.mxu1 %v521_v30  ;;  %869 = vmatprep.subr.mxu0 %v649_v31  ;;  %v721_v26 = vld [vmem:[%s5297_s5 + $0x708] sm:$0xff]  ;;  %v592_v27 = vld [vmem:[%s5297_s5 + $0x300] sm:$0xff] }
 0x100   :  { %793 = vmatpush1.msra.mxu1 %v520_v32  ;;  %870 = vmatpush1.msra.mxu0 %v648_v33  ;;  %v720_v28 = vld [vmem:[%s5297_s5 + $0x700] sm:$0xff]  ;;  %v589_v29 = vld [vmem:[%s5297_s5 + $0x2e8] sm:$0xff] }
 0x101   :  { %794 = vmatprep.subr.mxu1 %v517_v34  ;;  %871 = vmatprep.subr.mxu0 %v645_v35  ;;  %v717_v30 = vld [vmem:[%s5297_s5 + $0x6e8] sm:$0xff]  ;;  %v588_v31 = vld [vmem:[%s5297_s5 + $0x2e0] sm:$0xff] }
 0x102   :  { %795 = vmatpush1.msra.mxu1 %v516_v36  ;;  %872 = vmatpush1.msra.mxu0 %v644_v37  ;;  %v716_v32 = vld [vmem:[%s5297_s5 + $0x6e0] sm:$0xff]  ;;  %v585_v33 = vld [vmem:[%s5297_s5 + $0x2c8] sm:$0xff] }
 0x103   :  { %796 = vmatprep.subr.mxu1 %v513_v40  ;;  %873 = vmatprep.subr.mxu0 %v641_v42  ;;  %v713_v34 = vld [vmem:[%s5297_s5 + $0x6c8] sm:$0xff]  ;;  %v584_v35 = vld [vmem:[%s5297_s5 + $0x2c0] sm:$0xff] }
 0x104   :  { %797 = vmatpush1.msra.mxu1 %v512_v43  ;;  %874 = vmatpush1.msra.mxu0 %v640_v44  ;;  %v712_v36 = vld [vmem:[%s5297_s5 + $0x6c0] sm:$0xff]  ;;  %v581_v37 = vld [vmem:[%s5297_s5 + $0x2a8] sm:$0xff] }
 0x105   :  { %798 = vmatprep.subr.mxu1 %v509_v45  ;;  %875 = vmatprep.subr.mxu0 %v637_v46  ;;  %v709_v40 = vld [vmem:[%s5297_s5 + $0x6a8] sm:$0xff]  ;;  %v580_v42 = vld [vmem:[%s5297_s5 + $0x2a0] sm:$0xff] }
 0x106   :  { %799 = vmatpush1.msra.mxu1 %v508_v47  ;;  %876 = vmatpush1.msra.mxu0 %v636_v48  ;;  %v708_v43 = vld [vmem:[%s5297_s5 + $0x6a0] sm:$0xff]  ;;  %v577_v44 = vld [vmem:[%s5297_s5 + $0x288] sm:$0xff] }
 0x107   :  { %800 = vmatprep.subr.mxu1 %v505_v49  ;;  %877 = vmatprep.subr.mxu0 %v633_v50  ;;  %v705_v45 = vld [vmem:[%s5297_s5 + $0x688] sm:$0xff]  ;;  %v576_v46 = vld [vmem:[%s5297_s5 + $0x280] sm:$0xff] }
 0x108   :  { %801 = vmatpush1.msra.mxu1 %v504_v51  ;;  %878 = vmatpush1.msra.mxu0 %v632_v52  ;;  %v704_v47 = vld [vmem:[%s5297_s5 + $0x680] sm:$0xff]  ;;  %v573_v48 = vld [vmem:[%s5297_s5 + $0x268] sm:$0xff] }
 0x109   :  { %802 = vmatprep.subr.mxu1 %v501_v53  ;;  %879 = vmatprep.subr.mxu0 %v629_v54  ;;  %v701_v49 = vld [vmem:[%s5297_s5 + $0x668] sm:$0xff]  ;;  %v572_v50 = vld [vmem:[%s5297_s5 + $0x260] sm:$0xff] }
 0x10a   :  { %803 = vmatpush1.msra.mxu1 %v500_v55  ;;  %880 = vmatpush1.msra.mxu0 %v628_v56  ;;  %v700_v51 = vld [vmem:[%s5297_s5 + $0x660] sm:$0xff]  ;;  %v569_v52 = vld [vmem:[%s5297_s5 + $0x248] sm:$0xff] }
 0x10b   :  { %804 = vmatprep.subr.mxu1 %v497_v57  ;;  %881 = vmatprep.subr.mxu0 %v625_v58  ;;  %v697_v53 = vld [vmem:[%s5297_s5 + $0x648] sm:$0xff]  ;;  %v568_v54 = vld [vmem:[%s5297_s5 + $0x240] sm:$0xff] }
 0x10c   :  { %805 = vmatpush1.msra.mxu1 %v496_v59  ;;  %882 = vmatpush1.msra.mxu0 %v624_v60  ;;  %v696_v55 = vld [vmem:[%s5297_s5 + $0x640] sm:$0xff]  ;;  %v565_v56 = vld [vmem:[%s5297_s5 + $0x228] sm:$0xff] }
 0x10d   :  { %806 = vmatprep.subr.mxu1 %v621_v61  ;;  %883 = vmatprep.subr.mxu0 %v749_v62  ;;  %v693_v57 = vld [vmem:[%s5297_s5 + $0x628] sm:$0xff]  ;;  %v564_v58 = vld [vmem:[%s5297_s5 + $0x220] sm:$0xff] }
 0x10e   :  { %807 = vmatpush2.msra.mxu1 %v620_v63  ;;  %884 = vmatpush2.msra.mxu0 %v748_v0  ;;  %v692_v59 = vld [vmem:[%s5297_s5 + $0x620] sm:$0xff]  ;;  %v561_v60 = vld [vmem:[%s5297_s5 + $0x208] sm:$0xff]  ;;  %v559_v0 = vld [vmem:[%s5297_s5 + $0x1f8] sm:$0xff] }
 0x10f   :  { %808 = vmatprep.subr.mxu1 %v617_v1  ;;  %885 = vmatprep.subr.mxu0 %v745_v2  ;;  %v689_v61 = vld [vmem:[%s5297_s5 + $0x608] sm:$0xff]  ;;  %v560_v62 = vld [vmem:[%s5297_s5 + $0x200] sm:$0xff]  ;;  %v687_v1 = vld [vmem:[%s5297_s5 + $0x5f8] sm:$0xff]  ;;  %v3355_v2 = vsub.s32 2, %v2957_v38 }
 0x110   :  { %809 = vmatpush2.msra.mxu1 %v616_v3  ;;  %886 = vmatpush2.msra.mxu0 %v744_v4  ;;  %v688_v63 = vld [vmem:[%s5297_s5 + $0x600] sm:$0xff]  ;;  %v3361_v4 = vsub.s32 3, %v2957_v38 }
 0x111   :  { %810 = vmatprep.subr.mxu1 %v613_v5  ;;  %887 = vmatprep.subr.mxu0 %v741_v6  ;;  %v296_v3 = vld [vmem:[%s5296_s4] sm:$0xf] }
 0x112   :  { %811 = vmatpush2.msra.mxu1 %v612_v7  ;;  %888 = vmatpush2.msra.mxu0 %v740_v8  ;;  %v301_v5 = vrot.slane %v296_v3, %v2960_v39  ;;  %v309_v6 = vrot.slane %v296_v3, %v3355_v2 }
 0x113   :  { %812 = vmatprep.subr.mxu1 %v609_v9  ;;  %889 = vmatprep.subr.mxu0 %v737_v10  ;;  %v305_v9 = vrot.slane %v296_v3, %v2966_v41  ;;  %v313_v10 = vrot.slane %v296_v3, %v3361_v4  ;;  %v535_v3 = vld [vmem:[%s5297_s5 + $0x138] sm:$0xff] }
 0x114   :  { %813 = vmatpush2.msra.mxu1 %v608_v11  ;;  %890 = vmatpush2.msra.mxu0 %v736_v12 }
 0x115   :  { %814 = vmatprep.subr.mxu1 %v605_v13  ;;  %891 = vmatprep.subr.mxu0 %v733_v14 }
 0x116   :  { %815 = vmatpush2.msra.mxu1 %v604_v15  ;;  %892 = vmatpush2.msra.mxu0 %v732_v16 }
 0x117   :  { %816 = vmatprep.subr.mxu1 %v601_v17  ;;  %893 = vmatprep.subr.mxu0 %v729_v18 }
 0x118   :  { %817 = vmatpush2.msra.mxu1 %v600_v19  ;;  %894 = vmatpush2.msra.mxu0 %v728_v20 }
 0x119   :  { %818 = vmatprep.subr.mxu1 %v597_v21  ;;  %895 = vmatprep.subr.mxu0 %v725_v22 }
 0x11a   :  { %819 = vmatpush2.msra.mxu1 %v596_v23  ;;  %896 = vmatpush2.msra.mxu0 %v724_v24 }
 0x11b   :  { %820 = vmatprep.subr.mxu1 %v593_v25  ;;  %897 = vmatprep.subr.mxu0 %v721_v26 }
 0x11c   :  { %821 = vmatpush2.msra.mxu1 %v592_v27  ;;  %898 = vmatpush2.msra.mxu0 %v720_v28 }
 0x11d   :  { %822 = vmatprep.subr.mxu1 %v589_v29  ;;  %899 = vmatprep.subr.mxu0 %v717_v30 }
 0x11e   :  { %823 = vmatpush2.msra.mxu1 %v588_v31  ;;  %900 = vmatpush2.msra.mxu0 %v716_v32  ;;  %v558_v31 = vld [vmem:[%s5297_s5 + $0x1f0] sm:$0xff] }
 0x11f   :  { %824 = vmatprep.subr.mxu1 %v585_v33  ;;  %901 = vmatprep.subr.mxu0 %v713_v34  ;;  %v686_v32 = vld [vmem:[%s5297_s5 + $0x5f0] sm:$0xff] }
 0x120   :  { %825 = vmatpush2.msra.mxu1 %v584_v35  ;;  %902 = vmatpush2.msra.mxu0 %v712_v36 }
 0x121   :  { %826 = vmatprep.subr.mxu1 %v581_v37  ;;  %903 = vmatprep.subr.mxu0 %v709_v40  ;;  %v555_v37 = vld [vmem:[%s5297_s5 + $0x1d8] sm:$0xff] }
 0x122   :  { %827 = vmatpush2.msra.mxu1 %v580_v42  ;;  %904 = vmatpush2.msra.mxu0 %v708_v43  ;;  %v683_v40 = vld [vmem:[%s5297_s5 + $0x5d8] sm:$0xff] }
 0x123   :  { %828 = vmatprep.subr.mxu1 %v577_v44  ;;  %905 = vmatprep.subr.mxu0 %v705_v45  ;;  %v554_v44 = vld [vmem:[%s5297_s5 + $0x1d0] sm:$0xff] }
 0x124   :  { %829 = vmatpush2.msra.mxu1 %v576_v46  ;;  %906 = vmatpush2.msra.mxu0 %v704_v47  ;;  %v682_v45 = vld [vmem:[%s5297_s5 + $0x5d0] sm:$0xff] }
 0x125   :  { %830 = vmatprep.subr.mxu1 %v573_v48  ;;  %907 = vmatprep.subr.mxu0 %v701_v49  ;;  %v551_v48 = vld [vmem:[%s5297_s5 + $0x1b8] sm:$0xff] }
 0x126   :  { %831 = vmatpush2.msra.mxu1 %v572_v50  ;;  %908 = vmatpush2.msra.mxu0 %v700_v51  ;;  %v679_v49 = vld [vmem:[%s5297_s5 + $0x5b8] sm:$0xff] }
 0x127   :  { %832 = vmatprep.subr.mxu1 %v569_v52  ;;  %909 = vmatprep.subr.mxu0 %v697_v53  ;;  %v550_v52 = vld [vmem:[%s5297_s5 + $0x1b0] sm:$0xff] }
 0x128   :  { %833 = vmatpush2.msra.mxu1 %v568_v54  ;;  %910 = vmatpush2.msra.mxu0 %v696_v55  ;;  %v678_v53 = vld [vmem:[%s5297_s5 + $0x5b0] sm:$0xff]  ;;  %v547_v54 = vld [vmem:[%s5297_s5 + $0x198] sm:$0xff] }
 0x129   :  { %834 = vmatprep.subr.mxu1 %v565_v56  ;;  %911 = vmatprep.subr.mxu0 %v693_v57  ;;  %v675_v55 = vld [vmem:[%s5297_s5 + $0x598] sm:$0xff]  ;;  %v546_v56 = vld [vmem:[%s5297_s5 + $0x190] sm:$0xff] }
 0x12a   :  { %835 = vmatpush2.msra.mxu1 %v564_v58  ;;  %912 = vmatpush2.msra.mxu0 %v692_v59  ;;  %v674_v57 = vld [vmem:[%s5297_s5 + $0x590] sm:$0xff]  ;;  %v543_v58 = vld [vmem:[%s5297_s5 + $0x178] sm:$0xff] }
 0x12b   :  { %836 = vmatprep.subr.mxu1 %v561_v60  ;;  %913 = vmatprep.subr.mxu0 %v689_v61  ;;  %v671_v59 = vld [vmem:[%s5297_s5 + $0x578] sm:$0xff]  ;;  %v542_v60 = vld [vmem:[%s5297_s5 + $0x170] sm:$0xff] }
 0x12c   :  { %837 = vmatpush2.msra.mxu1 %v560_v62  ;;  %914 = vmatpush2.msra.mxu0 %v688_v63  ;;  %v670_v61 = vld [vmem:[%s5297_s5 + $0x570] sm:$0xff]  ;;  %v539_v62 = vld [vmem:[%s5297_s5 + $0x158] sm:$0xff] }
 0x12d   :  { %928 = vmatprep.subr.mxu1 %v559_v0  ;;  %1005 = vmatprep.subr.mxu0 %v687_v1  ;;  %v667_v63 = vld [vmem:[%s5297_s5 + $0x558] sm:$0xff]  ;;  %v538_v0 = vld [vmem:[%s5297_s5 + $0x150] sm:$0xff] }
 0x12e   :  { %v666_v1 = vld [vmem:[%s5297_s5 + $0x550] sm:$0xff] }
 0x1ab   :  { %v384_v7 = vpop.f32.mrf.mxu1  ;;  %v461_v8 = vpop.f32.mrf.mxu0 }
 0x1ac   :  { %v385_v11 = vadd.f32 %v384_v7, %v301_v5  ;;  %v462_v12 = vadd.f32 %v461_v8, %v309_v6  ;;  %v662_v7 = vld [vmem:[%s5297_s5 + $0x530] sm:$0xff]  ;;  %v531_v8 = vld [vmem:[%s5297_s5 + $0x118] sm:$0xff] }
 0x1ad   :  { %v386_v13 = vpop.f32.mrf.mxu1  ;;  %v463_v14 = vpop.f32.mrf.mxu0 }
 0x1ae   :  { %v480_v15 = vmul.f32 0.2, %v385_v11  ;;  %v482_v16 = vmul.f32 0.2, %v462_v12  ;;  %vm472_vm4 = vcmp.ge.f32.partialorder %v385_v11, 0.0  ;;  %vm474_vm5 = vcmp.ge.f32.partialorder %v462_v12, 0.0 }
 0x1af   :  { %v387_v17 = vadd.f32 %v386_v13, %v305_v9  ;;  %v464_v18 = vadd.f32 %v463_v14, %v313_v10  ;;  %v390_v19 = vpop.f32.mrf.mxu1  ;;  %v467_v20 = vpop.f32.mrf.mxu0  ;;  %v655_v13 = vld [vmem:[%s5297_s5 + $0x4f8] sm:$0xff]  ;;  %v526_v14 = vld [vmem:[%s5297_s5 + $0xf0] sm:$0xff] }
 0x1b0   :  { %v391_v21 = vadd.f32 %v390_v19, %v301_v5  ;;  %v468_v22 = vadd.f32 %v467_v20, %v309_v6  ;;  %v3367_v27 = vsel %vm472_vm4, %v385_v11, %v480_v15  ;;  %v3369_v28 = vsel %vm474_vm5, %v462_v12, %v482_v16  ;;  %v663_v5 = vld [vmem:[%s5297_s5 + $0x538] sm:$0xff]  ;;  %v534_v6 = vld [vmem:[%s5297_s5 + $0x130] sm:$0xff] }
 0x1b1   :  { %v481_v23 = vmul.f32 0.2, %v387_v17  ;;  %v483_v24 = vmul.f32 0.2, %v464_v18  ;;  %v392_v25 = vpop.f32.mrf.mxu1  ;;  %v469_v26 = vpop.f32.mrf.mxu0  ;;  %vm473_vm6 = vcmp.ge.f32.partialorder %v387_v17, 0.0  ;;  %vm475_vm7 = vcmp.ge.f32.partialorder %v464_v18, 0.0 }
 0x1b2   :  { %v393_v29 = vadd.f32 %v392_v25, %v305_v9  ;;  %v470_v30 = vadd.f32 %v469_v26, %v313_v10  ;;  %v484_v33 = vmul.f32 0.2, %v391_v21  ;;  %v486_v34 = vmul.f32 0.2, %v468_v22  ;;  %v659_v9 = vld [vmem:[%s5297_s5 + $0x518] sm:$0xff]  ;;  %v530_v10 = vld [vmem:[%s5297_s5 + $0x110] sm:$0xff] }
 0x1b3   :  { %v489_v35 = vsel %vm473_vm6, %v387_v17, %v481_v23  ;;  %v491_v36 = vsel %vm475_vm7, %v464_v18, %v483_v24  ;;  %vm476_vm10 = vcmp.ge.f32.partialorder %v391_v21, 0.0  ;;  %vm478_vm11 = vcmp.ge.f32.partialorder %v468_v22, 0.0  ;;  %v658_v11 = vld [vmem:[%s5297_s5 + $0x510] sm:$0xff]  ;;  %v527_v12 = vld [vmem:[%s5297_s5 + $0xf8] sm:$0xff] }
 0x1b4   :  { %v485_v42 = vmul.f32 0.2, %v393_v29  ;;  %v487_v43 = vmul.f32 0.2, %v470_v30  ;;  %838 = vmatprep.mubr.f32.mxu1 %v489_v35  ;;  %915 = vmatprep.mubr.f32.mxu0 %v491_v36  ;;  %vm477_vm8 = vcmp.ge.f32.partialorder %v393_v29, 0.0  ;;  %vm479_vm9 = vcmp.ge.f32.partialorder %v470_v30, 0.0 }
 0x1b5   :  { %839 = vmatmul.mubr.f32.vlgmr.msra.gmra.mxu1 %v3367_v27  ;;  %916 = vmatmul.mubr.f32.vlgmr.msra.gmra.mxu0 %v3369_v28  ;;  %v3401_v50 = vsel %vm476_vm10, %v391_v21, %v484_v33  ;;  %v3403_v51 = vsel %vm478_vm11, %v468_v22, %v486_v34  ;;  %v654_v15 = vld [vmem:[%s5297_s5 + $0x4f0] sm:$0xff]  ;;  %v523_v16 = vld [vmem:[%s5297_s5 + $0xd8] sm:$0xff] }
 0x1b6   :  { %929 = vmatpush1.msra.mxu1 %v558_v31  ;;  %1006 = vmatpush1.msra.mxu0 %v686_v32  ;;  %v3391_v46 = vsel %vm477_vm8, %v393_v29, %v485_v42  ;;  %v3393_v47 = vsel %vm479_vm9, %v470_v30, %v487_v43  ;;  %v651_v17 = vld [vmem:[%s5297_s5 + $0x4d8] sm:$0xff]  ;;  %v522_v18 = vld [vmem:[%s5297_s5 + $0xd0] sm:$0xff] }
 0x1b7   :  { %930 = vmatprep.subr.mxu1 %v555_v37  ;;  %1007 = vmatprep.subr.mxu0 %v683_v40  ;;  %v650_v19 = vld [vmem:[%s5297_s5 + $0x4d0] sm:$0xff]  ;;  %v519_v20 = vld [vmem:[%s5297_s5 + $0xb8] sm:$0xff] }
 0x1b8   :  { %931 = vmatpush1.msra.mxu1 %v554_v44  ;;  %1008 = vmatpush1.msra.mxu0 %v682_v45  ;;  %v647_v21 = vld [vmem:[%s5297_s5 + $0x4b8] sm:$0xff]  ;;  %v518_v22 = vld [vmem:[%s5297_s5 + $0xb0] sm:$0xff] }
 0x1b9   :  { %844 = vmatprep.mubr.f32.mxu1 %v3391_v46  ;;  %921 = vmatprep.mubr.f32.mxu0 %v3393_v47  ;;  %v646_v23 = vld [vmem:[%s5297_s5 + $0x4b0] sm:$0xff]  ;;  %v515_v24 = vld [vmem:[%s5297_s5 + $0x98] sm:$0xff] }
 0x1ba   :  { %932 = vmatprep.subr.mxu1 %v551_v48  ;;  %1009 = vmatprep.subr.mxu0 %v679_v49  ;;  %v643_v25 = vld [vmem:[%s5297_s5 + $0x498] sm:$0xff]  ;;  %v514_v26 = vld [vmem:[%s5297_s5 + $0x90] sm:$0xff] }
 0x1bb   :  { %845 = vmatmul.mubr.f32.gmra.mxu1 %v3401_v50  ;;  %922 = vmatmul.mubr.f32.gmra.mxu0 %v3403_v51  ;;  %v642_v29 = vld [vmem:[%s5297_s5 + $0x490] sm:$0xff]  ;;  %v511_v30 = vld [vmem:[%s5297_s5 + $0x78] sm:$0xff] }
 0x1bc   :  { %933 = vmatpush1.msra.mxu1 %v550_v52  ;;  %1010 = vmatpush1.msra.mxu0 %v678_v53  ;;  %v639_v31 = vld [vmem:[%s5297_s5 + $0x478] sm:$0xff]  ;;  %v510_v32 = vld [vmem:[%s5297_s5 + $0x70] sm:$0xff] }
 0x1bd   :  { %934 = vmatprep.subr.mxu1 %v547_v54  ;;  %992 = vmatprep.mubr.f32.mxu1 %v489_v35  ;;  %v638_v33 = vld [vmem:[%s5297_s5 + $0x470] sm:$0xff]  ;;  %v507_v34 = vld [vmem:[%s5297_s5 + $0x58] sm:$0xff] }
 0x1be   :  { %1011 = vmatprep.subr.mxu0 %v675_v55  ;;  %1069 = vmatprep.mubr.f32.mxu0 %v491_v36  ;;  %v635_v35 = vld [vmem:[%s5297_s5 + $0x458] sm:$0xff]  ;;  %v506_v36 = vld [vmem:[%s5297_s5 + $0x50] sm:$0xff] }
 0x1bf   :  { %935 = vmatpush1.msra.mxu1 %v546_v56  ;;  %1012 = vmatpush1.msra.mxu0 %v674_v57  ;;  %v634_v37 = vld [vmem:[%s5297_s5 + $0x450] sm:$0xff]  ;;  %v503_v40 = vld [vmem:[%s5297_s5 + $0x38] sm:$0xff] }
 0x1c0   :  { %936 = vmatprep.subr.mxu1 %v543_v58  ;;  %1013 = vmatprep.subr.mxu0 %v671_v59  ;;  %v631_v42 = vld [vmem:[%s5297_s5 + $0x438] sm:$0xff]  ;;  %v502_v43 = vld [vmem:[%s5297_s5 + $0x30] sm:$0xff] }
 0x1c1   :  { %937 = vmatpush1.msra.mxu1 %v542_v60  ;;  %1014 = vmatpush1.msra.mxu0 %v670_v61  ;;  %v630_v44 = vld [vmem:[%s5297_s5 + $0x430] sm:$0xff]  ;;  %v499_v45 = vld [vmem:[%s5297_s5 + $0x18] sm:$0xff] }
 0x1c2   :  { %938 = vmatprep.subr.mxu1 %v539_v62  ;;  %1015 = vmatprep.subr.mxu0 %v667_v63  ;;  %v627_v48 = vld [vmem:[%s5297_s5 + $0x418] sm:$0xff]  ;;  %v498_v49 = vld [vmem:[%s5297_s5 + $0x10] sm:$0xff] }
 0x1c3   :  { %939 = vmatpush1.msra.mxu1 %v538_v0  ;;  %1016 = vmatpush1.msra.mxu0 %v666_v1  ;;  %v626_v52 = vld [vmem:[%s5297_s5 + $0x410] sm:$0xff]  ;;  %v623_v53 = vld [vmem:[%s5297_s5 + $0x3f8] sm:$0xff] }
 0x1c4   :  { %940 = vmatprep.subr.mxu1 %v535_v3  ;;  %1017 = vmatprep.subr.mxu0 %v663_v5  ;;  %v751_v54 = vld [vmem:[%s5297_s5 + $0x7f8] sm:$0xff]  ;;  %v622_v55 = vld [vmem:[%s5297_s5 + $0x3f0] sm:$0xff] }
 0x1c5   :  { %941 = vmatpush1.msra.mxu1 %v534_v6  ;;  %1018 = vmatpush1.msra.mxu0 %v662_v7  ;;  %v750_v56 = vld [vmem:[%s5297_s5 + $0x7f0] sm:$0xff]  ;;  %v619_v57 = vld [vmem:[%s5297_s5 + $0x3d8] sm:$0xff] }
 0x1c6   :  { %942 = vmatprep.subr.mxu1 %v531_v8  ;;  %1019 = vmatprep.subr.mxu0 %v659_v9  ;;  %v747_v58 = vld [vmem:[%s5297_s5 + $0x7d8] sm:$0xff]  ;;  %v618_v59 = vld [vmem:[%s5297_s5 + $0x3d0] sm:$0xff] }
 0x1c7   :  { %943 = vmatpush1.msra.mxu1 %v530_v10  ;;  %1020 = vmatpush1.msra.mxu0 %v658_v11  ;;  %v746_v60 = vld [vmem:[%s5297_s5 + $0x7d0] sm:$0xff]  ;;  %v615_v61 = vld [vmem:[%s5297_s5 + $0x3b8] sm:$0xff] }
 0x1c8   :  { %944 = vmatprep.subr.mxu1 %v527_v12  ;;  %1021 = vmatprep.subr.mxu0 %v655_v13  ;;  %v743_v62 = vld [vmem:[%s5297_s5 + $0x7b8] sm:$0xff]  ;;  %v614_v63 = vld [vmem:[%s5297_s5 + $0x3b0] sm:$0xff] }
 0x1c9   :  { %945 = vmatpush1.msra.mxu1 %v526_v14  ;;  %1022 = vmatpush1.msra.mxu0 %v654_v15  ;;  %v742_v0 = vld [vmem:[%s5297_s5 + $0x7b0] sm:$0xff]  ;;  %v611_v1 = vld [vmem:[%s5297_s5 + $0x398] sm:$0xff] }
 0x1ca   :  { %946 = vmatprep.subr.mxu1 %v523_v16  ;;  %1023 = vmatprep.subr.mxu0 %v651_v17  ;;  %v739_v3 = vld [vmem:[%s5297_s5 + $0x798] sm:$0xff]  ;;  %v610_v5 = vld [vmem:[%s5297_s5 + $0x390] sm:$0xff] }
 0x1cb   :  { %947 = vmatpush1.msra.mxu1 %v522_v18  ;;  %1024 = vmatpush1.msra.mxu0 %v650_v19  ;;  %v738_v6 = vld [vmem:[%s5297_s5 + $0x790] sm:$0xff]  ;;  %v607_v7 = vld [vmem:[%s5297_s5 + $0x378] sm:$0xff] }
 0x1cc   :  { %948 = vmatprep.subr.mxu1 %v519_v20  ;;  %1025 = vmatprep.subr.mxu0 %v647_v21  ;;  %v735_v8 = vld [vmem:[%s5297_s5 + $0x778] sm:$0xff]  ;;  %v606_v9 = vld [vmem:[%s5297_s5 + $0x370] sm:$0xff] }
 0x1cd   :  { %949 = vmatpush1.msra.mxu1 %v518_v22  ;;  %1026 = vmatpush1.msra.mxu0 %v646_v23  ;;  %v734_v10 = vld [vmem:[%s5297_s5 + $0x770] sm:$0xff]  ;;  %v603_v11 = vld [vmem:[%s5297_s5 + $0x358] sm:$0xff] }
 0x1ce   :  { %950 = vmatprep.subr.mxu1 %v515_v24  ;;  %1027 = vmatprep.subr.mxu0 %v643_v25  ;;  %v731_v12 = vld [vmem:[%s5297_s5 + $0x758] sm:$0xff]  ;;  %v602_v13 = vld [vmem:[%s5297_s5 + $0x350] sm:$0xff] }
 0x1cf   :  { %951 = vmatpush1.msra.mxu1 %v514_v26  ;;  %1028 = vmatpush1.msra.mxu0 %v642_v29  ;;  %v730_v14 = vld [vmem:[%s5297_s5 + $0x750] sm:$0xff]  ;;  %v599_v15 = vld [vmem:[%s5297_s5 + $0x338] sm:$0xff] }
 0x1d0   :  { %952 = vmatprep.subr.mxu1 %v511_v30  ;;  %1029 = vmatprep.subr.mxu0 %v639_v31  ;;  %v727_v16 = vld [vmem:[%s5297_s5 + $0x738] sm:$0xff]  ;;  %v598_v17 = vld [vmem:[%s5297_s5 + $0x330] sm:$0xff] }
 0x1d1   :  { %953 = vmatpush1.msra.mxu1 %v510_v32  ;;  %1030 = vmatpush1.msra.mxu0 %v638_v33  ;;  %v726_v18 = vld [vmem:[%s5297_s5 + $0x730] sm:$0xff]  ;;  %v595_v19 = vld [vmem:[%s5297_s5 + $0x318] sm:$0xff] }
 0x1d2   :  { %954 = vmatprep.subr.mxu1 %v507_v34  ;;  %1031 = vmatprep.subr.mxu0 %v635_v35  ;;  %v723_v20 = vld [vmem:[%s5297_s5 + $0x718] sm:$0xff]  ;;  %v594_v21 = vld [vmem:[%s5297_s5 + $0x310] sm:$0xff] }
 0x1d3   :  { %955 = vmatpush1.msra.mxu1 %v506_v36  ;;  %1032 = vmatpush1.msra.mxu0 %v634_v37  ;;  %v722_v22 = vld [vmem:[%s5297_s5 + $0x710] sm:$0xff]  ;;  %v591_v23 = vld [vmem:[%s5297_s5 + $0x2f8] sm:$0xff] }
 0x1d4   :  { %956 = vmatprep.subr.mxu1 %v503_v40  ;;  %1033 = vmatprep.subr.mxu0 %v631_v42  ;;  %v719_v24 = vld [vmem:[%s5297_s5 + $0x6f8] sm:$0xff]  ;;  %v590_v25 = vld [vmem:[%s5297_s5 + $0x2f0] sm:$0xff] }
 0x1d5   :  { %957 = vmatpush1.msra.mxu1 %v502_v43  ;;  %1034 = vmatpush1.msra.mxu0 %v630_v44  ;;  %v718_v26 = vld [vmem:[%s5297_s5 + $0x6f0] sm:$0xff]  ;;  %v587_v29 = vld [vmem:[%s5297_s5 + $0x2d8] sm:$0xff] }
 0x1d6   :  { %958 = vmatprep.subr.mxu1 %v499_v45  ;;  %1035 = vmatprep.subr.mxu0 %v627_v48  ;;  %v715_v30 = vld [vmem:[%s5297_s5 + $0x6d8] sm:$0xff]  ;;  %v586_v31 = vld [vmem:[%s5297_s5 + $0x2d0] sm:$0xff] }
 0x1d7   :  { %959 = vmatpush1.msra.mxu1 %v498_v49  ;;  %1036 = vmatpush1.msra.mxu0 %v626_v52  ;;  %v714_v32 = vld [vmem:[%s5297_s5 + $0x6d0] sm:$0xff]  ;;  %v583_v33 = vld [vmem:[%s5297_s5 + $0x2b8] sm:$0xff] }
 0x1d8   :  { %960 = vmatprep.subr.mxu1 %v623_v53  ;;  %1037 = vmatprep.subr.mxu0 %v751_v54  ;;  %v711_v34 = vld [vmem:[%s5297_s5 + $0x6b8] sm:$0xff]  ;;  %v582_v35 = vld [vmem:[%s5297_s5 + $0x2b0] sm:$0xff] }
 0x1d9   :  { %961 = vmatpush2.msra.mxu1 %v622_v55  ;;  %1038 = vmatpush2.msra.mxu0 %v750_v56  ;;  %v710_v36 = vld [vmem:[%s5297_s5 + $0x6b0] sm:$0xff]  ;;  %v579_v37 = vld [vmem:[%s5297_s5 + $0x298] sm:$0xff] }
 0x1da   :  { %962 = vmatprep.subr.mxu1 %v619_v57  ;;  %1039 = vmatprep.subr.mxu0 %v747_v58  ;;  %v707_v40 = vld [vmem:[%s5297_s5 + $0x698] sm:$0xff]  ;;  %v578_v42 = vld [vmem:[%s5297_s5 + $0x290] sm:$0xff] }
 0x1db   :  { %963 = vmatpush2.msra.mxu1 %v618_v59  ;;  %1040 = vmatpush2.msra.mxu0 %v746_v60  ;;  %v706_v43 = vld [vmem:[%s5297_s5 + $0x690] sm:$0xff]  ;;  %v575_v44 = vld [vmem:[%s5297_s5 + $0x278] sm:$0xff] }
 0x1dc   :  { %964 = vmatprep.subr.mxu1 %v615_v61  ;;  %1041 = vmatprep.subr.mxu0 %v743_v62  ;;  %v703_v45 = vld [vmem:[%s5297_s5 + $0x678] sm:$0xff]  ;;  %v574_v48 = vld [vmem:[%s5297_s5 + $0x270] sm:$0xff] }
 0x1dd   :  { %965 = vmatpush2.msra.mxu1 %v614_v63  ;;  %1042 = vmatpush2.msra.mxu0 %v742_v0  ;;  %v702_v49 = vld [vmem:[%s5297_s5 + $0x670] sm:$0xff]  ;;  %v571_v52 = vld [vmem:[%s5297_s5 + $0x258] sm:$0xff] }
 0x1de   :  { %966 = vmatprep.subr.mxu1 %v611_v1  ;;  %1043 = vmatprep.subr.mxu0 %v739_v3  ;;  %v699_v53 = vld [vmem:[%s5297_s5 + $0x658] sm:$0xff]  ;;  %v570_v54 = vld [vmem:[%s5297_s5 + $0x250] sm:$0xff]  ;;  %v1211_v1 = vld [vmem:[%s5299_s7 + $0x348] sm:$0xff] }
 0x1df   :  { %967 = vmatpush2.msra.mxu1 %v610_v5  ;;  %1044 = vmatpush2.msra.mxu0 %v738_v6  ;;  %v698_v55 = vld [vmem:[%s5297_s5 + $0x650] sm:$0xff]  ;;  %v567_v56 = vld [vmem:[%s5297_s5 + $0x238] sm:$0xff]  ;;  %v1183_v5 = vld [vmem:[%s5299_s7 + $0x268] sm:$0xff] }
 0x1e0   :  { %968 = vmatprep.subr.mxu1 %v607_v7  ;;  %1045 = vmatprep.subr.mxu0 %v735_v8  ;;  %v695_v57 = vld [vmem:[%s5297_s5 + $0x638] sm:$0xff]  ;;  %v566_v58 = vld [vmem:[%s5297_s5 + $0x230] sm:$0xff]  ;;  %v1435_v8 = vld [vmem:[%s5299_s7 + $0xa48] sm:$0xff] }
 0x1e1   :  { %969 = vmatpush2.msra.mxu1 %v606_v9  ;;  %1046 = vmatpush2.msra.mxu0 %v734_v10  ;;  %v694_v59 = vld [vmem:[%s5297_s5 + $0x630] sm:$0xff]  ;;  %v563_v60 = vld [vmem:[%s5297_s5 + $0x218] sm:$0xff] }
 0x1e2   :  { %970 = vmatprep.subr.mxu1 %v603_v11  ;;  %1047 = vmatprep.subr.mxu0 %v731_v12  ;;  %v691_v61 = vld [vmem:[%s5297_s5 + $0x618] sm:$0xff]  ;;  %v562_v62 = vld [vmem:[%s5297_s5 + $0x210] sm:$0xff]  ;;  %v1170_v12 = vld [vmem:[%s5299_s7 + $0x200] sm:$0xff] }
 0x1e3   :  { %971 = vmatpush2.msra.mxu1 %v602_v13  ;;  %1048 = vmatpush2.msra.mxu0 %v730_v14  ;;  %v690_v63 = vld [vmem:[%s5297_s5 + $0x610] sm:$0xff]  ;;  %v1205_v3 = vld [vmem:[%s5299_s7 + $0x318] sm:$0xff]  ;;  %v1422_v13 = vld [vmem:[%s5299_s7 + $0x9e0] sm:$0xff] }
 0x1e4   :  { %972 = vmatprep.subr.mxu1 %v599_v15  ;;  %1049 = vmatprep.subr.mxu0 %v727_v16  ;;  %v1212_v0 = vld [vmem:[%s5299_s7 + $0x350] sm:$0xff]  ;;  %v1177_v7 = vld [vmem:[%s5299_s7 + $0x238] sm:$0xff]  ;;  %v1163_v16 = vld [vmem:[%s5299_s7 + $0x1c8] sm:$0xff] }
 0x1e5   :  { %973 = vmatpush2.msra.mxu1 %v598_v17  ;;  %1050 = vmatpush2.msra.mxu0 %v726_v18  ;;  %v1436_v6 = vld [vmem:[%s5299_s7 + $0xa50] sm:$0xff]  ;;  %v1429_v9 = vld [vmem:[%s5299_s7 + $0xa18] sm:$0xff]  ;;  %v1415_v17 = vld [vmem:[%s5299_s7 + $0x9a8] sm:$0xff] }
 0x1e6   :  { %974 = vmatprep.subr.mxu1 %v595_v19  ;;  %1051 = vmatprep.subr.mxu0 %v723_v20  ;;  %v1176_v10 = vld [vmem:[%s5299_s7 + $0x230] sm:$0xff]  ;;  %v1169_v14 = vld [vmem:[%s5299_s7 + $0x1f8] sm:$0xff]  ;;  %v1414_v18 = vld [vmem:[%s5299_s7 + $0x9a0] sm:$0xff] }
 0x1e7   :  { %975 = vmatpush2.msra.mxu1 %v594_v21  ;;  %1052 = vmatpush2.msra.mxu0 %v722_v22  ;;  %v1428_v11 = vld [vmem:[%s5299_s7 + $0xa10] sm:$0xff]  ;;  %v1421_v15 = vld [vmem:[%s5299_s7 + $0x9d8] sm:$0xff]  ;;  %v1162_v19 = vld [vmem:[%s5299_s7 + $0x1c0] sm:$0xff] }
 0x1e8   :  { %976 = vmatprep.subr.mxu1 %v591_v23  ;;  %1053 = vmatprep.subr.mxu0 %v719_v24  ;;  %v1408_v20 = vld [vmem:[%s5299_s7 + $0x970] sm:$0xff]  ;;  %v1407_v22 = vld [vmem:[%s5299_s7 + $0x968] sm:$0xff]  ;;  %v1401_v24 = vld [vmem:[%s5299_s7 + $0x938] sm:$0xff] }
 0x1e9   :  { %977 = vmatpush2.msra.mxu1 %v590_v25  ;;  %1054 = vmatpush2.msra.mxu0 %v718_v26  ;;  %v1156_v21 = vld [vmem:[%s5299_s7 + $0x190] sm:$0xff]  ;;  %v1155_v23 = vld [vmem:[%s5299_s7 + $0x188] sm:$0xff]  ;;  %v1149_v25 = vld [vmem:[%s5299_s7 + $0x158] sm:$0xff] }
 0x1ea   :  { %978 = vmatprep.subr.mxu1 %v587_v29  ;;  %1055 = vmatprep.subr.mxu0 %v715_v30  ;;  %v1400_v26 = vld [vmem:[%s5299_s7 + $0x930] sm:$0xff]  ;;  %v1394_v30 = vld [vmem:[%s5299_s7 + $0x900] sm:$0xff] }
 0x1eb   :  { %979 = vmatpush2.msra.mxu1 %v586_v31  ;;  %1056 = vmatpush2.msra.mxu0 %v714_v32  ;;  %v1148_v29 = vld [vmem:[%s5299_s7 + $0x150] sm:$0xff]  ;;  %v1142_v31 = vld [vmem:[%s5299_s7 + $0x120] sm:$0xff]  ;;  %v1393_v32 = vld [vmem:[%s5299_s7 + $0x8f8] sm:$0xff] }
 0x1ec   :  { %980 = vmatprep.subr.mxu1 %v583_v33  ;;  %1057 = vmatprep.subr.mxu0 %v711_v34  ;;  %v1141_v33 = vld [vmem:[%s5299_s7 + $0x118] sm:$0xff]  ;;  %v1387_v34 = vld [vmem:[%s5299_s7 + $0x8c8] sm:$0xff] }
 0x1ed   :  { %981 = vmatpush2.msra.mxu1 %v582_v35  ;;  %1058 = vmatpush2.msra.mxu0 %v710_v36  ;;  %v1135_v35 = vld [vmem:[%s5299_s7 + $0xe8] sm:$0xff]  ;;  %v1386_v36 = vld [vmem:[%s5299_s7 + $0x8c0] sm:$0xff] }
 0x1ee   :  { %982 = vmatprep.subr.mxu1 %v579_v37  ;;  %1059 = vmatprep.subr.mxu0 %v707_v40  ;;  %v1134_v37 = vld [vmem:[%s5299_s7 + $0xe0] sm:$0xff]  ;;  %v1380_v40 = vld [vmem:[%s5299_s7 + $0x890] sm:$0xff] }
 0x1ef   :  { %983 = vmatpush2.msra.mxu1 %v578_v42  ;;  %1060 = vmatpush2.msra.mxu0 %v706_v43  ;;  %v1128_v42 = vld [vmem:[%s5299_s7 + $0xb0] sm:$0xff]  ;;  %v1379_v43 = vld [vmem:[%s5299_s7 + $0x888] sm:$0xff] }
 0x1f0   :  { %984 = vmatprep.subr.mxu1 %v575_v44  ;;  %1061 = vmatprep.subr.mxu0 %v703_v45  ;;  %v1127_v44 = vld [vmem:[%s5299_s7 + $0xa8] sm:$0xff]  ;;  %v1373_v45 = vld [vmem:[%s5299_s7 + $0x858] sm:$0xff] }
 0x1f1   :  { %985 = vmatpush2.msra.mxu1 %v574_v48  ;;  %1062 = vmatpush2.msra.mxu0 %v702_v49  ;;  %v1121_v48 = vld [vmem:[%s5299_s7 + $0x78] sm:$0xff]  ;;  %v1372_v49 = vld [vmem:[%s5299_s7 + $0x850] sm:$0xff] }
 0x1f2   :  { %986 = vmatprep.subr.mxu1 %v571_v52  ;;  %1063 = vmatprep.subr.mxu0 %v699_v53  ;;  %v1120_v52 = vld [vmem:[%s5299_s7 + $0x70] sm:$0xff]  ;;  %v1366_v53 = vld [vmem:[%s5299_s7 + $0x820] sm:$0xff] }
 0x1f3   :  { %987 = vmatpush2.msra.mxu1 %v570_v54  ;;  %1064 = vmatpush2.msra.mxu0 %v698_v55  ;;  %v1114_v54 = vld [vmem:[%s5299_s7 + $0x40] sm:$0xff]  ;;  %v1365_v55 = vld [vmem:[%s5299_s7 + $0x818] sm:$0xff] }
 0x1f4   :  { %988 = vmatprep.subr.mxu1 %v567_v56  ;;  %1065 = vmatprep.subr.mxu0 %v695_v57  ;;  %v1113_v56 = vld [vmem:[%s5299_s7 + $0x38] sm:$0xff]  ;;  %v1359_v57 = vld [vmem:[%s5299_s7 + $0x7e8] sm:$0xff] }
 0x1f5   :  { %989 = vmatpush2.msra.mxu1 %v566_v58  ;;  %1066 = vmatpush2.msra.mxu0 %v694_v59  ;;  %v1107_v58 = vld [vmem:[%s5299_s7 + $0x8] sm:$0xff]  ;;  %v1358_v59 = vld [vmem:[%s5299_s7 + $0x7e0] sm:$0xff] }
 0x1f6   :  { %990 = vmatprep.subr.mxu1 %v563_v60  ;;  %1067 = vmatprep.subr.mxu0 %v691_v61  ;;  %v1106_v60 = vld [vmem:[%s5299_s7] sm:$0xff]  ;;  %v1352_v61 = vld [vmem:[%s5299_s7 + $0x7b0] sm:$0xff] }
 0x1f7   :  { %991 = vmatpush2.msra.mxu1 %v562_v62  ;;  %1068 = vmatpush2.msra.mxu0 %v690_v63  ;;  %v1324_v62 = vld [vmem:[%s5299_s7 + $0x6d0] sm:$0xff]  ;;  %v1351_v63 = vld [vmem:[%s5299_s7 + $0x7a8] sm:$0xff] }
 0x1f8   :  { %993 = vmatmul.mubr.f32.vlgmr.msra.gmra.mxu1 %v3367_v27  ;;  %1070 = vmatmul.mubr.f32.vlgmr.msra.gmra.mxu0 %v3369_v28  ;;  %v1204_v27 = vld [vmem:[%s5299_s7 + $0x310] sm:$0xff]  ;;  %v1198_v28 = vld [vmem:[%s5299_s7 + $0x2e0] sm:$0xff] }
 0x1f9   :  { %998 = vmatprep.mubr.f32.mxu1 %v3391_v46  ;;  %1075 = vmatprep.mubr.f32.mxu0 %v3393_v47  ;;  %v1197_v46 = vld [vmem:[%s5299_s7 + $0x2d8] sm:$0xff]  ;;  %v1191_v47 = vld [vmem:[%s5299_s7 + $0x2a8] sm:$0xff] }
 0x1fa   :  { %1591 = vmatprep.subr.mxu1 %v1212_v0  ;;  %1668 = vmatprep.subr.mxu0 %v1436_v6  ;;  %v1323_v0 = vld [vmem:[%s5299_s7 + $0x6c8] sm:$0xff] }
 0x1fb   :  { %1592 = vmatpush1.msra.mxu1 %v1211_v1  ;;  %1669 = vmatpush1.msra.mxu0 %v1435_v8  ;;  %v1345_v1 = vld [vmem:[%s5299_s7 + $0x778] sm:$0xff]  ;;  %v1303_v6 = vld [vmem:[%s5299_s7 + $0x628] sm:$0xff]  ;;  %v1302_v8 = vld [vmem:[%s5299_s7 + $0x620] sm:$0xff] }
 0x1fc   :  { %999 = vmatmul.mubr.f32.gmra.mxu1 %v3401_v50  ;;  %1076 = vmatmul.mubr.f32.gmra.mxu0 %v3403_v51  ;;  %v1190_v50 = vld [vmem:[%s5299_s7 + $0x2a0] sm:$0xff]  ;;  %v1184_v51 = vld [vmem:[%s5299_s7 + $0x270] sm:$0xff] }
 0x1fd   :  { %1593 = vmatprep.subr.mxu1 %v1205_v3  ;;  %1670 = vmatprep.subr.mxu0 %v1429_v9  ;;  %v1317_v3 = vld [vmem:[%s5299_s7 + $0x698] sm:$0xff]  ;;  %v1548_v9 = vld [vmem:[%s5299_s7 + $0xdd0] sm:$0xff] }
 0x1fe   :  { %1594 = vmatpush1.msra.mxu1 %v1204_v27  ;;  %1671 = vmatpush1.msra.mxu0 %v1428_v11  ;;  %v1344_v27 = vld [vmem:[%s5299_s7 + $0x770] sm:$0xff]  ;;  %v1547_v11 = vld [vmem:[%s5299_s7 + $0xdc8] sm:$0xff] }
 0x1ff   :  { %1595 = vmatprep.subr.mxu1 %v1198_v28  ;;  %1672 = vmatprep.subr.mxu0 %v1422_v13  ;;  %v1316_v28 = vld [vmem:[%s5299_s7 + $0x690] sm:$0xff]  ;;  %v1541_v13 = vld [vmem:[%s5299_s7 + $0xd98] sm:$0xff] }
 0x200   :  { %1596 = vmatpush1.msra.mxu1 %v1197_v46  ;;  %1673 = vmatpush1.msra.mxu0 %v1421_v15  ;;  %v1338_v46 = vld [vmem:[%s5299_s7 + $0x740] sm:$0xff]  ;;  %v1540_v15 = vld [vmem:[%s5299_s7 + $0xd90] sm:$0xff] }
 0x201   :  { %1597 = vmatprep.subr.mxu1 %v1191_v47  ;;  %1674 = vmatprep.subr.mxu0 %v1415_v17  ;;  %v1310_v47 = vld [vmem:[%s5299_s7 + $0x660] sm:$0xff] }
 0x202   :  { %1598 = vmatpush1.msra.mxu1 %v1190_v50  ;;  %1675 = vmatpush1.msra.mxu0 %v1414_v18  ;;  %v1337_v50 = vld [vmem:[%s5299_s7 + $0x738] sm:$0xff]  ;;  %v1534_v17 = vld [vmem:[%s5299_s7 + $0xd60] sm:$0xff] }
 0x203   :  { %1599 = vmatprep.subr.mxu1 %v1184_v51  ;;  %1676 = vmatprep.subr.mxu0 %v1408_v20  ;;  %v1309_v51 = vld [vmem:[%s5299_s7 + $0x658] sm:$0xff]  ;;  %v1282_v18 = vld [vmem:[%s5299_s7 + $0x580] sm:$0xff] }
 0x204   :  { %1600 = vmatpush1.msra.mxu1 %v1183_v5  ;;  %1677 = vmatpush1.msra.mxu0 %v1407_v22  ;;  %v1331_v5 = vld [vmem:[%s5299_s7 + $0x708] sm:$0xff]  ;;  %v1281_v20 = vld [vmem:[%s5299_s7 + $0x578] sm:$0xff] }
 0x205   :  { %1601 = vmatprep.subr.mxu1 %v1177_v7  ;;  %1678 = vmatprep.subr.mxu0 %v1401_v24  ;;  %v1330_v7 = vld [vmem:[%s5299_s7 + $0x700] sm:$0xff]  ;;  %v1275_v22 = vld [vmem:[%s5299_s7 + $0x548] sm:$0xff] }
 0x206   :  { %1602 = vmatpush1.msra.mxu1 %v1176_v10  ;;  %1679 = vmatpush1.msra.mxu0 %v1400_v26  ;;  %v1296_v10 = vld [vmem:[%s5299_s7 + $0x5f0] sm:$0xff]  ;;  %v1274_v24 = vld [vmem:[%s5299_s7 + $0x540] sm:$0xff] }
 0x207   :  { %1603 = vmatprep.subr.mxu1 %v1170_v12  ;;  %1680 = vmatprep.subr.mxu0 %v1394_v30  ;;  %v1295_v12 = vld [vmem:[%s5299_s7 + $0x5e8] sm:$0xff]  ;;  %v1268_v26 = vld [vmem:[%s5299_s7 + $0x510] sm:$0xff] }
 0x208   :  { %1604 = vmatpush1.msra.mxu1 %v1169_v14  ;;  %1681 = vmatpush1.msra.mxu0 %v1393_v32  ;;  %v1289_v14 = vld [vmem:[%s5299_s7 + $0x5b8] sm:$0xff]  ;;  %v1267_v30 = vld [vmem:[%s5299_s7 + $0x508] sm:$0xff] }
 0x209   :  { %1605 = vmatprep.subr.mxu1 %v1163_v16  ;;  %1682 = vmatprep.subr.mxu0 %v1387_v34  ;;  %v1288_v16 = vld [vmem:[%s5299_s7 + $0x5b0] sm:$0xff]  ;;  %v1261_v32 = vld [vmem:[%s5299_s7 + $0x4d8] sm:$0xff] }
 0x20a   :  { %1606 = vmatpush1.msra.mxu1 %v1162_v19  ;;  %1683 = vmatpush1.msra.mxu0 %v1386_v36  ;;  %v1533_v19 = vld [vmem:[%s5299_s7 + $0xd58] sm:$0xff]  ;;  %v1260_v34 = vld [vmem:[%s5299_s7 + $0x4d0] sm:$0xff]  ;;  %v1254_v36 = vld [vmem:[%s5299_s7 + $0x4a0] sm:$0xff] }
 0x20b   :  { %1607 = vmatprep.subr.mxu1 %v1156_v21  ;;  %1684 = vmatprep.subr.mxu0 %v1380_v40  ;;  %v1527_v21 = vld [vmem:[%s5299_s7 + $0xd28] sm:$0xff]  ;;  %v1253_v40 = vld [vmem:[%s5299_s7 + $0x498] sm:$0xff] }
 0x20c   :  { %1608 = vmatpush1.msra.mxu1 %v1155_v23  ;;  %1685 = vmatpush1.msra.mxu0 %v1379_v43  ;;  %v1526_v23 = vld [vmem:[%s5299_s7 + $0xd20] sm:$0xff]  ;;  %v1247_v43 = vld [vmem:[%s5299_s7 + $0x468] sm:$0xff] }
 0x20d   :  { %1609 = vmatprep.subr.mxu1 %v1149_v25  ;;  %1686 = vmatprep.subr.mxu0 %v1373_v45  ;;  %v1520_v25 = vld [vmem:[%s5299_s7 + $0xcf0] sm:$0xff]  ;;  %v1246_v45 = vld [vmem:[%s5299_s7 + $0x460] sm:$0xff] }
 0x20e   :  { %1610 = vmatpush1.msra.mxu1 %v1148_v29  ;;  %1687 = vmatpush1.msra.mxu0 %v1372_v49  ;;  %v1519_v29 = vld [vmem:[%s5299_s7 + $0xce8] sm:$0xff]  ;;  %v1240_v49 = vld [vmem:[%s5299_s7 + $0x430] sm:$0xff] }
 0x20f   :  { %1611 = vmatprep.subr.mxu1 %v1142_v31  ;;  %1688 = vmatprep.subr.mxu0 %v1366_v53  ;;  %v1513_v31 = vld [vmem:[%s5299_s7 + $0xcb8] sm:$0xff]  ;;  %v1239_v53 = vld [vmem:[%s5299_s7 + $0x428] sm:$0xff] }
 0x210   :  { %1612 = vmatpush1.msra.mxu1 %v1141_v33  ;;  %1689 = vmatpush1.msra.mxu0 %v1365_v55  ;;  %v1512_v33 = vld [vmem:[%s5299_s7 + $0xcb0] sm:$0xff]  ;;  %v1233_v55 = vld [vmem:[%s5299_s7 + $0x3f8] sm:$0xff] }
 0x211   :  { %1613 = vmatprep.subr.mxu1 %v1135_v35  ;;  %1690 = vmatprep.subr.mxu0 %v1359_v57  ;;  %v1506_v35 = vld [vmem:[%s5299_s7 + $0xc80] sm:$0xff]  ;;  %v1232_v57 = vld [vmem:[%s5299_s7 + $0x3f0] sm:$0xff] }
 0x212   :  { %1614 = vmatpush1.msra.mxu1 %v1134_v37  ;;  %1691 = vmatpush1.msra.mxu0 %v1358_v59  ;;  %v1505_v37 = vld [vmem:[%s5299_s7 + $0xc78] sm:$0xff]  ;;  %v1226_v59 = vld [vmem:[%s5299_s7 + $0x3c0] sm:$0xff] }
 0x213   :  { %1615 = vmatprep.subr.mxu1 %v1128_v42  ;;  %1692 = vmatprep.subr.mxu0 %v1352_v61  ;;  %v1499_v42 = vld [vmem:[%s5299_s7 + $0xc48] sm:$0xff]  ;;  %v1225_v61 = vld [vmem:[%s5299_s7 + $0x3b8] sm:$0xff] }
 0x214   :  { %1616 = vmatpush1.msra.mxu1 %v1127_v44  ;;  %1693 = vmatpush1.msra.mxu0 %v1351_v63  ;;  %v1498_v44 = vld [vmem:[%s5299_s7 + $0xc40] sm:$0xff] }
 0x215   :  { %1617 = vmatprep.subr.mxu1 %v1121_v48  ;;  %1694 = vmatprep.subr.mxu0 %v1345_v1  ;;  %v1492_v48 = vld [vmem:[%s5299_s7 + $0xc10] sm:$0xff]  ;;  %v1218_v63 = vld [vmem:[%s5299_s7 + $0x380] sm:$0xff] }
 0x216   :  { %1618 = vmatpush1.msra.mxu1 %v1120_v52  ;;  %1695 = vmatpush1.msra.mxu0 %v1344_v27  ;;  %v1491_v52 = vld [vmem:[%s5299_s7 + $0xc08] sm:$0xff]  ;;  %v1214_v1 = vld [vmem:[%s5299_s7 + $0x360] sm:$0xff]  ;;  %v1464_v27 = vld [vmem:[%s5299_s7 + $0xb30] sm:$0xff] }
 0x217   :  { %1619 = vmatprep.subr.mxu1 %v1114_v54  ;;  %1696 = vmatprep.subr.mxu0 %v1338_v46  ;;  %v1485_v54 = vld [vmem:[%s5299_s7 + $0xbd8] sm:$0xff] }
 0x218   :  { %1620 = vmatpush1.msra.mxu1 %v1113_v56  ;;  %1697 = vmatpush1.msra.mxu0 %v1337_v50  ;;  %v1484_v56 = vld [vmem:[%s5299_s7 + $0xbd0] sm:$0xff]  ;;  %v1457_v46 = vld [vmem:[%s5299_s7 + $0xaf8] sm:$0xff]  ;;  %v1450_v50 = vld [vmem:[%s5299_s7 + $0xac0] sm:$0xff] }
 0x219   :  { %1621 = vmatprep.subr.mxu1 %v1107_v58  ;;  %1698 = vmatprep.subr.mxu0 %v1331_v5  ;;  %v1478_v58 = vld [vmem:[%s5299_s7 + $0xba0] sm:$0xff]  ;;  %v1443_v5 = vld [vmem:[%s5299_s7 + $0xa88] sm:$0xff] }
 0x21a   :  { %1622 = vmatpush1.msra.mxu1 %v1106_v60  ;;  %1699 = vmatpush1.msra.mxu0 %v1330_v7  ;;  %v1477_v60 = vld [vmem:[%s5299_s7 + $0xb98] sm:$0xff]  ;;  %v1438_v7 = vld [vmem:[%s5299_s7 + $0xa60] sm:$0xff] }
 0x21b   :  { %1623 = vmatprep.subr.mxu1 %v1324_v62  ;;  %1700 = vmatprep.subr.mxu0 %v1548_v9  ;;  %v1219_v62 = vld [vmem:[%s5299_s7 + $0x388] sm:$0xff] }
 0x21c   :  { %1624 = vmatpush2.msra.mxu1 %v1323_v0  ;;  %1701 = vmatpush2.msra.mxu0 %v1547_v11  ;;  %v1471_v0 = vld [vmem:[%s5299_s7 + $0xb68] sm:$0xff] }
 0x21d   :  { %1625 = vmatprep.subr.mxu1 %v1317_v3  ;;  %1702 = vmatprep.subr.mxu0 %v1541_v13  ;;  %v1470_v3 = vld [vmem:[%s5299_s7 + $0xb60] sm:$0xff] }
 0x21e   :  { %1626 = vmatpush2.msra.mxu1 %v1316_v28  ;;  %1703 = vmatpush2.msra.mxu0 %v1540_v15  ;;  %v1463_v28 = vld [vmem:[%s5299_s7 + $0xb28] sm:$0xff] }
 0x21f   :  { %1627 = vmatprep.subr.mxu1 %v1310_v47  ;;  %1704 = vmatprep.subr.mxu0 %v1534_v17  ;;  %v1456_v47 = vld [vmem:[%s5299_s7 + $0xaf0] sm:$0xff] }
 0x220   :  { %1628 = vmatpush2.msra.mxu1 %v1309_v51  ;;  %1705 = vmatpush2.msra.mxu0 %v1533_v19  ;;  %v1449_v51 = vld [vmem:[%s5299_s7 + $0xab8] sm:$0xff] }
 0x221   :  { %1629 = vmatprep.subr.mxu1 %v1303_v6  ;;  %1706 = vmatprep.subr.mxu0 %v1527_v21  ;;  %v1442_v6 = vld [vmem:[%s5299_s7 + $0xa80] sm:$0xff] }
 0x222   :  { %1630 = vmatpush2.msra.mxu1 %v1302_v8  ;;  %1707 = vmatpush2.msra.mxu0 %v1526_v23  ;;  %v4162_v8 = vld [vmem:[%s5298_s6] sm:$0xf] }
 0x223   :  { %1631 = vmatprep.subr.mxu1 %v1296_v10  ;;  %1708 = vmatprep.subr.mxu0 %v1520_v25  ;;  %v757_v9 = vrot.slane %v4162_v8, %v2960_v39  ;;  %v761_v10 = vrot.slane %v4162_v8, %v2966_v41 }
 0x224   :  { %1632 = vmatpush2.msra.mxu1 %v1295_v12  ;;  %1709 = vmatpush2.msra.mxu0 %v1519_v29 }
 0x225   :  { %1633 = vmatprep.subr.mxu1 %v1289_v14  ;;  %1710 = vmatprep.subr.mxu0 %v1513_v31  ;;  %v1213_v31 = vld [vmem:[%s5299_s7 + $0x358] sm:$0xff] }
 0x226   :  { %1634 = vmatpush2.msra.mxu1 %v1288_v16  ;;  %1711 = vmatpush2.msra.mxu0 %v1512_v33  ;;  %v1207_v33 = vld [vmem:[%s5299_s7 + $0x328] sm:$0xff] }
 0x227   :  { %1635 = vmatprep.subr.mxu1 %v1282_v18  ;;  %1712 = vmatprep.subr.mxu0 %v1506_v35 }
 0x228   :  { %1636 = vmatpush2.msra.mxu1 %v1281_v20  ;;  %1713 = vmatpush2.msra.mxu0 %v1505_v37  ;;  %v1200_v37 = vld [vmem:[%s5299_s7 + $0x2f0] sm:$0xff] }
 0x229   :  { %1637 = vmatprep.subr.mxu1 %v1275_v22  ;;  %1714 = vmatprep.subr.mxu0 %v1499_v42  ;;  %v1199_v42 = vld [vmem:[%s5299_s7 + $0x2e8] sm:$0xff] }
 0x22a   :  { %1638 = vmatpush2.msra.mxu1 %v1274_v24  ;;  %1715 = vmatpush2.msra.mxu0 %v1498_v44  ;;  %v1193_v44 = vld [vmem:[%s5299_s7 + $0x2b8] sm:$0xff] }
 0x22b   :  { %1639 = vmatprep.subr.mxu1 %v1268_v26  ;;  %1716 = vmatprep.subr.mxu0 %v1492_v48  ;;  %v1192_v48 = vld [vmem:[%s5299_s7 + $0x2b0] sm:$0xff] }
 0x22c   :  { %1640 = vmatpush2.msra.mxu1 %v1267_v30  ;;  %1717 = vmatpush2.msra.mxu0 %v1491_v52  ;;  %v1185_v52 = vld [vmem:[%s5299_s7 + $0x278] sm:$0xff] }
 0x22d   :  { %1641 = vmatprep.subr.mxu1 %v1261_v32  ;;  %1718 = vmatprep.subr.mxu0 %v1485_v54  ;;  %v1178_v54 = vld [vmem:[%s5299_s7 + $0x240] sm:$0xff] }
 0x22e   :  { %1642 = vmatpush2.msra.mxu1 %v1260_v34  ;;  %1719 = vmatpush2.msra.mxu0 %v1484_v56  ;;  %v1171_v56 = vld [vmem:[%s5299_s7 + $0x208] sm:$0xff] }
 0x22f   :  { %1643 = vmatprep.subr.mxu1 %v1254_v36  ;;  %1720 = vmatprep.subr.mxu0 %v1478_v58  ;;  %v1206_v36 = vld [vmem:[%s5299_s7 + $0x320] sm:$0xff]  ;;  %v1164_v58 = vld [vmem:[%s5299_s7 + $0x1d0] sm:$0xff] }
 0x230   :  { %1644 = vmatpush2.msra.mxu1 %v1253_v40  ;;  %1721 = vmatpush2.msra.mxu0 %v1477_v60  ;;  %v1157_v60 = vld [vmem:[%s5299_s7 + $0x198] sm:$0xff] }
 0x231   :  { %1645 = vmatprep.subr.mxu1 %v1247_v43  ;;  %1722 = vmatprep.subr.mxu0 %v1471_v0  ;;  %v1143_v0 = vld [vmem:[%s5299_s7 + $0x128] sm:$0xff] }
 0x232   :  { %1646 = vmatpush2.msra.mxu1 %v1246_v45  ;;  %1723 = vmatpush2.msra.mxu0 %v1470_v3  ;;  %v1136_v3 = vld [vmem:[%s5299_s7 + $0xf0] sm:$0xff] }
 0x233   :  { %1647 = vmatprep.subr.mxu1 %v1240_v49  ;;  %1724 = vmatprep.subr.mxu0 %v1464_v27  ;;  %v1186_v49 = vld [vmem:[%s5299_s7 + $0x280] sm:$0xff] }
 0x234   :  { %1648 = vmatpush2.msra.mxu1 %v1239_v53  ;;  %1725 = vmatpush2.msra.mxu0 %v1463_v28  ;;  %v1179_v53 = vld [vmem:[%s5299_s7 + $0x248] sm:$0xff]  ;;  %v1130_v27 = vld [vmem:[%s5299_s7 + $0xc0] sm:$0xff]  ;;  %v1129_v28 = vld [vmem:[%s5299_s7 + $0xb8] sm:$0xff] }
 0x235   :  { %1649 = vmatprep.subr.mxu1 %v1233_v55  ;;  %1726 = vmatprep.subr.mxu0 %v1457_v46  ;;  %v1172_v55 = vld [vmem:[%s5299_s7 + $0x210] sm:$0xff]  ;;  %v1123_v46 = vld [vmem:[%s5299_s7 + $0x88] sm:$0xff] }
 0x236   :  { %1650 = vmatpush2.msra.mxu1 %v1232_v57  ;;  %1727 = vmatpush2.msra.mxu0 %v1456_v47  ;;  %v1165_v57 = vld [vmem:[%s5299_s7 + $0x1d8] sm:$0xff]  ;;  %v1122_v47 = vld [vmem:[%s5299_s7 + $0x80] sm:$0xff] }
 0x237   :  { %1651 = vmatprep.subr.mxu1 %v1226_v59  ;;  %1728 = vmatprep.subr.mxu0 %v1450_v50  ;;  %v1158_v59 = vld [vmem:[%s5299_s7 + $0x1a0] sm:$0xff]  ;;  %v1116_v50 = vld [vmem:[%s5299_s7 + $0x50] sm:$0xff] }
 0x238   :  { %1652 = vmatpush2.msra.mxu1 %v1225_v61  ;;  %1729 = vmatpush2.msra.mxu0 %v1449_v51  ;;  %v1151_v61 = vld [vmem:[%s5299_s7 + $0x168] sm:$0xff] }
 0x239   :  { %1653 = vmatprep.subr.mxu1 %v1219_v62  ;;  %1730 = vmatprep.subr.mxu0 %v1443_v5  ;;  %v1150_v62 = vld [vmem:[%s5299_s7 + $0x160] sm:$0xff]  ;;  %v1115_v51 = vld [vmem:[%s5299_s7 + $0x48] sm:$0xff]  ;;  %v1109_v5 = vld [vmem:[%s5299_s7 + $0x18] sm:$0xff] }
 0x23a   :  { %1654 = vmatpush2.msra.mxu1 %v1218_v63  ;;  %1731 = vmatpush2.msra.mxu0 %v1442_v6  ;;  %v1144_v63 = vld [vmem:[%s5299_s7 + $0x130] sm:$0xff] }
 0x23b   :  { %1745 = vmatprep.subr.mxu1 %v1214_v1  ;;  %1822 = vmatprep.subr.mxu0 %v1438_v7  ;;  %v1137_v1 = vld [vmem:[%s5299_s7 + $0xf8] sm:$0xff]  ;;  %v1108_v6 = vld [vmem:[%s5299_s7 + $0x10] sm:$0xff]  ;;  %v1326_v7 = vld [vmem:[%s5299_s7 + $0x6e0] sm:$0xff] }
 0x275   :  { %v840_v11 = vpop.f32.mrf.mxu1  ;;  %v917_v12 = vpop.f32.mrf.mxu0 }
 0x276   :  { %v841_v13 = vadd.f32 %v840_v11, %v757_v9  ;;  %v1318_v11 = vld [vmem:[%s5299_s7 + $0x6a0] sm:$0xff] }
 0x277   :  { %v842_v14 = vpop.f32.mrf.mxu1  ;;  %v919_v17 = vpop.f32.mrf.mxu0 }
 0x278   :  { %v918_v15 = vadd.f32 %v917_v12, %v841_v13  ;;  %v843_v16 = vadd.f32 %v842_v14, %v761_v10  ;;  %v1312_v12 = vld [vmem:[%s5299_s7 + $0x670] sm:$0xff]  ;;  %v1311_v13 = vld [vmem:[%s5299_s7 + $0x668] sm:$0xff]  ;;  %v1305_v14 = vld [vmem:[%s5299_s7 + $0x638] sm:$0xff] }
 0x27a   :  { %v920_v18 = vadd.f32 %v919_v17, %v843_v16  ;;  %v1090_v19 = vmul.f32 0.2, %v918_v15  ;;  %vm1082_vm12 = vcmp.ge.f32.partialorder %v918_v15, 0.0  ;;  %v1298_v16 = vld [vmem:[%s5299_s7 + $0x600] sm:$0xff]  ;;  %v1297_v17 = vld [vmem:[%s5299_s7 + $0x5f8] sm:$0xff] }
 0x27b   :  { %v846_v20 = vpop.f32.mrf.mxu1  ;;  %v923_v21 = vpop.f32.mrf.mxu0 }
 0x27c   :  { %vm1083_vm13 = vcmp.ge.f32.partialorder %v920_v18, 0.0  ;;  %v1091_v22 = vmul.f32 0.2, %v920_v18  ;;  %v847_v23 = vadd.f32 %v846_v20, %v757_v9  ;;  %v4173_v32 = vsel %vm1082_vm12, %v918_v15, %v1090_v19  ;;  %v1325_v9 = vld [vmem:[%s5299_s7 + $0x6d8] sm:$0xff]  ;;  %v1304_v15 = vld [vmem:[%s5299_s7 + $0x630] sm:$0xff]  ;;  %v1290_v19 = vld [vmem:[%s5299_s7 + $0x5c0] sm:$0xff] }
 0x27d   :  { %v848_v24 = vpop.f32.mrf.mxu1  ;;  %v925_v25 = vpop.f32.mrf.mxu0  ;;  %v1284_v20 = vld [vmem:[%s5299_s7 + $0x590] sm:$0xff] }
 0x27e   :  { %v849_v26 = vadd.f32 %v848_v24, %v761_v10  ;;  %v924_v29 = vadd.f32 %v923_v21, %v847_v23  ;;  %v4168_v30 = vsel %vm1083_vm13, %v920_v18, %v1091_v22  ;;  %v1319_v10 = vld [vmem:[%s5299_s7 + $0x6a8] sm:$0xff]  ;;  %v1277_v22 = vld [vmem:[%s5299_s7 + $0x558] sm:$0xff]  ;;  %v1276_v23 = vld [vmem:[%s5299_s7 + $0x550] sm:$0xff] }
 0x27f   :  { %1655 = vmatprep.mubr.f32.mxu1 %v4168_v30  ;;  %v1291_v18 = vld [vmem:[%s5299_s7 + $0x5c8] sm:$0xff]  ;;  %v1270_v24 = vld [vmem:[%s5299_s7 + $0x520] sm:$0xff] }
 0x280   :  { %vm1086_vm14 = vcmp.ge.f32.partialorder %v924_v29, 0.0  ;;  %v1094_v34 = vmul.f32 0.2, %v924_v29  ;;  %v926_v35 = vadd.f32 %v925_v25, %v849_v26  ;;  %1656 = vmatmul.mubr.f32.vlgmr.msra.gmra.mxu1 %v4173_v32  ;;  %v1283_v21 = vld [vmem:[%s5299_s7 + $0x588] sm:$0xff]  ;;  %v1269_v25 = vld [vmem:[%s5299_s7 + $0x518] sm:$0xff] }
 0x281   :  { %1746 = vmatpush1.msra.mxu1 %v1213_v31  ;;  %v1263_v26 = vld [vmem:[%s5299_s7 + $0x4e8] sm:$0xff]  ;;  %v1256_v31 = vld [vmem:[%s5299_s7 + $0x4b0] sm:$0xff] }
 0x282   :  { %vm1087_vm15 = vcmp.ge.f32.partialorder %v926_v35, 0.0  ;;  %v1095_v40 = vmul.f32 0.2, %v926_v35  ;;  %1747 = vmatprep.subr.mxu1 %v1207_v33  ;;  %v4189_v43 = vsel %vm1086_vm14, %v924_v29, %v1094_v34  ;;  %v1262_v29 = vld [vmem:[%s5299_s7 + $0x4e0] sm:$0xff]  ;;  %v1255_v33 = vld [vmem:[%s5299_s7 + $0x4a8] sm:$0xff]  ;;  %v1249_v34 = vld [vmem:[%s5299_s7 + $0x478] sm:$0xff] }
 0x283   :  { %1748 = vmatpush1.msra.mxu1 %v1206_v36  ;;  %v765_v36 = vrot.slane %v4162_v8, %v3355_v2 }
 0x284   :  { %v4194_v45 = vsel %vm1087_vm15, %v926_v35, %v1095_v40  ;;  %1749 = vmatprep.subr.mxu1 %v1200_v37  ;;  %v1248_v35 = vld [vmem:[%s5299_s7 + $0x470] sm:$0xff]  ;;  %v1242_v37 = vld [vmem:[%s5299_s7 + $0x440] sm:$0xff]  ;;  %v1241_v40 = vld [vmem:[%s5299_s7 + $0x438] sm:$0xff] }
 0x285   :  { %1661 = vmatprep.mubr.f32.mxu1 %v4194_v45  ;;  %1750 = vmatpush1.msra.mxu1 %v1199_v42  ;;  %v769_v42 = vrot.slane %v4162_v8, %v3361_v4 }
 0x286   :  { %1662 = vmatmul.mubr.f32.gmra.mxu1 %v4189_v43  ;;  %1751 = vmatprep.subr.mxu1 %v1193_v44  ;;  %v1235_v44 = vld [vmem:[%s5299_s7 + $0x408] sm:$0xff] }
 0x287   :  { %1809 = vmatprep.mubr.f32.mxu1 %v4168_v30  ;;  %1752 = vmatpush1.msra.mxu1 %v1192_v48 }
 0x288   :  { %1753 = vmatprep.subr.mxu1 %v1186_v49 }
 0x289   :  { %1754 = vmatpush1.msra.mxu1 %v1185_v52  ;;  %v1234_v52 = vld [vmem:[%s5299_s7 + $0x400] sm:$0xff] }
 0x28a   :  { %1755 = vmatprep.subr.mxu1 %v1179_v53 }
 0x28b   :  { %1756 = vmatpush1.msra.mxu1 %v1178_v54  ;;  %v1228_v54 = vld [vmem:[%s5299_s7 + $0x3d0] sm:$0xff] }
 0x28c   :  { %1757 = vmatprep.subr.mxu1 %v1172_v55 }
 0x28d   :  { %1758 = vmatpush1.msra.mxu1 %v1171_v56  ;;  %v1227_v56 = vld [vmem:[%s5299_s7 + $0x3c8] sm:$0xff] }
 0x28e   :  { %1759 = vmatprep.subr.mxu1 %v1165_v57 }
 0x28f   :  { %1760 = vmatpush1.msra.mxu1 %v1164_v58 }
 0x290   :  { %1761 = vmatprep.subr.mxu1 %v1158_v59  ;;  %v1221_v59 = vld [vmem:[%s5299_s7 + $0x398] sm:$0xff] }
 0x291   :  { %1762 = vmatpush1.msra.mxu1 %v1157_v60 }
 0x292   :  { %1763 = vmatprep.subr.mxu1 %v1151_v61  ;;  %v1220_v61 = vld [vmem:[%s5299_s7 + $0x390] sm:$0xff] }
 0x293   :  { %1764 = vmatpush1.msra.mxu1 %v1150_v62 }
 0x294   :  { %1765 = vmatprep.subr.mxu1 %v1144_v63 }
 0x295   :  { %1766 = vmatpush1.msra.mxu1 %v1143_v0 }
 0x296   :  { %1767 = vmatprep.subr.mxu1 %v1137_v1  ;;  %v1216_v1 = vld [vmem:[%s5299_s7 + $0x370] sm:$0xff] }
 0x297   :  { %1768 = vmatpush1.msra.mxu1 %v1136_v3 }
 0x298   :  { %1769 = vmatprep.subr.mxu1 %v1130_v27 }
 0x299   :  { %1770 = vmatpush1.msra.mxu1 %v1129_v28  ;;  %v1215_v28 = vld [vmem:[%s5299_s7 + $0x368] sm:$0xff] }
 0x29a   :  { %1771 = vmatprep.subr.mxu1 %v1123_v46 }
 0x29b   :  { %1772 = vmatpush1.msra.mxu1 %v1122_v47 }
 0x29c   :  { %1773 = vmatprep.subr.mxu1 %v1116_v50  ;;  %v1209_v50 = vld [vmem:[%s5299_s7 + $0x338] sm:$0xff] }
 0x29d   :  { %1774 = vmatpush1.msra.mxu1 %v1115_v51 }
 0x29e   :  { %1775 = vmatprep.subr.mxu1 %v1109_v5  ;;  %v1208_v5 = vld [vmem:[%s5299_s7 + $0x330] sm:$0xff] }
 0x29f   :  { %1776 = vmatpush1.msra.mxu1 %v1108_v6 }
 0x2a0   :  { %1777 = vmatprep.subr.mxu1 %v1326_v7 }
 0x2a1   :  { %1778 = vmatpush2.msra.mxu1 %v1325_v9  ;;  %v1437_v9 = vld [vmem:[%s5299_s7 + $0xa58] sm:$0xff] }
 0x2a2   :  { %1779 = vmatprep.subr.mxu1 %v1319_v10 }
 0x2a3   :  { %1780 = vmatpush2.msra.mxu1 %v1318_v11 }
 0x2a4   :  { %1781 = vmatprep.subr.mxu1 %v1312_v12  ;;  %v1431_v12 = vld [vmem:[%s5299_s7 + $0xa28] sm:$0xff] }
 0x2a5   :  { %1782 = vmatpush2.msra.mxu1 %v1311_v13  ;;  %v1202_v13 = vld [vmem:[%s5299_s7 + $0x300] sm:$0xff] }
 0x2a6   :  { %1783 = vmatprep.subr.mxu1 %v1305_v14 }
 0x2a7   :  { %1784 = vmatpush2.msra.mxu1 %v1304_v15  ;;  %v1430_v15 = vld [vmem:[%s5299_s7 + $0xa20] sm:$0xff] }
 0x2a8   :  { %1785 = vmatprep.subr.mxu1 %v1298_v16  ;;  %v1201_v16 = vld [vmem:[%s5299_s7 + $0x2f8] sm:$0xff] }
 0x2a9   :  { %1786 = vmatpush2.msra.mxu1 %v1297_v17 }
 0x2aa   :  { %1787 = vmatprep.subr.mxu1 %v1291_v18  ;;  %v1424_v18 = vld [vmem:[%s5299_s7 + $0x9f0] sm:$0xff] }
 0x2ab   :  { %1788 = vmatpush2.msra.mxu1 %v1290_v19 }
 0x2ac   :  { %1789 = vmatprep.subr.mxu1 %v1284_v20  ;;  %v1423_v20 = vld [vmem:[%s5299_s7 + $0x9e8] sm:$0xff] }
 0x2ad   :  { %1790 = vmatpush2.msra.mxu1 %v1283_v21 }
 0x2ae   :  { %1791 = vmatprep.subr.mxu1 %v1277_v22  ;;  %v1417_v22 = vld [vmem:[%s5299_s7 + $0x9b8] sm:$0xff] }
 0x2af   :  { %1792 = vmatpush2.msra.mxu1 %v1276_v23  ;;  %v1195_v23 = vld [vmem:[%s5299_s7 + $0x2c8] sm:$0xff] }
 0x2b0   :  { %1793 = vmatprep.subr.mxu1 %v1270_v24  ;;  %v1416_v24 = vld [vmem:[%s5299_s7 + $0x9b0] sm:$0xff] }
 0x2b1   :  { %1794 = vmatpush2.msra.mxu1 %v1269_v25  ;;  %v1194_v25 = vld [vmem:[%s5299_s7 + $0x2c0] sm:$0xff] }
 0x2b2   :  { %1795 = vmatprep.subr.mxu1 %v1263_v26  ;;  %v1410_v26 = vld [vmem:[%s5299_s7 + $0x980] sm:$0xff] }
 0x2b3   :  { %1796 = vmatpush2.msra.mxu1 %v1262_v29  ;;  %v1188_v29 = vld [vmem:[%s5299_s7 + $0x290] sm:$0xff] }
 0x2b4   :  { %1797 = vmatprep.subr.mxu1 %v1256_v31  ;;  %v1409_v31 = vld [vmem:[%s5299_s7 + $0x978] sm:$0xff] }
 0x2b5   :  { %1798 = vmatpush2.msra.mxu1 %v1255_v33  ;;  %v1187_v33 = vld [vmem:[%s5299_s7 + $0x288] sm:$0xff] }
 0x2b6   :  { %1799 = vmatprep.subr.mxu1 %v1249_v34  ;;  %v1403_v34 = vld [vmem:[%s5299_s7 + $0x948] sm:$0xff] }
 0x2b7   :  { %1800 = vmatpush2.msra.mxu1 %v1248_v35  ;;  %v1181_v35 = vld [vmem:[%s5299_s7 + $0x258] sm:$0xff] }
 0x2b8   :  { %v994_v48 = vpop.f32.mrf.mxu1  ;;  %v1071_v49 = vpop.f32.mrf.mxu0  ;;  %1801 = vmatprep.subr.mxu1 %v1242_v37  ;;  %v1180_v37 = vld [vmem:[%s5299_s7 + $0x250] sm:$0xff] }
 0x2b9   :  { %v995_v53 = vadd.f32 %v994_v48, %v765_v36  ;;  %1802 = vmatpush2.msra.mxu1 %v1241_v40  ;;  %v1396_v40 = vld [vmem:[%s5299_s7 + $0x910] sm:$0xff]  ;;  %v1173_v48 = vld [vmem:[%s5299_s7 + $0x218] sm:$0xff] }
 0x2ba   :  { %v996_v55 = vpop.f32.mrf.mxu1  ;;  %v1073_v8 = vpop.f32.mrf.mxu0  ;;  %1803 = vmatprep.subr.mxu1 %v1235_v44  ;;  %v1395_v44 = vld [vmem:[%s5299_s7 + $0x908] sm:$0xff] }
 0x2bb   :  { %v1072_v57 = vadd.f32 %v1071_v49, %v995_v53  ;;  %v997_v58 = vadd.f32 %v996_v55, %v769_v42  ;;  %1804 = vmatpush2.msra.mxu1 %v1234_v52  ;;  %v1389_v49 = vld [vmem:[%s5299_s7 + $0x8d8] sm:$0xff]  ;;  %v1167_v52 = vld [vmem:[%s5299_s7 + $0x1e8] sm:$0xff]  ;;  %v1388_v53 = vld [vmem:[%s5299_s7 + $0x8d0] sm:$0xff] }
 0x2bc   :  { %v1000_v60 = vpop.f32.mrf.mxu1  ;;  %1805 = vmatprep.subr.mxu1 %v1228_v54  ;;  %v1077_v0 = vpop.f32.mrf.mxu0  ;;  %v1166_v54 = vld [vmem:[%s5299_s7 + $0x1e0] sm:$0xff] }
 0x2bd   :  { %v1074_v62 = vadd.f32 %v1073_v8, %v997_v58  ;;  %v1001_v63 = vadd.f32 %v1000_v60, %v765_v36  ;;  %1806 = vmatpush2.msra.mxu1 %v1227_v56  ;;  %v1092_v3 = vmul.f32 0.2, %v1072_v57  ;;  %vm1084_vm0 = vcmp.ge.f32.partialorder %v1072_v57, 0.0  ;;  %v1402_v36 = vld [vmem:[%s5299_s7 + $0x940] sm:$0xff]  ;;  %v1160_v8 = vld [vmem:[%s5299_s7 + $0x1b0] sm:$0xff]  ;;  %v1381_v56 = vld [vmem:[%s5299_s7 + $0x898] sm:$0xff] }
 0x2be   :  { %v1002_v27 = vpop.f32.mrf.mxu1  ;;  %1807 = vmatprep.subr.mxu1 %v1221_v59  ;;  %v1079_v6 = vpop.f32.mrf.mxu0  ;;  %v1382_v55 = vld [vmem:[%s5299_s7 + $0x8a0] sm:$0xff]  ;;  %v1375_v58 = vld [vmem:[%s5299_s7 + $0x868] sm:$0xff]  ;;  %v1153_v59 = vld [vmem:[%s5299_s7 + $0x178] sm:$0xff] }
 0x2bf   :  { %vm1085_vm1 = vcmp.ge.f32.partialorder %v1074_v62, 0.0  ;;  %v1093_v46 = vmul.f32 0.2, %v1074_v62  ;;  %v1078_v47 = vadd.f32 %v1077_v0, %v1001_v63  ;;  %1808 = vmatpush2.msra.mxu1 %v1220_v61  ;;  %v1003_v51 = vadd.f32 %v1002_v27, %v769_v42  ;;  %v1174_v42 = vld [vmem:[%s5299_s7 + $0x220] sm:$0xff]  ;;  %v1152_v61 = vld [vmem:[%s5299_s7 + $0x170] sm:$0xff]  ;;  %v1367_v0 = vld [vmem:[%s5299_s7 + $0x828] sm:$0xff] }
 0x2c0   :  { %1810 = vmatmul.mubr.f32.vlgmr.msra.gmra.mxu1 %v4173_v32  ;;  %1899 = vmatprep.subr.mxu1 %v1216_v1  ;;  %v4393_v10 = vsel %vm1084_vm0, %v1072_v57, %v1092_v3  ;;  %v1159_v57 = vld [vmem:[%s5299_s7 + $0x1a8] sm:$0xff]  ;;  %v1374_v60 = vld [vmem:[%s5299_s7 + $0x860] sm:$0xff]  ;;  %v1145_v1 = vld [vmem:[%s5299_s7 + $0x138] sm:$0xff] }
 0x2c1   :  { %v4387_v7 = vsel %vm1085_vm1, %v1074_v62, %v1093_v46  ;;  %1815 = vmatprep.mubr.f32.mxu1 %v4194_v45  ;;  %1900 = vmatpush1.msra.mxu1 %v1215_v28  ;;  %v1080_v11 = vadd.f32 %v1079_v6, %v1003_v51  ;;  %v1096_v14 = vmul.f32 0.2, %v1078_v47  ;;  %vm1088_vm2 = vcmp.ge.f32.partialorder %v1078_v47, 0.0  ;;  %v1368_v62 = vld [vmem:[%s5299_s7 + $0x830] sm:$0xff]  ;;  %v1146_v63 = vld [vmem:[%s5299_s7 + $0x140] sm:$0xff]  ;;  %v1361_v3 = vld [vmem:[%s5299_s7 + $0x7f8] sm:$0xff] }
 0x2c2   :  { %1732 = vmatprep.mubr.f32.mxu0 %v4387_v7  ;;  %1901 = vmatprep.subr.mxu1 %v1209_v50  ;;  %v1139_v27 = vld [vmem:[%s5299_s7 + $0x108] sm:$0xff]  ;;  %v1360_v28 = vld [vmem:[%s5299_s7 + $0x7f0] sm:$0xff]  ;;  %v1138_v46 = vld [vmem:[%s5299_s7 + $0x100] sm:$0xff] }
 0x2c3   :  { %1733 = vmatmul.mubr.f32.vlgmr.msra.gmra.mxu0 %v4393_v10  ;;  %1902 = vmatpush1.msra.mxu1 %v1208_v5  ;;  %vm1089_vm3 = vcmp.ge.f32.partialorder %v1080_v11, 0.0  ;;  %v1097_v17 = vmul.f32 0.2, %v1080_v11  ;;  %v4419_v21 = vsel %vm1088_vm2, %v1078_v47, %v1096_v14  ;;  %v1354_v47 = vld [vmem:[%s5299_s7 + $0x7c0] sm:$0xff]  ;;  %v1132_v50 = vld [vmem:[%s5299_s7 + $0xd0] sm:$0xff]  ;;  %v1353_v51 = vld [vmem:[%s5299_s7 + $0x7b8] sm:$0xff] }
 0x2c4   :  { %1823 = vmatpush1.msra.mxu0 %v1437_v9  ;;  %1816 = vmatmul.mubr.f32.gmra.mxu1 %v4189_v43  ;;  %v1131_v5 = vld [vmem:[%s5299_s7 + $0xc8] sm:$0xff]  ;;  %v1125_v9 = vld [vmem:[%s5299_s7 + $0x98] sm:$0xff]  ;;  %v1118_v14 = vld [vmem:[%s5299_s7 + $0x60] sm:$0xff] }
 0x2c5   :  { %1824 = vmatprep.subr.mxu0 %v1431_v12  ;;  %1903 = vmatprep.subr.mxu1 %v1202_v13  ;;  %v4413_v19 = vsel %vm1089_vm3, %v1080_v11, %v1097_v17  ;;  %v1347_v6 = vld [vmem:[%s5299_s7 + $0x788] sm:$0xff]  ;;  %v1346_v11 = vld [vmem:[%s5299_s7 + $0x780] sm:$0xff]  ;;  %v1124_v12 = vld [vmem:[%s5299_s7 + $0x90] sm:$0xff] }
 0x2c6   :  { %1825 = vmatpush1.msra.mxu0 %v1430_v15  ;;  %1904 = vmatpush1.msra.mxu1 %v1201_v16  ;;  %v1340_v13 = vld [vmem:[%s5299_s7 + $0x750] sm:$0xff]  ;;  %v1339_v15 = vld [vmem:[%s5299_s7 + $0x748] sm:$0xff]  ;;  %v1117_v16 = vld [vmem:[%s5299_s7 + $0x58] sm:$0xff] }
 0x2c7   :  { %1738 = vmatprep.mubr.f32.mxu0 %v4413_v19  ;;  %1826 = vmatprep.subr.mxu0 %v1424_v18  ;;  %v1333_v17 = vld [vmem:[%s5299_s7 + $0x718] sm:$0xff]  ;;  %v1111_v18 = vld [vmem:[%s5299_s7 + $0x28] sm:$0xff] }
 0x2c8   :  { %1739 = vmatmul.mubr.f32.gmra.mxu0 %v4419_v21  ;;  %1963 = vmatprep.mubr.f32.mxu1 %v4168_v30 }
 0x2c9   :  { %1827 = vmatpush1.msra.mxu0 %v1423_v20  ;;  %1886 = vmatprep.mubr.f32.mxu0 %v4387_v7  ;;  %v1332_v20 = vld [vmem:[%s5299_s7 + $0x710] sm:$0xff] }
 0x2ca   :  { %1828 = vmatprep.subr.mxu0 %v1417_v22  ;;  %1905 = vmatprep.subr.mxu1 %v1195_v23  ;;  %v1110_v22 = vld [vmem:[%s5299_s7 + $0x20] sm:$0xff] }
 0x2cb   :  { %1829 = vmatpush1.msra.mxu0 %v1416_v24  ;;  %1906 = vmatpush1.msra.mxu1 %v1194_v25  ;;  %v1550_v23 = vld [vmem:[%s5299_s7 + $0xde0] sm:$0xff]  ;;  %v1328_v24 = vld [vmem:[%s5299_s7 + $0x6f0] sm:$0xff]  ;;  %v1549_v25 = vld [vmem:[%s5299_s7 + $0xdd8] sm:$0xff] }
 0x2cc   :  { %1830 = vmatprep.subr.mxu0 %v1410_v26  ;;  %1907 = vmatprep.subr.mxu1 %v1188_v29  ;;  %v1327_v26 = vld [vmem:[%s5299_s7 + $0x6e8] sm:$0xff] }
 0x2cd   :  { %1831 = vmatpush1.msra.mxu0 %v1409_v31  ;;  %1908 = vmatpush1.msra.mxu1 %v1187_v33  ;;  %v1543_v29 = vld [vmem:[%s5299_s7 + $0xda8] sm:$0xff]  ;;  %v1321_v31 = vld [vmem:[%s5299_s7 + $0x6b8] sm:$0xff]  ;;  %v1542_v33 = vld [vmem:[%s5299_s7 + $0xda0] sm:$0xff] }
 0x2ce   :  { %1832 = vmatprep.subr.mxu0 %v1403_v34  ;;  %1909 = vmatprep.subr.mxu1 %v1181_v35  ;;  %v1320_v34 = vld [vmem:[%s5299_s7 + $0x6b0] sm:$0xff] }
 0x2cf   :  { %1833 = vmatpush1.msra.mxu0 %v1402_v36  ;;  %1910 = vmatpush1.msra.mxu1 %v1180_v37  ;;  %v1536_v35 = vld [vmem:[%s5299_s7 + $0xd70] sm:$0xff]  ;;  %v1314_v36 = vld [vmem:[%s5299_s7 + $0x680] sm:$0xff]  ;;  %v1535_v37 = vld [vmem:[%s5299_s7 + $0xd68] sm:$0xff] }
 0x2d0   :  { %1834 = vmatprep.subr.mxu0 %v1396_v40  ;;  %1911 = vmatprep.subr.mxu1 %v1174_v42  ;;  %v1313_v40 = vld [vmem:[%s5299_s7 + $0x678] sm:$0xff] }
 0x2d1   :  { %1835 = vmatpush1.msra.mxu0 %v1395_v44  ;;  %1912 = vmatpush1.msra.mxu1 %v1173_v48  ;;  %v1529_v42 = vld [vmem:[%s5299_s7 + $0xd38] sm:$0xff]  ;;  %v1307_v44 = vld [vmem:[%s5299_s7 + $0x648] sm:$0xff]  ;;  %v1528_v48 = vld [vmem:[%s5299_s7 + $0xd30] sm:$0xff] }
 0x2d2   :  { %1836 = vmatprep.subr.mxu0 %v1389_v49  ;;  %1913 = vmatprep.subr.mxu1 %v1167_v52  ;;  %v1306_v49 = vld [vmem:[%s5299_s7 + $0x640] sm:$0xff] }
 0x2d3   :  { %1837 = vmatpush1.msra.mxu0 %v1388_v53  ;;  %1914 = vmatpush1.msra.mxu1 %v1166_v54  ;;  %v1522_v52 = vld [vmem:[%s5299_s7 + $0xd00] sm:$0xff]  ;;  %v1300_v53 = vld [vmem:[%s5299_s7 + $0x610] sm:$0xff]  ;;  %v1521_v54 = vld [vmem:[%s5299_s7 + $0xcf8] sm:$0xff] }
 0x2d4   :  { %1838 = vmatprep.subr.mxu0 %v1382_v55  ;;  %1915 = vmatprep.subr.mxu1 %v1160_v8  ;;  %v1299_v55 = vld [vmem:[%s5299_s7 + $0x608] sm:$0xff] }
 0x2d5   :  { %1839 = vmatpush1.msra.mxu0 %v1381_v56  ;;  %1916 = vmatpush1.msra.mxu1 %v1159_v57  ;;  %v1515_v8 = vld [vmem:[%s5299_s7 + $0xcc8] sm:$0xff]  ;;  %v1293_v56 = vld [vmem:[%s5299_s7 + $0x5d8] sm:$0xff]  ;;  %v1514_v57 = vld [vmem:[%s5299_s7 + $0xcc0] sm:$0xff] }
 0x2d6   :  { %1840 = vmatprep.subr.mxu0 %v1375_v58  ;;  %1917 = vmatprep.subr.mxu1 %v1153_v59  ;;  %v1292_v58 = vld [vmem:[%s5299_s7 + $0x5d0] sm:$0xff] }
 0x2d7   :  { %1841 = vmatpush1.msra.mxu0 %v1374_v60  ;;  %1918 = vmatpush1.msra.mxu1 %v1152_v61  ;;  %v1508_v59 = vld [vmem:[%s5299_s7 + $0xc90] sm:$0xff]  ;;  %v1286_v60 = vld [vmem:[%s5299_s7 + $0x5a0] sm:$0xff]  ;;  %v1507_v61 = vld [vmem:[%s5299_s7 + $0xc88] sm:$0xff] }
 0x2d8   :  { %1842 = vmatprep.subr.mxu0 %v1368_v62  ;;  %1919 = vmatprep.subr.mxu1 %v1146_v63  ;;  %v1285_v62 = vld [vmem:[%s5299_s7 + $0x598] sm:$0xff] }
 0x2d9   :  { %1843 = vmatpush1.msra.mxu0 %v1367_v0  ;;  %1920 = vmatpush1.msra.mxu1 %v1145_v1  ;;  %v1501_v63 = vld [vmem:[%s5299_s7 + $0xc58] sm:$0xff]  ;;  %v1279_v0 = vld [vmem:[%s5299_s7 + $0x568] sm:$0xff]  ;;  %v1500_v1 = vld [vmem:[%s5299_s7 + $0xc50] sm:$0xff] }
 0x2da   :  { %1844 = vmatprep.subr.mxu0 %v1361_v3  ;;  %1921 = vmatprep.subr.mxu1 %v1139_v27  ;;  %v1278_v3 = vld [vmem:[%s5299_s7 + $0x560] sm:$0xff] }
 0x2db   :  { %1845 = vmatpush1.msra.mxu0 %v1360_v28  ;;  %1922 = vmatpush1.msra.mxu1 %v1138_v46  ;;  %v1494_v27 = vld [vmem:[%s5299_s7 + $0xc20] sm:$0xff]  ;;  %v1272_v28 = vld [vmem:[%s5299_s7 + $0x530] sm:$0xff]  ;;  %v1493_v46 = vld [vmem:[%s5299_s7 + $0xc18] sm:$0xff] }
 0x2dc   :  { %1846 = vmatprep.subr.mxu0 %v1354_v47  ;;  %1923 = vmatprep.subr.mxu1 %v1132_v50  ;;  %v1271_v47 = vld [vmem:[%s5299_s7 + $0x528] sm:$0xff] }
 0x2dd   :  { %1847 = vmatpush1.msra.mxu0 %v1353_v51  ;;  %1924 = vmatpush1.msra.mxu1 %v1131_v5  ;;  %v1487_v50 = vld [vmem:[%s5299_s7 + $0xbe8] sm:$0xff]  ;;  %v1265_v51 = vld [vmem:[%s5299_s7 + $0x4f8] sm:$0xff]  ;;  %v1486_v5 = vld [vmem:[%s5299_s7 + $0xbe0] sm:$0xff] }
 0x2de   :  { %1848 = vmatprep.subr.mxu0 %v1347_v6  ;;  %1925 = vmatprep.subr.mxu1 %v1125_v9  ;;  %v1264_v6 = vld [vmem:[%s5299_s7 + $0x4f0] sm:$0xff] }
 0x2df   :  { %1849 = vmatpush1.msra.mxu0 %v1346_v11  ;;  %1926 = vmatpush1.msra.mxu1 %v1124_v12  ;;  %v1480_v9 = vld [vmem:[%s5299_s7 + $0xbb0] sm:$0xff]  ;;  %v1258_v11 = vld [vmem:[%s5299_s7 + $0x4c0] sm:$0xff]  ;;  %v1479_v12 = vld [vmem:[%s5299_s7 + $0xba8] sm:$0xff] }
 0x2e0   :  { %1850 = vmatprep.subr.mxu0 %v1340_v13  ;;  %1927 = vmatprep.subr.mxu1 %v1118_v14  ;;  %v1257_v13 = vld [vmem:[%s5299_s7 + $0x4b8] sm:$0xff] }
 0x2e1   :  { %1851 = vmatpush1.msra.mxu0 %v1339_v15  ;;  %1928 = vmatpush1.msra.mxu1 %v1117_v16  ;;  %v1473_v14 = vld [vmem:[%s5299_s7 + $0xb78] sm:$0xff]  ;;  %v1251_v15 = vld [vmem:[%s5299_s7 + $0x488] sm:$0xff]  ;;  %v1472_v16 = vld [vmem:[%s5299_s7 + $0xb70] sm:$0xff] }
 0x2e2   :  { %1852 = vmatprep.subr.mxu0 %v1333_v17  ;;  %1929 = vmatprep.subr.mxu1 %v1111_v18  ;;  %v1250_v17 = vld [vmem:[%s5299_s7 + $0x480] sm:$0xff] }
 0x2e3   :  { %1853 = vmatpush1.msra.mxu0 %v1332_v20  ;;  %1930 = vmatpush1.msra.mxu1 %v1110_v22  ;;  %v1466_v18 = vld [vmem:[%s5299_s7 + $0xb40] sm:$0xff]  ;;  %v1244_v20 = vld [vmem:[%s5299_s7 + $0x450] sm:$0xff]  ;;  %v1465_v22 = vld [vmem:[%s5299_s7 + $0xb38] sm:$0xff] }
 0x2e4   :  { %1854 = vmatprep.subr.mxu0 %v1550_v23  ;;  %1931 = vmatprep.subr.mxu1 %v1328_v24  ;;  %v1243_v23 = vld [vmem:[%s5299_s7 + $0x448] sm:$0xff] }
 0x2e5   :  { %1855 = vmatpush2.msra.mxu0 %v1549_v25  ;;  %1932 = vmatpush2.msra.mxu1 %v1327_v26  ;;  %v1459_v24 = vld [vmem:[%s5299_s7 + $0xb08] sm:$0xff]  ;;  %v1237_v25 = vld [vmem:[%s5299_s7 + $0x418] sm:$0xff]  ;;  %v1458_v26 = vld [vmem:[%s5299_s7 + $0xb00] sm:$0xff] }
 0x2e6   :  { %1856 = vmatprep.subr.mxu0 %v1543_v29  ;;  %1933 = vmatprep.subr.mxu1 %v1321_v31  ;;  %v1236_v29 = vld [vmem:[%s5299_s7 + $0x410] sm:$0xff] }
 0x2e7   :  { %1857 = vmatpush2.msra.mxu0 %v1542_v33  ;;  %1934 = vmatpush2.msra.mxu1 %v1320_v34  ;;  %v1452_v31 = vld [vmem:[%s5299_s7 + $0xad0] sm:$0xff]  ;;  %v1230_v33 = vld [vmem:[%s5299_s7 + $0x3e0] sm:$0xff]  ;;  %v1451_v34 = vld [vmem:[%s5299_s7 + $0xac8] sm:$0xff] }
 0x2e8   :  { %1858 = vmatprep.subr.mxu0 %v1536_v35  ;;  %1935 = vmatprep.subr.mxu1 %v1314_v36  ;;  %v1229_v35 = vld [vmem:[%s5299_s7 + $0x3d8] sm:$0xff] }
 0x2e9   :  { %1859 = vmatpush2.msra.mxu0 %v1535_v37  ;;  %1936 = vmatpush2.msra.mxu1 %v1313_v40  ;;  %v1445_v36 = vld [vmem:[%s5299_s7 + $0xa98] sm:$0xff]  ;;  %v1223_v37 = vld [vmem:[%s5299_s7 + $0x3a8] sm:$0xff]  ;;  %v1444_v40 = vld [vmem:[%s5299_s7 + $0xa90] sm:$0xff] }
 0x2ea   :  { %1860 = vmatprep.subr.mxu0 %v1529_v42  ;;  %1937 = vmatprep.subr.mxu1 %v1307_v44  ;;  %v1222_v42 = vld [vmem:[%s5299_s7 + $0x3a0] sm:$0xff]  ;;  %v1440_v44 = vld [vmem:[%s5299_s7 + $0xa70] sm:$0xff] }
 0x2eb   :  { %1861 = vmatpush2.msra.mxu0 %v1528_v48  ;;  %1938 = vmatpush2.msra.mxu1 %v1306_v49  ;;  %v1439_v48 = vld [vmem:[%s5299_s7 + $0xa68] sm:$0xff]  ;;  %v1329_v49 = vld [vmem:[%s5299_s7 + $0x6f8] sm:$0xff] }
 0x2ec   :  { %1862 = vmatprep.subr.mxu0 %v1522_v52  ;;  %1939 = vmatprep.subr.mxu1 %v1300_v53  ;;  %v1433_v52 = vld [vmem:[%s5299_s7 + $0xa38] sm:$0xff] }
 0x2ed   :  { %1863 = vmatpush2.msra.mxu0 %v1521_v54  ;;  %1940 = vmatpush2.msra.mxu1 %v1299_v55  ;;  %v1217_v53 = vld [vmem:[%s5299_s7 + $0x378] sm:$0xff]  ;;  %v1432_v54 = vld [vmem:[%s5299_s7 + $0xa30] sm:$0xff]  ;;  %v1322_v55 = vld [vmem:[%s5299_s7 + $0x6c0] sm:$0xff] }
 0x2ee   :  { %1864 = vmatprep.subr.mxu0 %v1515_v8  ;;  %1941 = vmatprep.subr.mxu1 %v1293_v56  ;;  %v1426_v8 = vld [vmem:[%s5299_s7 + $0xa00] sm:$0xff] }
 0x2ef   :  { %1865 = vmatpush2.msra.mxu0 %v1514_v57  ;;  %1942 = vmatpush2.msra.mxu1 %v1292_v58  ;;  %v1210_v56 = vld [vmem:[%s5299_s7 + $0x340] sm:$0xff]  ;;  %v1425_v57 = vld [vmem:[%s5299_s7 + $0x9f8] sm:$0xff]  ;;  %v1315_v58 = vld [vmem:[%s5299_s7 + $0x688] sm:$0xff] }
 0x2f0   :  { %1866 = vmatprep.subr.mxu0 %v1508_v59  ;;  %1943 = vmatprep.subr.mxu1 %v1286_v60  ;;  %v1419_v59 = vld [vmem:[%s5299_s7 + $0x9c8] sm:$0xff] }
 0x2f1   :  { %1867 = vmatpush2.msra.mxu0 %v1507_v61  ;;  %1944 = vmatpush2.msra.mxu1 %v1285_v62  ;;  %v1203_v60 = vld [vmem:[%s5299_s7 + $0x308] sm:$0xff]  ;;  %v1418_v61 = vld [vmem:[%s5299_s7 + $0x9c0] sm:$0xff]  ;;  %v1308_v62 = vld [vmem:[%s5299_s7 + $0x650] sm:$0xff] }
 0x2f2   :  { %1868 = vmatprep.subr.mxu0 %v1501_v63  ;;  %1945 = vmatprep.subr.mxu1 %v1279_v0  ;;  %v1412_v63 = vld [vmem:[%s5299_s7 + $0x990] sm:$0xff] }
 0x2f3   :  { %1869 = vmatpush2.msra.mxu0 %v1500_v1  ;;  %1946 = vmatpush2.msra.mxu1 %v1278_v3  ;;  %v1196_v0 = vld [vmem:[%s5299_s7 + $0x2d0] sm:$0xff]  ;;  %v1411_v1 = vld [vmem:[%s5299_s7 + $0x988] sm:$0xff]  ;;  %v1301_v3 = vld [vmem:[%s5299_s7 + $0x618] sm:$0xff] }
 0x2f4   :  { %1870 = vmatprep.subr.mxu0 %v1494_v27  ;;  %1947 = vmatprep.subr.mxu1 %v1272_v28  ;;  %v1405_v27 = vld [vmem:[%s5299_s7 + $0x958] sm:$0xff] }
 0x2f5   :  { %1871 = vmatpush2.msra.mxu0 %v1493_v46  ;;  %1948 = vmatpush2.msra.mxu1 %v1271_v47  ;;  %v1189_v28 = vld [vmem:[%s5299_s7 + $0x298] sm:$0xff]  ;;  %v1404_v46 = vld [vmem:[%s5299_s7 + $0x950] sm:$0xff]  ;;  %v1398_v47 = vld [vmem:[%s5299_s7 + $0x920] sm:$0xff] }
 0x2f6   :  { %1872 = vmatprep.subr.mxu0 %v1487_v50  ;;  %1949 = vmatprep.subr.mxu1 %v1265_v51  ;;  %v1182_v50 = vld [vmem:[%s5299_s7 + $0x260] sm:$0xff]  ;;  %v1397_v51 = vld [vmem:[%s5299_s7 + $0x918] sm:$0xff] }
 0x2f7   :  { %1873 = vmatpush2.msra.mxu0 %v1486_v5  ;;  %1950 = vmatpush2.msra.mxu1 %v1264_v6  ;;  %v1287_v5 = vld [vmem:[%s5299_s7 + $0x5a8] sm:$0xff] }
 0x2f8   :  { %1874 = vmatprep.subr.mxu0 %v1480_v9  ;;  %1951 = vmatprep.subr.mxu1 %v1258_v11  ;;  %v1391_v6 = vld [vmem:[%s5299_s7 + $0x8e8] sm:$0xff]  ;;  %v1390_v11 = vld [vmem:[%s5299_s7 + $0x8e0] sm:$0xff] }
 0x2f9   :  { %1875 = vmatpush2.msra.mxu0 %v1479_v12  ;;  %1952 = vmatpush2.msra.mxu1 %v1257_v13  ;;  %v1175_v9 = vld [vmem:[%s5299_s7 + $0x228] sm:$0xff]  ;;  %v1280_v12 = vld [vmem:[%s5299_s7 + $0x570] sm:$0xff] }
 0x2fa   :  { %1876 = vmatprep.subr.mxu0 %v1473_v14  ;;  %1953 = vmatprep.subr.mxu1 %v1251_v15  ;;  %v1384_v13 = vld [vmem:[%s5299_s7 + $0x8b0] sm:$0xff]  ;;  %v1383_v15 = vld [vmem:[%s5299_s7 + $0x8a8] sm:$0xff] }
 0x2fb   :  { %1877 = vmatpush2.msra.mxu0 %v1472_v16  ;;  %1954 = vmatpush2.msra.mxu1 %v1250_v17  ;;  %v1168_v14 = vld [vmem:[%s5299_s7 + $0x1f0] sm:$0xff]  ;;  %v1273_v16 = vld [vmem:[%s5299_s7 + $0x538] sm:$0xff] }
 0x2fc   :  { %1878 = vmatprep.subr.mxu0 %v1466_v18  ;;  %1955 = vmatprep.subr.mxu1 %v1244_v20  ;;  %v1377_v17 = vld [vmem:[%s5299_s7 + $0x878] sm:$0xff]  ;;  %v1376_v20 = vld [vmem:[%s5299_s7 + $0x870] sm:$0xff] }
 0x2fd   :  { %1879 = vmatpush2.msra.mxu0 %v1465_v22  ;;  %1956 = vmatpush2.msra.mxu1 %v1243_v23  ;;  %v1161_v18 = vld [vmem:[%s5299_s7 + $0x1b8] sm:$0xff]  ;;  %v1266_v22 = vld [vmem:[%s5299_s7 + $0x500] sm:$0xff] }
 0x2fe   :  { %1880 = vmatprep.subr.mxu0 %v1459_v24  ;;  %1957 = vmatprep.subr.mxu1 %v1237_v25  ;;  %v1370_v23 = vld [vmem:[%s5299_s7 + $0x840] sm:$0xff]  ;;  %v1369_v25 = vld [vmem:[%s5299_s7 + $0x838] sm:$0xff] }
 0x2ff   :  { %1881 = vmatpush2.msra.mxu0 %v1458_v26  ;;  %1958 = vmatpush2.msra.mxu1 %v1236_v29  ;;  %v1154_v24 = vld [vmem:[%s5299_s7 + $0x180] sm:$0xff]  ;;  %v1259_v26 = vld [vmem:[%s5299_s7 + $0x4c8] sm:$0xff] }
 0x300   :  { %1882 = vmatprep.subr.mxu0 %v1452_v31  ;;  %1959 = vmatprep.subr.mxu1 %v1230_v33  ;;  %v1363_v29 = vld [vmem:[%s5299_s7 + $0x808] sm:$0xff]  ;;  %v1362_v33 = vld [vmem:[%s5299_s7 + $0x800] sm:$0xff] }
 0x301   :  { %1883 = vmatpush2.msra.mxu0 %v1451_v34  ;;  %1960 = vmatpush2.msra.mxu1 %v1229_v35  ;;  %v1147_v31 = vld [vmem:[%s5299_s7 + $0x148] sm:$0xff]  ;;  %v1252_v34 = vld [vmem:[%s5299_s7 + $0x490] sm:$0xff] }
 0x302   :  { %1884 = vmatprep.subr.mxu0 %v1445_v36  ;;  %1961 = vmatprep.subr.mxu1 %v1223_v37  ;;  %v1356_v35 = vld [vmem:[%s5299_s7 + $0x7d0] sm:$0xff]  ;;  %v1355_v37 = vld [vmem:[%s5299_s7 + $0x7c8] sm:$0xff] }
 0x303   :  { %1885 = vmatpush2.msra.mxu0 %v1444_v40  ;;  %1962 = vmatpush2.msra.mxu1 %v1222_v42  ;;  %v1140_v36 = vld [vmem:[%s5299_s7 + $0x110] sm:$0xff]  ;;  %v1245_v40 = vld [vmem:[%s5299_s7 + $0x458] sm:$0xff] }
 0x304   :  { %1887 = vmatmul.mubr.f32.vlgmr.msra.gmra.mxu0 %v4393_v10  ;;  %1976 = vmatprep.subr.mxu0 %v1440_v44  ;;  %v1349_v42 = vld [vmem:[%s5299_s7 + $0x798] sm:$0xff] }
 0x305   :  { %1892 = vmatprep.mubr.f32.mxu0 %v4413_v19  ;;  %1964 = vmatmul.mubr.f32.vlgmr.msra.gmra.mxu1 %v4173_v32  ;;  %v1133_v44 = vld [vmem:[%s5299_s7 + $0xd8] sm:$0xff] }
 0x306   :  { %1977 = vmatpush1.msra.mxu0 %v1439_v48  ;;  %2247 = vmatprep.subr.mxu1 %v1329_v49  ;;  %v1348_v48 = vld [vmem:[%s5299_s7 + $0x790] sm:$0xff]  ;;  %v1238_v49 = vld [vmem:[%s5299_s7 + $0x420] sm:$0xff] }
 0x307   :  { %1969 = vmatprep.mubr.f32.mxu1 %v4194_v45  ;;  %1978 = vmatprep.subr.mxu0 %v1433_v52  ;;  %v1342_v52 = vld [vmem:[%s5299_s7 + $0x760] sm:$0xff] }
 0x308   :  { %2248 = vmatpush3.msra.mxu1 %v1217_v53  ;;  %1979 = vmatpush1.msra.mxu0 %v1432_v54  ;;  %v1126_v53 = vld [vmem:[%s5299_s7 + $0xa0] sm:$0xff]  ;;  %v1341_v54 = vld [vmem:[%s5299_s7 + $0x758] sm:$0xff] }
 0x309   :  { %2249 = vmatprep.subr.mxu1 %v1322_v55  ;;  %1893 = vmatmul.mubr.f32.gmra.mxu0 %v4419_v21  ;;  %v1231_v55 = vld [vmem:[%s5299_s7 + $0x3e8] sm:$0xff] }
 0x30a   :  { %1980 = vmatprep.subr.mxu0 %v1426_v8  ;;  %2250 = vmatpush3.msra.mxu1 %v1210_v56  ;;  %v1335_v8 = vld [vmem:[%s5299_s7 + $0x728] sm:$0xff] }
 0x30b   :  { %1970 = vmatmul.mubr.f32.gmra.mxu1 %v4189_v43  ;;  %1981 = vmatpush1.msra.mxu0 %v1425_v57  ;;  %v1119_v56 = vld [vmem:[%s5299_s7 + $0x68] sm:$0xff]  ;;  %v1334_v57 = vld [vmem:[%s5299_s7 + $0x720] sm:$0xff] }
 0x30c   :  { %2040 = vmatprep.mubr.f32.mxu0 %v4387_v7  ;;  %2251 = vmatprep.subr.mxu1 %v1315_v58  ;;  %v1224_v58 = vld [vmem:[%s5299_s7 + $0x3b0] sm:$0xff] }
 0x30d   :  { %1982 = vmatprep.subr.mxu0 %v1419_v59  ;;  %2252 = vmatpush3.msra.mxu1 %v1203_v60  ;;  %v1552_v59 = vld [vmem:[%s5299_s7 + $0xdf0] sm:$0xff] }
 0x30e   :  { %2117 = vmatprep.mubr.f32.mxu1 %v4168_v30  ;;  %1983 = vmatpush1.msra.mxu0 %v1418_v61  ;;  %v1294_v30 = vld [vmem:[%s5299_s7 + $0x5e0] sm:$0xff]  ;;  %v1112_v60 = vld [vmem:[%s5299_s7 + $0x30] sm:$0xff]  ;;  %v1551_v61 = vld [vmem:[%s5299_s7 + $0xde8] sm:$0xff] }
 0x30f   :  { %2253 = vmatprep.subr.mxu1 %v1308_v62  ;;  %1984 = vmatprep.subr.mxu0 %v1412_v63  ;;  %v4981_v62 = vld [vmem:[%s5299_s7 + $0xdf8] sm:$0xff] }
 0x310   :  { %2254 = vmatpush3.msra.mxu1 %v1196_v0  ;;  %1985 = vmatpush1.msra.mxu0 %v1411_v1  ;;  %v1545_v63 = vld [vmem:[%s5299_s7 + $0xdb8] sm:$0xff]  ;;  %v1544_v1 = vld [vmem:[%s5299_s7 + $0xdb0] sm:$0xff] }
 0x311   :  { %2255 = vmatprep.subr.mxu1 %v1301_v3  ;;  %1986 = vmatprep.subr.mxu0 %v1405_v27  ;;  %v4989_v0 = vld [vmem:[%s5299_s7 + $0xa78] sm:$0xff]  ;;  %v4999_v3 = vld [vmem:[%s5299_s7 + $0xdc0] sm:$0xff] }
 0x312   :  { %2256 = vmatpush3.msra.mxu1 %v1189_v28  ;;  %1987 = vmatpush1.msra.mxu0 %v1404_v46  ;;  %v1538_v27 = vld [vmem:[%s5299_s7 + $0xd80] sm:$0xff]  ;;  %v5017_v46 = vld [vmem:[%s5299_s7 + $0xd88] sm:$0xff] }
 0x313   :  { %2257 = vmatprep.subr.mxu1 %v1294_v30  ;;  %1988 = vmatprep.subr.mxu0 %v1398_v47  ;;  %v5008_v28 = vld [vmem:[%s5299_s7 + $0xa40] sm:$0xff]  ;;  %v5026_v30 = vld [vmem:[%s5299_s7 + $0xa08] sm:$0xff] }
 0x314   :  { %2258 = vmatpush3.msra.mxu1 %v1182_v50  ;;  %1989 = vmatpush1.msra.mxu0 %v1397_v51  ;;  %v1530_v47 = vld [vmem:[%s5299_s7 + $0xd40] sm:$0xff]  ;;  %v5037_v50 = vld [vmem:[%s5299_s7 + $0xd50] sm:$0xff] }
 0x315   :  { %2259 = vmatprep.subr.mxu1 %v1287_v5  ;;  %1990 = vmatprep.subr.mxu0 %v1391_v6  ;;  %v1524_v51 = vld [vmem:[%s5299_s7 + $0xd10] sm:$0xff]  ;;  %v5055_v6 = vld [vmem:[%s5299_s7 + $0xd18] sm:$0xff] }
 0x316   :  { %2260 = vmatpush3.msra.mxu1 %v1175_v9  ;;  %1991 = vmatpush1.msra.mxu0 %v1390_v11  ;;  %v5046_v5 = vld [vmem:[%s5299_s7 + $0x9d0] sm:$0xff]  ;;  %v1517_v9 = vld [vmem:[%s5299_s7 + $0xcd8] sm:$0xff] }
 0x317   :  { %2261 = vmatprep.subr.mxu1 %v1280_v12  ;;  %1992 = vmatprep.subr.mxu0 %v1384_v13  ;;  %v5064_v11 = vld [vmem:[%s5299_s7 + $0x998] sm:$0xff]  ;;  %v1516_v12 = vld [vmem:[%s5299_s7 + $0xcd0] sm:$0xff]  ;;  %v5073_v13 = vld [vmem:[%s5299_s7 + $0xce0] sm:$0xff] }
 0x318   :  { %2262 = vmatpush3.msra.mxu1 %v1168_v14  ;;  %1993 = vmatpush1.msra.mxu0 %v1383_v15  ;;  %v1510_v14 = vld [vmem:[%s5299_s7 + $0xca0] sm:$0xff] }
 0x319   :  { %2263 = vmatprep.subr.mxu1 %v1273_v16  ;;  %1994 = vmatprep.subr.mxu0 %v1377_v17  ;;  %v5082_v15 = vld [vmem:[%s5299_s7 + $0x960] sm:$0xff]  ;;  %v1509_v16 = vld [vmem:[%s5299_s7 + $0xc98] sm:$0xff]  ;;  %v5091_v17 = vld [vmem:[%s5299_s7 + $0xca8] sm:$0xff] }
 0x31a   :  { %2264 = vmatpush3.msra.mxu1 %v1161_v18  ;;  %1995 = vmatpush1.msra.mxu0 %v1376_v20  ;;  %v1503_v18 = vld [vmem:[%s5299_s7 + $0xc68] sm:$0xff] }
 0x31b   :  { %2265 = vmatprep.subr.mxu1 %v1266_v22  ;;  %1996 = vmatprep.subr.mxu0 %v1370_v23  ;;  %v5100_v20 = vld [vmem:[%s5299_s7 + $0x928] sm:$0xff]  ;;  %v1502_v22 = vld [vmem:[%s5299_s7 + $0xc60] sm:$0xff]  ;;  %v5109_v23 = vld [vmem:[%s5299_s7 + $0xc70] sm:$0xff] }
 0x31c   :  { %2266 = vmatpush3.msra.mxu1 %v1154_v24  ;;  %1997 = vmatpush1.msra.mxu0 %v1369_v25  ;;  %v1496_v24 = vld [vmem:[%s5299_s7 + $0xc30] sm:$0xff] }
 0x31d   :  { %2267 = vmatprep.subr.mxu1 %v1259_v26  ;;  %1998 = vmatprep.subr.mxu0 %v1363_v29  ;;  %v5118_v25 = vld [vmem:[%s5299_s7 + $0x8f0] sm:$0xff]  ;;  %v1495_v26 = vld [vmem:[%s5299_s7 + $0xc28] sm:$0xff]  ;;  %v5127_v29 = vld [vmem:[%s5299_s7 + $0xc38] sm:$0xff] }
 0x31e   :  { %2268 = vmatpush3.msra.mxu1 %v1147_v31  ;;  %1999 = vmatpush1.msra.mxu0 %v1362_v33  ;;  %v1489_v31 = vld [vmem:[%s5299_s7 + $0xbf8] sm:$0xff] }
 0x31f   :  { %2269 = vmatprep.subr.mxu1 %v1252_v34  ;;  %2000 = vmatprep.subr.mxu0 %v1356_v35  ;;  %v5136_v33 = vld [vmem:[%s5299_s7 + $0x8b8] sm:$0xff]  ;;  %v1488_v34 = vld [vmem:[%s5299_s7 + $0xbf0] sm:$0xff]  ;;  %v5145_v35 = vld [vmem:[%s5299_s7 + $0xc00] sm:$0xff] }
 0x320   :  { %2270 = vmatpush3.msra.mxu1 %v1140_v36  ;;  %2001 = vmatpush1.msra.mxu0 %v1355_v37  ;;  %v1482_v36 = vld [vmem:[%s5299_s7 + $0xbc0] sm:$0xff] }
 0x321   :  { %2271 = vmatprep.subr.mxu1 %v1245_v40  ;;  %2002 = vmatprep.subr.mxu0 %v1349_v42  ;;  %v5154_v37 = vld [vmem:[%s5299_s7 + $0x880] sm:$0xff]  ;;  %v1481_v40 = vld [vmem:[%s5299_s7 + $0xbb8] sm:$0xff]  ;;  %v5163_v42 = vld [vmem:[%s5299_s7 + $0xbc8] sm:$0xff] }
 0x322   :  { %2272 = vmatpush3.msra.mxu1 %v1133_v44  ;;  %2003 = vmatpush1.msra.mxu0 %v1348_v48  ;;  %v1475_v44 = vld [vmem:[%s5299_s7 + $0xb88] sm:$0xff] }
 0x323   :  { %2273 = vmatprep.subr.mxu1 %v1238_v49  ;;  %2004 = vmatprep.subr.mxu0 %v1342_v52  ;;  %v5172_v48 = vld [vmem:[%s5299_s7 + $0x848] sm:$0xff]  ;;  %v1474_v49 = vld [vmem:[%s5299_s7 + $0xb80] sm:$0xff]  ;;  %v5181_v52 = vld [vmem:[%s5299_s7 + $0xb90] sm:$0xff] }
 0x324   :  { %2274 = vmatpush3.msra.mxu1 %v1126_v53  ;;  %2005 = vmatpush1.msra.mxu0 %v1341_v54  ;;  %v1468_v53 = vld [vmem:[%s5299_s7 + $0xb50] sm:$0xff] }
 0x325   :  { %2275 = vmatprep.subr.mxu1 %v1231_v55  ;;  %2006 = vmatprep.subr.mxu0 %v1335_v8  ;;  %v5190_v54 = vld [vmem:[%s5299_s7 + $0x810] sm:$0xff]  ;;  %v1467_v55 = vld [vmem:[%s5299_s7 + $0xb48] sm:$0xff]  ;;  %v1469_v8 = vld [vmem:[%s5299_s7 + $0xb58] sm:$0xff] }
 0x326   :  { %2276 = vmatpush3.msra.mxu1 %v1119_v56  ;;  %2007 = vmatpush1.msra.mxu0 %v1334_v57  ;;  %v1461_v56 = vld [vmem:[%s5299_s7 + $0xb18] sm:$0xff] }
 0x327   :  { %2277 = vmatprep.subr.mxu1 %v1224_v58  ;;  %2008 = vmatprep.subr.mxu0 %v1552_v59  ;;  %v1357_v57 = vld [vmem:[%s5299_s7 + $0x7d8] sm:$0xff]  ;;  %v1460_v58 = vld [vmem:[%s5299_s7 + $0xb10] sm:$0xff]  ;;  %v1462_v59 = vld [vmem:[%s5299_s7 + $0xb20] sm:$0xff] }
 0x328   :  { %2278 = vmatpush3.msra.mxu1 %v1112_v60  ;;  %2009 = vmatpush2.msra.mxu0 %v1551_v61  ;;  %v1454_v60 = vld [vmem:[%s5299_s7 + $0xae0] sm:$0xff] }
 0x329   :  { %2118 = vmatmul.mubr.f32.vlgmr.msra.gmra.mxu1 %v4173_v32  ;;  %2323 = vmatprep.subr.mxu1 %v4981_v62  ;;  %v1537_v32 = vld [vmem:[%s5299_s7 + $0xd78] sm:$0xff]  ;;  %v1350_v61 = vld [vmem:[%s5299_s7 + $0x7a0] sm:$0xff] }
 0x32a   :  { %2010 = vmatprep.subr.mxu0 %v1545_v63  ;;  %2122 = vmatprep.mubr.f32.mxu1 %v4194_v45  ;;  %v1531_v45 = vld [vmem:[%s5299_s7 + $0xd48] sm:$0xff]  ;;  %v1453_v63 = vld [vmem:[%s5299_s7 + $0xad8] sm:$0xff] }
 0x32b   :  { %2339 = vmatpush3.msra.mxu1 %v4989_v0  ;;  %2011 = vmatpush2.msra.mxu0 %v1544_v1  ;;  %v1455_v1 = vld [vmem:[%s5299_s7 + $0xae8] sm:$0xff] }
 0x32c   :  { %2324 = vmatprep.subr.mxu1 %v4999_v3  ;;  %2012 = vmatprep.subr.mxu0 %v1538_v27  ;;  %v1447_v27 = vld [vmem:[%s5299_s7 + $0xaa8] sm:$0xff] }
 0x32d   :  { %2340 = vmatpush3.msra.mxu1 %v5008_v28  ;;  %2013 = vmatpush2.msra.mxu0 %v1537_v32  ;;  %v1343_v32 = vld [vmem:[%s5299_s7 + $0x768] sm:$0xff] }
 0x32e   :  { %2123 = vmatmul.mubr.f32.gmra.mxu1 %v4189_v43  ;;  %2325 = vmatprep.subr.mxu1 %v5017_v46  ;;  %v1523_v43 = vld [vmem:[%s5299_s7 + $0xd08] sm:$0xff] }
 0x32f   :  { %2014 = vmatprep.subr.mxu0 %v1531_v45  ;;  %2341 = vmatpush3.msra.mxu1 %v5026_v30  ;;  %v1446_v45 = vld [vmem:[%s5299_s7 + $0xaa0] sm:$0xff] }
 0x330   :  { %2197 = vmatprep.mubr.f32.mxu1 %v4413_v19  ;;  %2015 = vmatpush2.msra.mxu0 %v1530_v47  ;;  %v1448_v47 = vld [vmem:[%s5299_s7 + $0xab0] sm:$0xff] }
 0x331   :  { %2326 = vmatprep.subr.mxu1 %v5037_v50  ;;  %2016 = vmatprep.subr.mxu0 %v1524_v51  ;;  %v1336_v51 = vld [vmem:[%s5299_s7 + $0x730] sm:$0xff] }
 0x332   :  { %2342 = vmatpush3.msra.mxu1 %v5046_v5  ;;  %2017 = vmatpush2.msra.mxu0 %v1523_v43 }
 0x333   :  { %2327 = vmatprep.subr.mxu1 %v5055_v6  ;;  %2018 = vmatprep.subr.mxu0 %v1517_v9 }
 0x334   :  { %2343 = vmatpush3.msra.mxu1 %v5064_v11  ;;  %2019 = vmatpush2.msra.mxu0 %v1516_v12 }
 0x335   :  { %2328 = vmatprep.subr.mxu1 %v5073_v13  ;;  %2020 = vmatprep.subr.mxu0 %v1510_v14 }
 0x336   :  { %2344 = vmatpush3.msra.mxu1 %v5082_v15  ;;  %2021 = vmatpush2.msra.mxu0 %v1509_v16 }
 0x337   :  { %2329 = vmatprep.subr.mxu1 %v5091_v17  ;;  %2022 = vmatprep.subr.mxu0 %v1503_v18 }
 0x338   :  { %2345 = vmatpush3.msra.mxu1 %v5100_v20  ;;  %2023 = vmatpush2.msra.mxu0 %v1502_v22 }
 0x339   :  { %2330 = vmatprep.subr.mxu1 %v5109_v23  ;;  %2024 = vmatprep.subr.mxu0 %v1496_v24 }
 0x33a   :  { %2346 = vmatpush3.msra.mxu1 %v5118_v25  ;;  %2025 = vmatpush2.msra.mxu0 %v1495_v26 }
 0x33b   :  { %2331 = vmatprep.subr.mxu1 %v5127_v29  ;;  %2026 = vmatprep.subr.mxu0 %v1489_v31 }
 0x33c   :  { %2347 = vmatpush3.msra.mxu1 %v5136_v33  ;;  %2027 = vmatpush2.msra.mxu0 %v1488_v34 }
 0x33d   :  { %2332 = vmatprep.subr.mxu1 %v5145_v35  ;;  %2028 = vmatprep.subr.mxu0 %v1482_v36 }
 0x33e   :  { %2348 = vmatpush3.msra.mxu1 %v5154_v37  ;;  %2029 = vmatpush2.msra.mxu0 %v1481_v40 }
 0x33f   :  { %2333 = vmatprep.subr.mxu1 %v5163_v42  ;;  %2030 = vmatprep.subr.mxu0 %v1475_v44 }
 0x340   :  { %2349 = vmatpush3.msra.mxu1 %v5172_v48  ;;  %2031 = vmatpush2.msra.mxu0 %v1474_v49 }
 0x341   :  { %2334 = vmatprep.subr.mxu1 %v5181_v52  ;;  %2032 = vmatprep.subr.mxu0 %v1468_v53 }
 0x342   :  { %2350 = vmatpush3.msra.mxu1 %v5190_v54  ;;  %2033 = vmatpush2.msra.mxu0 %v1467_v55 }
 0x343   :  { %2335 = vmatprep.subr.mxu1 %v1469_v8  ;;  %2034 = vmatprep.subr.mxu0 %v1461_v56  ;;  %v1574_v56 = vsub.s32 4, %v2957_v38 }
 0x344   :  { %2351 = vmatpush3.msra.mxu1 %v1357_v57  ;;  %2035 = vmatpush2.msra.mxu0 %v1460_v58  ;;  %v1578_v58 = vsub.s32 5, %v2957_v38 }
 0x345   :  { %2336 = vmatprep.subr.mxu1 %v1462_v59  ;;  %2036 = vmatprep.subr.mxu0 %v1454_v60 }
 0x346   :  { %2352 = vmatpush3.msra.mxu1 %v1350_v61  ;;  %2037 = vmatpush2.msra.mxu0 %v1453_v63 }
 0x347   :  { %2337 = vmatprep.subr.mxu1 %v1455_v1  ;;  %2038 = vmatprep.subr.mxu0 %v1447_v27  ;;  %v1582_v27 = vsub.s32 6, %v2957_v38 }
 0x348   :  { %2353 = vmatpush3.msra.mxu1 %v1343_v32  ;;  %2039 = vmatpush2.msra.mxu0 %v1446_v45 }
 0x349   :  { %2338 = vmatprep.subr.mxu1 %v1448_v47  ;;  %2041 = vmatmul.mubr.f32.vlgmr.msra.gmra.mxu0 %v4393_v10 }
 0x34a   :  { %2285 = vmatprep.subr.mxu0 %v4981_v62  ;;  %2354 = vmatpush3.msra.mxu1 %v1336_v51 }
 0x34b   :  { %2046 = vmatprep.mubr.f32.mxu0 %v4413_v19  ;;  %2286 = vmatpush3.msra.mxu0 %v4989_v0  ;;  %v1657_v19 = vpop.f32.mrf.mxu1 }
 0x34c   :  { %2198 = vmatmul.mubr.f32.vlgmr.msra.gmra.mxu1 %v4419_v21  ;;  %2287 = vmatprep.subr.mxu0 %v4999_v3 }
 0x34d   :  { %2288 = vmatpush3.msra.mxu0 %v5008_v28  ;;  %v1659_v0 = vpop.f32.mrf.mxu1 }
 0x34e   :  { %2047 = vmatmul.mubr.f32.gmra.mxu0 %v4419_v21  ;;  %2289 = vmatprep.subr.mxu0 %v5017_v46 }
 0x34f   :  { %2290 = vmatpush3.msra.mxu0 %v5026_v30  ;;  %2192 = vmatprep.mubr.f32.mxu0 %v4387_v7  ;;  %v5273_v7 = vld [vmem:[%s5300_s8] sm:$0xff]  ;;  %v1663_v28 = vpop.f32.mrf.mxu1  ;;  %s2410_s8 = smov [#allocation2]  }
 0x350   :  { %2291 = vmatprep.subr.mxu0 %v5037_v50  ;;  %v1559_v21 = vrot.slane %v5273_v7, %v2960_v39  ;;  %v1563_v62 = vrot.slane %v5273_v7, %v2966_v41  ;;  %v1567_v18 = vrot.slane %v5273_v7, %v3355_v2  ;;  %v1571_v22 = vrot.slane %v5273_v7, %v3361_v4  ;;  %s2236_s12 = sshll.u32 %s2410_s8, 4  ;;  %s2237_s12 = int_to_ptr.vmem [resolvable:$true] %s2236_s12 }
 0x351   :  { %2292 = vmatpush3.msra.mxu0 %v5046_v5  ;;  %s2387_s13 = scalar_lea.vmem %s2237_s12, 1792  ;;  %p2392_p1 = scmp.lt.s32.totalorder %s2237_s12, %s2237_s12 }
 0x352   :  { %2293 = vmatprep.subr.mxu0 %v5055_v6  ;;  %v1658_v3 = vadd.f32 %v1657_v19, %v1559_v21  ;;  %v1660_v30 = vadd.f32 %v1659_v0, %v1563_v62  ;;  %v1664_v6 = vadd.f32 %v1663_v28, %v1559_v21  ;;  %p2388_p0 = scmp.ne.s32.totalorder %s2237_s12, %s2387_s13  ;;  %p2393_p2 = scmp.lt.s32.totalorder %s2387_s13, %s2387_s13 }
 0x353   :  { %2294 = vmatpush3.msra.mxu0 %v5064_v11 }
 0x354   :  { %2295 = vmatprep.subr.mxu0 %v5073_v13  ;;  %p2394_p3 = por %p2393_p2, %p2392_p1 }
 0x355   :  { %2296 = vmatpush3.msra.mxu0 %v5082_v15 }
 0x356   :  { %2297 = vmatprep.subr.mxu0 %v5091_v17  ;;  %p2395_p4 = pnand %p2394_p3, %p2388_p0 }
 0x357   :  { %2298 = vmatpush3.msra.mxu0 %v5100_v20 }
 0x358   :  { %2299 = vmatprep.subr.mxu0 %v5109_v23 }
 0x359   :  { %2300 = vmatpush3.msra.mxu0 %v5118_v25 }
 0x35a   :  { %2301 = vmatprep.subr.mxu0 %v5127_v29 }
 0x35b   :  { %2302 = vmatpush3.msra.mxu0 %v5136_v33 }
 0x35c   :  { %2303 = vmatprep.subr.mxu0 %v5145_v35 }
 0x35d   :  { %2304 = vmatpush3.msra.mxu0 %v5154_v37 }
 0x35e   :  { %2305 = vmatprep.subr.mxu0 %v5163_v42 }
 0x35f   :  { %2306 = vmatpush3.msra.mxu0 %v5172_v48 }
 0x360   :  { %2307 = vmatprep.subr.mxu0 %v5181_v52 }
 0x361   :  { %2308 = vmatpush3.msra.mxu0 %v5190_v54 }
 0x362   :  { %2309 = vmatprep.subr.mxu0 %v1469_v8 }
 0x363   :  { %2310 = vmatpush3.msra.mxu0 %v1357_v57 }
 0x364   :  { %2311 = vmatprep.subr.mxu0 %v1462_v59  ;;  %v1575_v59 = vrot.slane %v5273_v7, %v1574_v56 }
 0x365   :  { %2312 = vmatpush3.msra.mxu0 %v1350_v61  ;;  %v1579_v61 = vrot.slane %v5273_v7, %v1578_v58 }
 0x366   :  { %2313 = vmatprep.subr.mxu0 %v1455_v1 }
 0x367   :  { %2314 = vmatpush3.msra.mxu0 %v1343_v32 }
 0x368   :  { %2315 = vmatprep.subr.mxu0 %v1448_v47 }
 0x369   :  { %2316 = vmatpush3.msra.mxu0 %v1336_v51 }
 0x36a   :  { %2193 = vmatmul.mubr.f32.vlgmr.msra.gmra.mxu0 %v4393_v10  ;;  %v1665_v10 = vpop.f32.mrf.mxu1 }
 0x36b   :  { %v1666_v11 = vadd.f32 %v1665_v10, %v1563_v62 }
 0x380   :  { %v1811_v17 = vpop.f32.mrf.mxu1 }
 0x381   :  { %v1812_v23 = vadd.f32 %v1811_v17, %v1567_v18 }
 0x382   :  { %v1813_v20 = vpop.f32.mrf.mxu1 }
 0x383   :  { %v1734_v46 = vpop.f32.mrf.mxu0  ;;  %v1814_v26 = vadd.f32 %v1813_v20, %v1571_v22 }
 0x384   :  { %v1735_v50 = vadd.f32 %v1734_v46, %v1658_v3  ;;  %v1817_v24 = vpop.f32.mrf.mxu1  ;;  %v1583_v3 = vrot.slane %v5273_v7, %v1582_v27 }
 0x385   :  { %v1736_v5 = vpop.f32.mrf.mxu0  ;;  %v1818_v35 = vadd.f32 %v1817_v24, %v1567_v18 }
 0x386   :  { %2359 = vtanh.f32 %v1735_v50  ;;  %v1737_v43 = vadd.f32 %v1736_v5, %v1660_v30  ;;  %v1819_v33 = vpop.f32.mrf.mxu1 }
 0x387   :  { %v1820_v37 = vadd.f32 %v1819_v33, %v1571_v22 }
 0x388   :  { %2361 = vtanh.f32 %v1737_v43  ;;  %v1740_v9 = vpop.f32.mrf.mxu0 }
 0x389   :  { %v1741_v12 = vadd.f32 %v1740_v9, %v1664_v6 }
 0x38a   :  { %v1742_v13 = vpop.f32.mrf.mxu0 }
 0x38b   :  { %2363 = vtanh.f32 %v1741_v12  ;;  %v1743_v39 = vadd.f32 %v1742_v13, %v1666_v11 }
 0x38d   :  { %2365 = vtanh.f32 %v1743_v39 }
 0x393   :  { %v2360_v41 = vpop.eup %2359 }
 0x394   :  { %2217 = vst [vmem:[#allocation2] sm:$0xff] %v2360_v41 }
 0x395   :  { %v2362_v14 = vpop.eup %2361 }
 0x396   :  { %2218 = vst [vmem:[#allocation2 + $0x8] sm:$0xff] %v2362_v14 }
 0x398   :  { %v2364_v15 = vpop.eup %2363 }
 0x399   :  { %2224 = vst [vmem:[#allocation2 + $0x38] sm:$0xff] %v2364_v15 }
 0x39a   :  { %v2366_v16 = vpop.eup %2365 }
 0x39b   :  { %2225 = vst [vmem:[#allocation2 + $0x40] sm:$0xff] %v2366_v16 }
 0x3c4   :  { %v1888_v25 = vpop.f32.mrf.mxu0 }
 0x3c5   :  { %v1889_v29 = vadd.f32 %v1888_v25, %v1812_v23  ;;  %v1965_v52 = vpop.f32.mrf.mxu1 }
 0x3c6   :  { %v1890_v31 = vpop.f32.mrf.mxu0  ;;  %v1966_v63 = vadd.f32 %v1965_v52, %v1575_v59 }
 0x3c7   :  { %2367 = vtanh.f32 %v1889_v29  ;;  %v1891_v34 = vadd.f32 %v1890_v31, %v1814_v26  ;;  %v1967_v53 = vpop.f32.mrf.mxu1 }
 0x3c8   :  { %v1968_v45 = vadd.f32 %v1967_v53, %v1579_v61 }
 0x3c9   :  { %2369 = vtanh.f32 %v1891_v34  ;;  %v1894_v36 = vpop.f32.mrf.mxu0 }
 0x3ca   :  { %v1895_v40 = vadd.f32 %v1894_v36, %v1818_v35 }
 0x3cb   :  { %v1896_v42 = vpop.f32.mrf.mxu0  ;;  %v1971_v54 = vpop.f32.mrf.mxu1 }
 0x3cc   :  { %2371 = vtanh.f32 %v1895_v40  ;;  %v1897_v2 = vadd.f32 %v1896_v42, %v1820_v37  ;;  %v1972_v0 = vadd.f32 %v1971_v54, %v1575_v59 }
 0x3cd   :  { %v1973_v55 = vpop.f32.mrf.mxu1 }
 0x3ce   :  { %2373 = vtanh.f32 %v1897_v2  ;;  %v1974_v30 = vadd.f32 %v1973_v55, %v1579_v61 }
 0x3d4   :  { %v2368_v44 = vpop.eup %2367 }
 0x3d5   :  { %2219 = vst [vmem:[#allocation2 + $0x10] sm:$0xff] %v2368_v44 }
 0x3d6   :  { %v2370_v4 = vpop.eup %2369 }
 0x3d7   :  { %2220 = vst [vmem:[#allocation2 + $0x18] sm:$0xff] %v2370_v4 }
 0x3d9   :  { %v2372_v48 = vpop.eup %2371 }
 0x3da   :  { %2226 = vst [vmem:[#allocation2 + $0x48] sm:$0xff] %v2372_v48 }
 0x3db   :  { %v2374_v49 = vpop.eup %2373 }
 0x3dc   :  { %2227 = vst [vmem:[#allocation2 + $0x50] sm:$0xff] %v2374_v49 }
 0x3e9   :  { %v2279_v8 = vpop.f32.mrf.mxu1 }
 0x3eb   :  { %v2280_v57 = vpop.f32.mrf.mxu1 }
 0x3ec   :  { %v2281_v39 = vadd.f32 %v2280_v57, %v2279_v8 }
 0x3ee   :  { %v2282_v60 = vpop.f32.mrf.mxu1  ;;  %v2120_v15 = vadd.f32 %v2281_v39, %v1583_v3 }
 0x3f0   :  { %v2283_v1 = vpop.f32.mrf.mxu1 }
 0x3f1   :  { %v2284_v51 = vadd.f32 %v2283_v1, %v2282_v60 }
 0x3f3   :  { %v2125_v50 = vadd.f32 %v2284_v51, %v1583_v3 }
 0x409   :  { %v2042_v32 = vpop.f32.mrf.mxu0 }
 0x40a   :  { %v2043_v47 = vadd.f32 %v2042_v32, %v1966_v63 }
 0x40b   :  { %v2044_v19 = vpop.f32.mrf.mxu0 }
 0x40c   :  { %2375 = vtanh.f32 %v2043_v47  ;;  %v2320_v21 = vpop.f32.mrf.mxu1  ;;  %v2045_v62 = vadd.f32 %v2044_v19, %v1968_v45 }
 0x40e   :  { %2377 = vtanh.f32 %v2045_v62  ;;  %v2321_v28 = vpop.f32.mrf.mxu1  ;;  %v2048_v46 = vpop.f32.mrf.mxu0 }
 0x40f   :  { %v2322_v5 = vadd.f32 %v2321_v28, %v2320_v21  ;;  %v2049_v10 = vadd.f32 %v2048_v46, %v1972_v0 }
 0x410   :  { %v2050_v43 = vpop.f32.mrf.mxu0 }
 0x411   :  { %v2200_v38 = vadd.f32 %v2322_v5, %v2125_v50  ;;  %2379 = vtanh.f32 %v2049_v10  ;;  %v2051_v6 = vadd.f32 %v2050_v43, %v1974_v30 }
 0x413   :  { %2381 = vtanh.f32 %v2200_v38 }
 0x414   :  { %2383 = vtanh.f32 %v2051_v6 }
 0x419   :  { %v2376_v9 = vpop.eup %2375 }
 0x41a   :  { %2221 = vst [vmem:[#allocation2 + $0x20] sm:$0xff] %v2376_v9 }
 0x41b   :  { %v2378_v11 = vpop.eup %2377 }
 0x41c   :  { %2222 = vst [vmem:[#allocation2 + $0x28] sm:$0xff] %v2378_v11 }
 0x41e   :  { %v2380_v12 = vpop.eup %2379 }
 0x41f   :  { %2228 = vst [vmem:[#allocation2 + $0x58] sm:$0xff] %v2380_v12 }
 0x420   :  { %v2382_v7 = vpop.eup %2381 }
 0x421   :  { %v2384_v13 = vpop.eup %2383  ;;  %2230 = vst [vmem:[#allocation2 + $0x68] sm:$0xff] %v2382_v7 }
 0x422   :  { %2229 = vst [vmem:[#allocation2 + $0x60] sm:$0xff] %v2384_v13 }
 0x42a   :  { %v2317_v41 = vpop.f32.mrf.mxu0 }
 0x42c   :  { %v2318_v14 = vpop.f32.mrf.mxu0 }
 0x42d   :  { %v2319_v16 = vadd.f32 %v2318_v14, %v2317_v41 }
 0x42f   :  { %v2195_v17 = vadd.f32 %v2319_v16, %v2120_v15 }
 0x431   :  { %2385 = vtanh.f32 %v2195_v17 }
 0x43e   :  { %v2386_v18 = vpop.eup %2385 }
 0x43f   :  { %2223 = vst [vmem:[#allocation2 + $0x30] sm:$0xff] %v2386_v18 }
 0x440   :  { %2398 = shalt.err (!%p2395_p4)
}
 0x441   :  { %s2411_s14 = smov 896   ;;  %s2412_s15 = smov 56  }
 0x442   :  { %2242 = dma.vmem_to_hbm [thread:$0]  %s2237_s12, 1792, %s5301_s9, [#allocation3], %s2411_s14, %s2411_s14, %s2412_s15  }
 0x443   :  { %2407 = dma.done.wait [#allocation3], 1792  }
 0x444   :  { %2408 = vsyncadd [#allocation3], 4294965504 }
 0x445   :  { %2246 = vsyncpa [#allocation3], 1 }

</bundles_post_ra>
